<compile_context>
chip_gen: v7x
topology: tpu7x:2x2x1
jax: 0.10.0
libtpu: 0.0.40
codegen_flags: <defaults>
</compile_context>

<pallas_src>
import functools

import numpy as np
import jax
import jax.numpy as jnp
from jax import lax
from jax.experimental import pallas as pl
from jax.experimental.pallas import tpu as pltpu


def _round_up(x, m):
    return -(-x // m) * m


def _pick_vmem_limit():
    cap = 64 * 1024 * 1024
    try:
        cap = int(pltpu.get_tpu_info().vmem_capacity_bytes)
    except Exception:
        pass
    return max(32 * 1024 * 1024, min((cap * 3) // 4, 100 * 1024 * 1024))


def deconv2d_batchnorm_relu(x, w_t, bias, gamma, beta, *, stride, padding, eps=1e-5):
    """ConvTranspose2d(stride, padding, bias) + BatchNorm2d (train-mode batch stats) + ReLU."""
    N, C_in, H, W = x.shape
    C_in_w, C_out, kH, kW = w_t.shape
    assert C_in == C_in_w
    s, p = int(stride), int(padding)
    H_out = (H - 1) * s - 2 * p + kH
    W_out = (W - 1) * s - 2 * p + kW
    assert H_out > 0 and W_out > 0

    # ---- static sub-pixel decomposition parameters ----
    T_h = -(-kH // s)                 # taps per phase (rows / cols)
    T_w = -(-kW // s)
    T_taps = T_h * T_w
    Uh = -(-H_out // s)               # per-phase output extent (upper bound)
    Uw = -(-W_out // s)
    n_phases = s * s

    def _phase(r):
        ph = (r + p) % s
        d = (r + p - ph) // s
        return ph, d

    d_h = [_phase(r)[1] for r in range(s)]
    d_w = [_phase(r)[1] for r in range(s)]
    pad_lo_h = max(0, max(T_h - 1 - d for d in d_h))
    pad_hi_h = max(0, max(Uh - 1 + d - (H - 1) for d in d_h))
    pad_lo_w = max(0, max(T_w - 1 - d for d in d_w))
    pad_hi_w = max(0, max(Uw - 1 + d - (W - 1) for d in d_w))
    Hp = H + pad_lo_h + pad_hi_h
    Wp = W + pad_lo_w + pad_hi_w

    L = Uh * Wp                               # per-phase flat output length (row stride = Wp)
    C_in_p = max(8, _round_up(C_in, 8))       # friendlier MXU contraction dim
    C_out_p = max(16, _round_up(C_out, 16))   # full (16,128) bf16 sublane tiles on stores

    # ---- static tap offsets, per-(phase,tap) weight slices, per-phase validity mask ----
    tap_off = []          # [phase][tap] -> flat offset into the padded image
    w_rows = []           # n_phases*T_taps entries of (C_out, C_in)
    mask_np = np.zeros((n_phases, 1, L), np.float32)
    for r_h in range(s):
        ph_h, dh = _phase(r_h)
        Uh_valid = max(0, -(-(H_out - r_h) // s))
        for r_w in range(s):
            ph_w, dw = _phase(r_w)
            Uw_valid = max(0, -(-(W_out - r_w) // s))
            offs = []
            for jh in range(T_h):
                kh = ph_h + s * jh
                sh = dh - jh + pad_lo_h
                for jw in range(T_w):
                    kw_ = ph_w + s * jw
                    sw = dw - jw + pad_lo_w
                    offs.append(sh * Wp + sw)
                    if kh < kH and kw_ < kW:
                        w_rows.append(w_t[:, :, kh, kw_].T)            # (C_out, C_in)
                    else:
                        w_rows.append(jnp.zeros((C_out, C_in), w_t.dtype))
            tap_off.append(offs)
            m2d = np.zeros((Uh, Wp), np.float32)
            m2d[:Uh_valid, :Uw_valid] = 1.0
            mask_np[r_h * s + r_w, 0, :] = m2d.reshape(-1)

    max_off = max(max(o) for o in tap_off)
    Lp = _round_up(max(Hp * Wp, max_off + L), 128)

    # ---- one cheap layout pass over x (no k^2 duplication): pad, flatten, cast to bf16 ----
    x_pad = jnp.pad(x, ((0, 0), (0, 0), (pad_lo_h, pad_hi_h), (pad_lo_w, pad_hi_w)))
    x_flat = x_pad.reshape(N, C_in, Hp * Wp)
    x_flat = jnp.pad(x_flat, ((0, 0), (0, C_in_p - C_in), (0, Lp - Hp * Wp)))
    x_flat = x_flat.astype(jnp.bfloat16)

    w_all = jnp.stack(w_rows, axis=0)                                   # (P*T, C_out, C_in)
    w_all = jnp.pad(w_all, ((0, 0), (0, C_out_p - C_out), (0, C_in_p - C_in)))
    w_all = w_all.astype(jnp.bfloat16)
    mask = jnp.asarray(mask_np)

    count_img = float(H_out * W_out)          # valid output pixels per image per channel
    inv_count_img = 1.0 / count_img
    vmem_limit = _pick_vmem_limit()

    def _phase_conv(x_ref, w_ref, ph):
        """f32 (bias-less) conv-transpose output of one phase for the resident image."""
        acc = None
        for t in range(T_taps):
            off = tap_off[ph][t]                               # static python int
            xs = x_ref[:, off:off + L]                         # (C_in_p, L) bf16
            wt = w_ref[ph * T_taps + t]                        # (C_out_p, C_in_p) bf16
            c = jnp.dot(wt, xs, preferred_element_type=jnp.float32)
            acc = c if acc is None else acc + c
        return acc                                             # (C_out_p, L) f32

    # ---- pass 1: per-image BN statistics (sum + centered sum of squares) ----
    def _stats_kernel(x_ref, w_ref, mask_ref, sum_ref, css_ref):
        total = jnp.zeros((C_out_p, 1), jnp.float32)
        for ph in range(n_phases):
            y = _phase_conv(x_ref, w_ref, ph)
            total = total + jnp.sum(y * mask_ref[ph], axis=1, keepdims=True)
        sum_ref[...] = total
        mean_img = total * inv_count_img
        css = jnp.zeros((C_out_p, 1), jnp.float32)
        for ph in range(n_phases):
            y = _phase_conv(x_ref, w_ref, ph)                  # recompute: x stays in VMEM
            d = (y - mean_img) * mask_ref[ph]
            css = css + jnp.sum(d * d, axis=1, keepdims=True)
        css_ref[...] = css

    s1, css = pl.pallas_call(
        _stats_kernel,
        out_shape=(
            jax.ShapeDtypeStruct((N, C_out_p, 1), jnp.float32),
            jax.ShapeDtypeStruct((N, C_out_p, 1), jnp.float32),
        ),
        grid_spec=pltpu.PrefetchScalarGridSpec(
            num_scalar_prefetch=0,
            grid=(N,),
            in_specs=[
                pl.BlockSpec((None, C_in_p, Lp), lambda n: (n, 0, 0)),
                pl.BlockSpec((n_phases * T_taps, C_out_p, C_in_p), lambda n: (0, 0, 0)),
                pl.BlockSpec((n_phases, 1, L), lambda n: (0, 0, 0)),
            ],
            out_specs=(
                pl.BlockSpec((None, C_out_p, 1), lambda n: (n, 0, 0)),
                pl.BlockSpec((None, C_out_p, 1), lambda n: (n, 0, 0)),
            ),
        ),
        compiler_params=pltpu.CompilerParams(
            dimension_semantics=("parallel",), vmem_limit_bytes=vmem_limit),
    )(x_flat, w_all, mask)

    # ---- tiny scalar epilogue: pooled mean/var -> per-channel scale/shift ----
    total_count = float(N) * count_img
    sum_all = jnp.sum(s1[:, :, 0], axis=0)                    # (C_out_p,)
    mean_conv = sum_all / total_count
    img_means = s1[:, :, 0] * inv_count_img                   # (N, C_out_p)
    var = (jnp.sum(css[:, :, 0], axis=0)
           + count_img * jnp.sum((img_means - mean_conv[None, :]) ** 2, axis=0)) / total_count
    var = jnp.maximum(var, 0.0)
    inv_std = lax.rsqrt(var + eps)

    gamma_p = jnp.pad(gamma.astype(jnp.float32), (0, C_out_p - C_out), constant_values=1.0)
    beta_p = jnp.pad(beta.astype(jnp.float32), (0, C_out_p - C_out))
    # y = conv + bias; train-mode BN subtracts mean(y) = mean(conv) + bias, so `bias` cancels
    # exactly and is not needed anywhere in the compute.
    scale2 = (gamma_p * inv_std).reshape(C_out_p, 1)
    shift2 = (beta_p - gamma_p * inv_std * mean_conv).reshape(C_out_p, 1)

    # ---- pass 2: recompute conv (no y round trip through HBM) + fused BN affine + ReLU ----
    def _bnrelu_kernel(x_ref, w_ref, scale_ref, shift_ref, o_ref):
        sc = scale_ref[...]
        sh = shift_ref[...]
        for ph in range(n_phases):
            y = _phase_conv(x_ref, w_ref, ph)
            o_ref[ph] = jnp.maximum(y * sc + sh, 0.0).astype(o_ref.dtype)

    out4 = pl.pallas_call(
        _bnrelu_kernel,
        out_shape=jax.ShapeDtypeStruct((N, n_phases, C_out_p, L), jnp.bfloat16),
        grid_spec=pltpu.PrefetchScalarGridSpec(
            num_scalar_prefetch=0,
            grid=(N,),
            in_specs=[
                pl.BlockSpec((None, C_in_p, Lp), lambda n: (n, 0, 0)),
                pl.BlockSpec((n_phases * T_taps, C_out_p, C_in_p), lambda n: (0, 0, 0)),
                pl.BlockSpec((C_out_p, 1), lambda n: (0, 0)),
                pl.BlockSpec((C_out_p, 1), lambda n: (0, 0)),
            ],
            out_specs=pl.BlockSpec((None, n_phases, C_out_p, L), lambda n: (n, 0, 0, 0)),
        ),
        compiler_params=pltpu.CompilerParams(
            dimension_semantics=("parallel",), vmem_limit_bytes=vmem_limit),
    )(x_flat, w_all, scale2, shift2)

    # ---- single reshape/transpose re-interleave of the s*s phases (fused with f32 upcast) ----
    o = out4[:, :, :C_out, :].reshape(N, s, s, C_out, Uh, Wp)[..., :Uw]
    o = o.transpose(0, 3, 4, 1, 5, 2).reshape(N, C_out, Uh * s, Uw * s)
    return o[:, :, :H_out, :W_out].astype(jnp.float32)


if __name__ == "__main__":
    key = jax.random.PRNGKey(0)
    kx, kw, kb, kg, kbt = jax.random.split(key, 5)

    # shapes consistent with deconv2DBatchNormRelu(4, 8, 4, 2, 1)
    N, C_in, H, W = 2, 4, 16, 16
    C_out, k_size, stride, padding = 8, 4, 2, 1

    x = jax.random.normal(kx, (N, C_in, H, W), jnp.float32)
    w_t = 0.1 * jax.random.normal(kw, (C_in, C_out, k_size, k_size), jnp.float32)
    bias = 0.1 * jax.random.normal(kb, (C_out,), jnp.float32)
    gamma = 1.0 + 0.1 * jax.random.normal(kg, (C_out,), jnp.float32)
    beta = 0.1 * jax.random.normal(kbt, (C_out,), jnp.float32)

    fn = jax.jit(functools.partial(deconv2d_batchnorm_relu,
                                   stride=stride, padding=padding))
    out = jax.block_until_ready(fn(x, w_t, bias, gamma, beta))

    # ---- reference (pure JAX): ConvTranspose2d + train-mode BatchNorm2d + ReLU ----
    # Operands cast to bf16 (f32 accumulation) to match the kernel's MXU precision.
    w_conv = jnp.flip(w_t, axis=(2, 3)).transpose(1, 0, 2, 3)      # (C_out, C_in, kH, kW)
    y_ref = lax.conv_general_dilated(
        x.astype(jnp.bfloat16), w_conv.astype(jnp.bfloat16),
        window_strides=(1, 1),
        padding=[(k_size - 1 - padding, k_size - 1 - padding)] * 2,
        lhs_dilation=(stride, stride),
        dimension_numbers=("NCHW", "OIHW", "NCHW"),
        preferred_element_type=jnp.float32)
    y_ref = y_ref + bias[None, :, None, None]
    mu = y_ref.mean(axis=(0, 2, 3), keepdims=True)
    vr = y_ref.var(axis=(0, 2, 3), keepdims=True)
    ref = jnp.maximum((y_ref - mu) / jnp.sqrt(vr + 1e-5)
                      * gamma[None, :, None, None] + beta[None, :, None, None], 0.0)

    H_out = (H - 1) * stride - 2 * padding + k_size
    assert out.shape == ref.shape == (N, C_out, H_out, H_out), (out.shape, ref.shape)
    max_err = float(jnp.max(jnp.abs(out - ref)))
    if not jnp.allclose(out, ref, atol=2e-2, rtol=2e-2):
        raise AssertionError(f"Pallas output mismatch vs JAX reference (max abs err={max_err})")
    print("KERNEL_OK")
</pallas_src>

<mosaic_0001>
module attributes {stable_mosaic.version = 11 : i64} {
  func.func @_stats_kernel(%arg0: i32, %arg1: memref<1x8x384xbf16, #tpu.memory_space<vmem>>, %arg2: memref<16x16x8xbf16, #tpu.memory_space<vmem>>, %arg3: memref<4x1x288xf32, #tpu.memory_space<vmem>>, %arg4: memref<1x16x1xf32, #tpu.memory_space<vmem>>, %arg5: memref<1x16x1xf32, #tpu.memory_space<vmem>>) attributes {dimension_semantics = [#tpu.dimension_semantics<parallel>], iteration_bounds = array<i64: 2>, scalar_prefetch = 0 : i64, scratch_operands = 0 : i64, tpu.core_type = #tpu.core_type<tc>, window_params = [{transform_indices = @transform_0, window_bounds = array<i64: 1, 8, 384>}, {pipeline_mode = #tpu.pipeline_mode<synchronous>, transform_indices = @transform_1, window_bounds = array<i64: 16, 16, 8>}, {pipeline_mode = #tpu.pipeline_mode<synchronous>, transform_indices = @transform_2, window_bounds = array<i64: 4, 1, 288>}, {transform_indices = @transform_3, window_bounds = array<i64: 1, 16, 1>}, {transform_indices = @transform_4, window_bounds = array<i64: 1, 16, 1>}]} {
    %cst = arith.constant 0.000000e+00 : f32
    %0 = vector.broadcast %cst : f32 to vector<16x1xf32>
    %c0 = arith.constant 0 : index
    %c0_0 = arith.constant 0 : index
    %c19 = arith.constant 19 : index
    %1 = vector.load %arg1[%c0, %c0_0, %c19] : memref<1x8x384xbf16, #tpu.memory_space<vmem>>, vector<1x8x288xbf16>
    %2 = vector.shape_cast %1 : vector<1x8x288xbf16> to vector<8x288xbf16>
    %c0_1 = arith.constant 0 : index
    %c0_2 = arith.constant 0 : index
    %c0_3 = arith.constant 0 : index
    %3 = vector.load %arg2[%c0_1, %c0_2, %c0_3] : memref<16x16x8xbf16, #tpu.memory_space<vmem>>, vector<1x16x8xbf16>
    %4 = vector.shape_cast %3 : vector<1x16x8xbf16> to vector<16x8xbf16>
    %cst_4 = arith.constant dense<0.000000e+00> : vector<16x288xf32>
    %5 = tpu.matmul %4, %2, %cst_4 {dimension_numbers = #tpu.dot_dimension_numbers<[1], [0], [0], [1], [0, 0, 1, 1], [], []>} : vector<16x8xbf16>, vector<8x288xbf16>, vector<16x288xf32> -> vector<16x288xf32>
    %c0_5 = arith.constant 0 : index
    %c0_6 = arith.constant 0 : index
    %c18 = arith.constant 18 : index
    %6 = vector.load %arg1[%c0_5, %c0_6, %c18] : memref<1x8x384xbf16, #tpu.memory_space<vmem>>, vector<1x8x288xbf16>
    %7 = vector.shape_cast %6 : vector<1x8x288xbf16> to vector<8x288xbf16>
    %c1 = arith.constant 1 : index
    %c0_7 = arith.constant 0 : index
    %c0_8 = arith.constant 0 : index
    %8 = vector.load %arg2[%c1, %c0_7, %c0_8] : memref<16x16x8xbf16, #tpu.memory_space<vmem>>, vector<1x16x8xbf16>
    %9 = vector.shape_cast %8 : vector<1x16x8xbf16> to vector<16x8xbf16>
    %cst_9 = arith.constant dense<0.000000e+00> : vector<16x288xf32>
    %10 = tpu.matmul %9, %7, %cst_9 {dimension_numbers = #tpu.dot_dimension_numbers<[1], [0], [0], [1], [0, 0, 1, 1], [], []>} : vector<16x8xbf16>, vector<8x288xbf16>, vector<16x288xf32> -> vector<16x288xf32>
    %11 = arith.addf %5, %10 : vector<16x288xf32>
    %c0_10 = arith.constant 0 : index
    %c0_11 = arith.constant 0 : index
    %c1_12 = arith.constant 1 : index
    %12 = vector.load %arg1[%c0_10, %c0_11, %c1_12] : memref<1x8x384xbf16, #tpu.memory_space<vmem>>, vector<1x8x288xbf16>
    %13 = vector.shape_cast %12 : vector<1x8x288xbf16> to vector<8x288xbf16>
    %c2 = arith.constant 2 : index
    %c0_13 = arith.constant 0 : index
    %c0_14 = arith.constant 0 : index
    %14 = vector.load %arg2[%c2, %c0_13, %c0_14] : memref<16x16x8xbf16, #tpu.memory_space<vmem>>, vector<1x16x8xbf16>
    %15 = vector.shape_cast %14 : vector<1x16x8xbf16> to vector<16x8xbf16>
    %cst_15 = arith.constant dense<0.000000e+00> : vector<16x288xf32>
    %16 = tpu.matmul %15, %13, %cst_15 {dimension_numbers = #tpu.dot_dimension_numbers<[1], [0], [0], [1], [0, 0, 1, 1], [], []>} : vector<16x8xbf16>, vector<8x288xbf16>, vector<16x288xf32> -> vector<16x288xf32>
    %17 = arith.addf %11, %16 : vector<16x288xf32>
    %c0_16 = arith.constant 0 : index
    %c0_17 = arith.constant 0 : index
    %c0_18 = arith.constant 0 : index
    %18 = vector.load %arg1[%c0_16, %c0_17, %c0_18] : memref<1x8x384xbf16, #tpu.memory_space<vmem>>, vector<1x8x288xbf16>
    %19 = vector.shape_cast %18 : vector<1x8x288xbf16> to vector<8x288xbf16>
    %c3 = arith.constant 3 : index
    %c0_19 = arith.constant 0 : index
    %c0_20 = arith.constant 0 : index
    %20 = vector.load %arg2[%c3, %c0_19, %c0_20] : memref<16x16x8xbf16, #tpu.memory_space<vmem>>, vector<1x16x8xbf16>
    %21 = vector.shape_cast %20 : vector<1x16x8xbf16> to vector<16x8xbf16>
    %cst_21 = arith.constant dense<0.000000e+00> : vector<16x288xf32>
    %22 = tpu.matmul %21, %19, %cst_21 {dimension_numbers = #tpu.dot_dimension_numbers<[1], [0], [0], [1], [0, 0, 1, 1], [], []>} : vector<16x8xbf16>, vector<8x288xbf16>, vector<16x288xf32> -> vector<16x288xf32>
    %23 = arith.addf %17, %22 : vector<16x288xf32>
    %c0_22 = arith.constant 0 : index
    %c0_23 = arith.constant 0 : index
    %c0_24 = arith.constant 0 : index
    %24 = vector.load %arg3[%c0_22, %c0_23, %c0_24] : memref<4x1x288xf32, #tpu.memory_space<vmem>>, vector<1x1x288xf32>
    %25 = vector.shape_cast %24 : vector<1x1x288xf32> to vector<1x288xf32>
    %26 = vector.broadcast %25 : vector<1x288xf32> to vector<16x288xf32>
    %27 = arith.mulf %23, %26 : vector<16x288xf32>
    %cst_25 = arith.constant dense<0.000000e+00> : vector<16xf32>
    %28 = vector.multi_reduction <add>, %27, %cst_25 [1] : vector<16x288xf32> to vector<16xf32>
    %29 = vector.shape_cast %28 : vector<16xf32> to vector<16x1xf32>
    %30 = arith.addf %0, %29 : vector<16x1xf32>
    %c0_26 = arith.constant 0 : index
    %c0_27 = arith.constant 0 : index
    %c20 = arith.constant 20 : index
    %31 = vector.load %arg1[%c0_26, %c0_27, %c20] : memref<1x8x384xbf16, #tpu.memory_space<vmem>>, vector<1x8x288xbf16>
    %32 = vector.shape_cast %31 : vector<1x8x288xbf16> to vector<8x288xbf16>
    %c4 = arith.constant 4 : index
    %c0_28 = arith.constant 0 : index
    %c0_29 = arith.constant 0 : index
    %33 = vector.load %arg2[%c4, %c0_28, %c0_29] : memref<16x16x8xbf16, #tpu.memory_space<vmem>>, vector<1x16x8xbf16>
    %34 = vector.shape_cast %33 : vector<1x16x8xbf16> to vector<16x8xbf16>
    %cst_30 = arith.constant dense<0.000000e+00> : vector<16x288xf32>
    %35 = tpu.matmul %34, %32, %cst_30 {dimension_numbers = #tpu.dot_dimension_numbers<[1], [0], [0], [1], [0, 0, 1, 1], [], []>} : vector<16x8xbf16>, vector<8x288xbf16>, vector<16x288xf32> -> vector<16x288xf32>
    %c0_31 = arith.constant 0 : index
    %c0_32 = arith.constant 0 : index
    %c19_33 = arith.constant 19 : index
    %36 = vector.load %arg1[%c0_31, %c0_32, %c19_33] : memref<1x8x384xbf16, #tpu.memory_space<vmem>>, vector<1x8x288xbf16>
    %37 = vector.shape_cast %36 : vector<1x8x288xbf16> to vector<8x288xbf16>
    %c5 = arith.constant 5 : index
    %c0_34 = arith.constant 0 : index
    %c0_35 = arith.constant 0 : index
    %38 = vector.load %arg2[%c5, %c0_34, %c0_35] : memref<16x16x8xbf16, #tpu.memory_space<vmem>>, vector<1x16x8xbf16>
    %39 = vector.shape_cast %38 : vector<1x16x8xbf16> to vector<16x8xbf16>
    %cst_36 = arith.constant dense<0.000000e+00> : vector<16x288xf32>
    %40 = tpu.matmul %39, %37, %cst_36 {dimension_numbers = #tpu.dot_dimension_numbers<[1], [0], [0], [1], [0, 0, 1, 1], [], []>} : vector<16x8xbf16>, vector<8x288xbf16>, vector<16x288xf32> -> vector<16x288xf32>
    %41 = arith.addf %35, %40 : vector<16x288xf32>
    %c0_37 = arith.constant 0 : index
    %c0_38 = arith.constant 0 : index
    %c2_39 = arith.constant 2 : index
    %42 = vector.load %arg1[%c0_37, %c0_38, %c2_39] : memref<1x8x384xbf16, #tpu.memory_space<vmem>>, vector<1x8x288xbf16>
    %43 = vector.shape_cast %42 : vector<1x8x288xbf16> to vector<8x288xbf16>
    %c6 = arith.constant 6 : index
    %c0_40 = arith.constant 0 : index
    %c0_41 = arith.constant 0 : index
    %44 = vector.load %arg2[%c6, %c0_40, %c0_41] : memref<16x16x8xbf16, #tpu.memory_space<vmem>>, vector<1x16x8xbf16>
    %45 = vector.shape_cast %44 : vector<1x16x8xbf16> to vector<16x8xbf16>
    %cst_42 = arith.constant dense<0.000000e+00> : vector<16x288xf32>
    %46 = tpu.matmul %45, %43, %cst_42 {dimension_numbers = #tpu.dot_dimension_numbers<[1], [0], [0], [1], [0, 0, 1, 1], [], []>} : vector<16x8xbf16>, vector<8x288xbf16>, vector<16x288xf32> -> vector<16x288xf32>
    %47 = arith.addf %41, %46 : vector<16x288xf32>
    %c0_43 = arith.constant 0 : index
    %c0_44 = arith.constant 0 : index
    %c1_45 = arith.constant 1 : index
    %48 = vector.load %arg1[%c0_43, %c0_44, %c1_45] : memref<1x8x384xbf16, #tpu.memory_space<vmem>>, vector<1x8x288xbf16>
    %49 = vector.shape_cast %48 : vector<1x8x288xbf16> to vector<8x288xbf16>
    %c7 = arith.constant 7 : index
    %c0_46 = arith.constant 0 : index
    %c0_47 = arith.constant 0 : index
    %50 = vector.load %arg2[%c7, %c0_46, %c0_47] : memref<16x16x8xbf16, #tpu.memory_space<vmem>>, vector<1x16x8xbf16>
    %51 = vector.shape_cast %50 : vector<1x16x8xbf16> to vector<16x8xbf16>
    %cst_48 = arith.constant dense<0.000000e+00> : vector<16x288xf32>
    %52 = tpu.matmul %51, %49, %cst_48 {dimension_numbers = #tpu.dot_dimension_numbers<[1], [0], [0], [1], [0, 0, 1, 1], [], []>} : vector<16x8xbf16>, vector<8x288xbf16>, vector<16x288xf32> -> vector<16x288xf32>
    %53 = arith.addf %47, %52 : vector<16x288xf32>
    %c1_49 = arith.constant 1 : index
    %c0_50 = arith.constant 0 : index
    %c0_51 = arith.constant 0 : index
    %54 = vector.load %arg3[%c1_49, %c0_50, %c0_51] : memref<4x1x288xf32, #tpu.memory_space<vmem>>, vector<1x1x288xf32>
    %55 = vector.shape_cast %54 : vector<1x1x288xf32> to vector<1x288xf32>
    %56 = vector.broadcast %55 : vector<1x288xf32> to vector<16x288xf32>
    %57 = arith.mulf %53, %56 : vector<16x288xf32>
    %cst_52 = arith.constant dense<0.000000e+00> : vector<16xf32>
    %58 = vector.multi_reduction <add>, %57, %cst_52 [1] : vector<16x288xf32> to vector<16xf32>
    %59 = vector.shape_cast %58 : vector<16xf32> to vector<16x1xf32>
    %60 = arith.addf %30, %59 : vector<16x1xf32>
    %c0_53 = arith.constant 0 : index
    %c0_54 = arith.constant 0 : index
    %c37 = arith.constant 37 : index
    %61 = vector.load %arg1[%c0_53, %c0_54, %c37] : memref<1x8x384xbf16, #tpu.memory_space<vmem>>, vector<1x8x288xbf16>
    %62 = vector.shape_cast %61 : vector<1x8x288xbf16> to vector<8x288xbf16>
    %c8 = arith.constant 8 : index
    %c0_55 = arith.constant 0 : index
    %c0_56 = arith.constant 0 : index
    %63 = vector.load %arg2[%c8, %c0_55, %c0_56] : memref<16x16x8xbf16, #tpu.memory_space<vmem>>, vector<1x16x8xbf16>
    %64 = vector.shape_cast %63 : vector<1x16x8xbf16> to vector<16x8xbf16>
    %cst_57 = arith.constant dense<0.000000e+00> : vector<16x288xf32>
    %65 = tpu.matmul %64, %62, %cst_57 {dimension_numbers = #tpu.dot_dimension_numbers<[1], [0], [0], [1], [0, 0, 1, 1], [], []>} : vector<16x8xbf16>, vector<8x288xbf16>, vector<16x288xf32> -> vector<16x288xf32>
    %c0_58 = arith.constant 0 : index
    %c0_59 = arith.constant 0 : index
    %c36 = arith.constant 36 : index
    %66 = vector.load %arg1[%c0_58, %c0_59, %c36] : memref<1x8x384xbf16, #tpu.memory_space<vmem>>, vector<1x8x288xbf16>
    %67 = vector.shape_cast %66 : vector<1x8x288xbf16> to vector<8x288xbf16>
    %c9 = arith.constant 9 : index
    %c0_60 = arith.constant 0 : index
    %c0_61 = arith.constant 0 : index
    %68 = vector.load %arg2[%c9, %c0_60, %c0_61] : memref<16x16x8xbf16, #tpu.memory_space<vmem>>, vector<1x16x8xbf16>
    %69 = vector.shape_cast %68 : vector<1x16x8xbf16> to vector<16x8xbf16>
    %cst_62 = arith.constant dense<0.000000e+00> : vector<16x288xf32>
    %70 = tpu.matmul %69, %67, %cst_62 {dimension_numbers = #tpu.dot_dimension_numbers<[1], [0], [0], [1], [0, 0, 1, 1], [], []>} : vector<16x8xbf16>, vector<8x288xbf16>, vector<16x288xf32> -> vector<16x288xf32>
    %71 = arith.addf %65, %70 : vector<16x288xf32>
    %c0_63 = arith.constant 0 : index
    %c0_64 = arith.constant 0 : index
    %c19_65 = arith.constant 19 : index
    %72 = vector.load %arg1[%c0_63, %c0_64, %c19_65] : memref<1x8x384xbf16, #tpu.memory_space<vmem>>, vector<1x8x288xbf16>
    %73 = vector.shape_cast %72 : vector<1x8x288xbf16> to vector<8x288xbf16>
    %c10 = arith.constant 10 : index
    %c0_66 = arith.constant 0 : index
    %c0_67 = arith.constant 0 : index
    %74 = vector.load %arg2[%c10, %c0_66, %c0_67] : memref<16x16x8xbf16, #tpu.memory_space<vmem>>, vector<1x16x8xbf16>
    %75 = vector.shape_cast %74 : vector<1x16x8xbf16> to vector<16x8xbf16>
    %cst_68 = arith.constant dense<0.000000e+00> : vector<16x288xf32>
    %76 = tpu.matmul %75, %73, %cst_68 {dimension_numbers = #tpu.dot_dimension_numbers<[1], [0], [0], [1], [0, 0, 1, 1], [], []>} : vector<16x8xbf16>, vector<8x288xbf16>, vector<16x288xf32> -> vector<16x288xf32>
    %77 = arith.addf %71, %76 : vector<16x288xf32>
    %c0_69 = arith.constant 0 : index
    %c0_70 = arith.constant 0 : index
    %c18_71 = arith.constant 18 : index
    %78 = vector.load %arg1[%c0_69, %c0_70, %c18_71] : memref<1x8x384xbf16, #tpu.memory_space<vmem>>, vector<1x8x288xbf16>
    %79 = vector.shape_cast %78 : vector<1x8x288xbf16> to vector<8x288xbf16>
    %c11 = arith.constant 11 : index
    %c0_72 = arith.constant 0 : index
    %c0_73 = arith.constant 0 : index
    %80 = vector.load %arg2[%c11, %c0_72, %c0_73] : memref<16x16x8xbf16, #tpu.memory_space<vmem>>, vector<1x16x8xbf16>
    %81 = vector.shape_cast %80 : vector<1x16x8xbf16> to vector<16x8xbf16>
    %cst_74 = arith.constant dense<0.000000e+00> : vector<16x288xf32>
    %82 = tpu.matmul %81, %79, %cst_74 {dimension_numbers = #tpu.dot_dimension_numbers<[1], [0], [0], [1], [0, 0, 1, 1], [], []>} : vector<16x8xbf16>, vector<8x288xbf16>, vector<16x288xf32> -> vector<16x288xf32>
    %83 = arith.addf %77, %82 : vector<16x288xf32>
    %c2_75 = arith.constant 2 : index
    %c0_76 = arith.constant 0 : index
    %c0_77 = arith.constant 0 : index
    %84 = vector.load %arg3[%c2_75, %c0_76, %c0_77] : memref<4x1x288xf32, #tpu.memory_space<vmem>>, vector<1x1x288xf32>
    %85 = vector.shape_cast %84 : vector<1x1x288xf32> to vector<1x288xf32>
    %86 = vector.broadcast %85 : vector<1x288xf32> to vector<16x288xf32>
    %87 = arith.mulf %83, %86 : vector<16x288xf32>
    %cst_78 = arith.constant dense<0.000000e+00> : vector<16xf32>
    %88 = vector.multi_reduction <add>, %87, %cst_78 [1] : vector<16x288xf32> to vector<16xf32>
    %89 = vector.shape_cast %88 : vector<16xf32> to vector<16x1xf32>
    %90 = arith.addf %60, %89 : vector<16x1xf32>
    %c0_79 = arith.constant 0 : index
    %c0_80 = arith.constant 0 : index
    %c38 = arith.constant 38 : index
    %91 = vector.load %arg1[%c0_79, %c0_80, %c38] : memref<1x8x384xbf16, #tpu.memory_space<vmem>>, vector<1x8x288xbf16>
    %92 = vector.shape_cast %91 : vector<1x8x288xbf16> to vector<8x288xbf16>
    %c12 = arith.constant 12 : index
    %c0_81 = arith.constant 0 : index
    %c0_82 = arith.constant 0 : index
    %93 = vector.load %arg2[%c12, %c0_81, %c0_82] : memref<16x16x8xbf16, #tpu.memory_space<vmem>>, vector<1x16x8xbf16>
    %94 = vector.shape_cast %93 : vector<1x16x8xbf16> to vector<16x8xbf16>
    %cst_83 = arith.constant dense<0.000000e+00> : vector<16x288xf32>
    %95 = tpu.matmul %94, %92, %cst_83 {dimension_numbers = #tpu.dot_dimension_numbers<[1], [0], [0], [1], [0, 0, 1, 1], [], []>} : vector<16x8xbf16>, vector<8x288xbf16>, vector<16x288xf32> -> vector<16x288xf32>
    %c0_84 = arith.constant 0 : index
    %c0_85 = arith.constant 0 : index
    %c37_86 = arith.constant 37 : index
    %96 = vector.load %arg1[%c0_84, %c0_85, %c37_86] : memref<1x8x384xbf16, #tpu.memory_space<vmem>>, vector<1x8x288xbf16>
    %97 = vector.shape_cast %96 : vector<1x8x288xbf16> to vector<8x288xbf16>
    %c13 = arith.constant 13 : index
    %c0_87 = arith.constant 0 : index
    %c0_88 = arith.constant 0 : index
    %98 = vector.load %arg2[%c13, %c0_87, %c0_88] : memref<16x16x8xbf16, #tpu.memory_space<vmem>>, vector<1x16x8xbf16>
    %99 = vector.shape_cast %98 : vector<1x16x8xbf16> to vector<16x8xbf16>
    %cst_89 = arith.constant dense<0.000000e+00> : vector<16x288xf32>
    %100 = tpu.matmul %99, %97, %cst_89 {dimension_numbers = #tpu.dot_dimension_numbers<[1], [0], [0], [1], [0, 0, 1, 1], [], []>} : vector<16x8xbf16>, vector<8x288xbf16>, vector<16x288xf32> -> vector<16x288xf32>
    %101 = arith.addf %95, %100 : vector<16x288xf32>
    %c0_90 = arith.constant 0 : index
    %c0_91 = arith.constant 0 : index
    %c20_92 = arith.constant 20 : index
    %102 = vector.load %arg1[%c0_90, %c0_91, %c20_92] : memref<1x8x384xbf16, #tpu.memory_space<vmem>>, vector<1x8x288xbf16>
    %103 = vector.shape_cast %102 : vector<1x8x288xbf16> to vector<8x288xbf16>
    %c14 = arith.constant 14 : index
    %c0_93 = arith.constant 0 : index
    %c0_94 = arith.constant 0 : index
    %104 = vector.load %arg2[%c14, %c0_93, %c0_94] : memref<16x16x8xbf16, #tpu.memory_space<vmem>>, vector<1x16x8xbf16>
    %105 = vector.shape_cast %104 : vector<1x16x8xbf16> to vector<16x8xbf16>
    %cst_95 = arith.constant dense<0.000000e+00> : vector<16x288xf32>
    %106 = tpu.matmul %105, %103, %cst_95 {dimension_numbers = #tpu.dot_dimension_numbers<[1], [0], [0], [1], [0, 0, 1, 1], [], []>} : vector<16x8xbf16>, vector<8x288xbf16>, vector<16x288xf32> -> vector<16x288xf32>
    %107 = arith.addf %101, %106 : vector<16x288xf32>
    %c0_96 = arith.constant 0 : index
    %c0_97 = arith.constant 0 : index
    %c19_98 = arith.constant 19 : index
    %108 = vector.load %arg1[%c0_96, %c0_97, %c19_98] : memref<1x8x384xbf16, #tpu.memory_space<vmem>>, vector<1x8x288xbf16>
    %109 = vector.shape_cast %108 : vector<1x8x288xbf16> to vector<8x288xbf16>
    %c15 = arith.constant 15 : index
    %c0_99 = arith.constant 0 : index
    %c0_100 = arith.constant 0 : index
    %110 = vector.load %arg2[%c15, %c0_99, %c0_100] : memref<16x16x8xbf16, #tpu.memory_space<vmem>>, vector<1x16x8xbf16>
    %111 = vector.shape_cast %110 : vector<1x16x8xbf16> to vector<16x8xbf16>
    %cst_101 = arith.constant dense<0.000000e+00> : vector<16x288xf32>
    %112 = tpu.matmul %111, %109, %cst_101 {dimension_numbers = #tpu.dot_dimension_numbers<[1], [0], [0], [1], [0, 0, 1, 1], [], []>} : vector<16x8xbf16>, vector<8x288xbf16>, vector<16x288xf32> -> vector<16x288xf32>
    %113 = arith.addf %107, %112 : vector<16x288xf32>
    %c3_102 = arith.constant 3 : index
    %c0_103 = arith.constant 0 : index
    %c0_104 = arith.constant 0 : index
    %114 = vector.load %arg3[%c3_102, %c0_103, %c0_104] : memref<4x1x288xf32, #tpu.memory_space<vmem>>, vector<1x1x288xf32>
    %115 = vector.shape_cast %114 : vector<1x1x288xf32> to vector<1x288xf32>
    %116 = vector.broadcast %115 : vector<1x288xf32> to vector<16x288xf32>
    %117 = arith.mulf %113, %116 : vector<16x288xf32>
    %cst_105 = arith.constant dense<0.000000e+00> : vector<16xf32>
    %118 = vector.multi_reduction <add>, %117, %cst_105 [1] : vector<16x288xf32> to vector<16xf32>
    %119 = vector.shape_cast %118 : vector<16xf32> to vector<16x1xf32>
    %120 = arith.addf %90, %119 : vector<16x1xf32>
    %c0_106 = arith.constant 0 : index
    %c0_107 = arith.constant 0 : index
    %c0_108 = arith.constant 0 : index
    %121 = vector.load %arg4[%c0_106, %c0_107, %c0_108] : memref<1x16x1xf32, #tpu.memory_space<vmem>>, vector<1x16x1xf32>
    %122 = vector.shape_cast %121 : vector<1x16x1xf32> to vector<16x1xf32>
    %123 = vector.shape_cast %120 : vector<16x1xf32> to vector<1x16x1xf32>
    tpu.vector_store %arg4[%c0_106, %c0_107, %c0_108], %123 {strides = array<i32>} : memref<1x16x1xf32, #tpu.memory_space<vmem>>, vector<1x16x1xf32>,
    %cst_109 = arith.constant 9.765625E-4 : f32
    %124 = vector.broadcast %cst_109 : f32 to vector<16x1xf32>
    %125 = arith.mulf %120, %124 : vector<16x1xf32>
    %cst_110 = arith.constant 0.000000e+00 : f32
    %126 = vector.broadcast %cst_110 : f32 to vector<16x1xf32>
    %c0_111 = arith.constant 0 : index
    %c0_112 = arith.constant 0 : index
    %c19_113 = arith.constant 19 : index
    %127 = vector.load %arg1[%c0_111, %c0_112, %c19_113] : memref<1x8x384xbf16, #tpu.memory_space<vmem>>, vector<1x8x288xbf16>
    %128 = vector.shape_cast %127 : vector<1x8x288xbf16> to vector<8x288xbf16>
    %c0_114 = arith.constant 0 : index
    %c0_115 = arith.constant 0 : index
    %c0_116 = arith.constant 0 : index
    %129 = vector.load %arg2[%c0_114, %c0_115, %c0_116] : memref<16x16x8xbf16, #tpu.memory_space<vmem>>, vector<1x16x8xbf16>
    %130 = vector.shape_cast %129 : vector<1x16x8xbf16> to vector<16x8xbf16>
    %cst_117 = arith.constant dense<0.000000e+00> : vector<16x288xf32>
    %131 = tpu.matmul %130, %128, %cst_117 {dimension_numbers = #tpu.dot_dimension_numbers<[1], [0], [0], [1], [0, 0, 1, 1], [], []>} : vector<16x8xbf16>, vector<8x288xbf16>, vector<16x288xf32> -> vector<16x288xf32>
    %c0_118 = arith.constant 0 : index
    %c0_119 = arith.constant 0 : index
    %c18_120 = arith.constant 18 : index
    %132 = vector.load %arg1[%c0_118, %c0_119, %c18_120] : memref<1x8x384xbf16, #tpu.memory_space<vmem>>, vector<1x8x288xbf16>
    %133 = vector.shape_cast %132 : vector<1x8x288xbf16> to vector<8x288xbf16>
    %c1_121 = arith.constant 1 : index
    %c0_122 = arith.constant 0 : index
    %c0_123 = arith.constant 0 : index
    %134 = vector.load %arg2[%c1_121, %c0_122, %c0_123] : memref<16x16x8xbf16, #tpu.memory_space<vmem>>, vector<1x16x8xbf16>
    %135 = vector.shape_cast %134 : vector<1x16x8xbf16> to vector<16x8xbf16>
    %cst_124 = arith.constant dense<0.000000e+00> : vector<16x288xf32>
    %136 = tpu.matmul %135, %133, %cst_124 {dimension_numbers = #tpu.dot_dimension_numbers<[1], [0], [0], [1], [0, 0, 1, 1], [], []>} : vector<16x8xbf16>, vector<8x288xbf16>, vector<16x288xf32> -> vector<16x288xf32>
    %137 = arith.addf %131, %136 : vector<16x288xf32>
    %c0_125 = arith.constant 0 : index
    %c0_126 = arith.constant 0 : index
    %c1_127 = arith.constant 1 : index
    %138 = vector.load %arg1[%c0_125, %c0_126, %c1_127] : memref<1x8x384xbf16, #tpu.memory_space<vmem>>, vector<1x8x288xbf16>
    %139 = vector.shape_cast %138 : vector<1x8x288xbf16> to vector<8x288xbf16>
    %c2_128 = arith.constant 2 : index
    %c0_129 = arith.constant 0 : index
    %c0_130 = arith.constant 0 : index
    %140 = vector.load %arg2[%c2_128, %c0_129, %c0_130] : memref<16x16x8xbf16, #tpu.memory_space<vmem>>, vector<1x16x8xbf16>
    %141 = vector.shape_cast %140 : vector<1x16x8xbf16> to vector<16x8xbf16>
    %cst_131 = arith.constant dense<0.000000e+00> : vector<16x288xf32>
    %142 = tpu.matmul %141, %139, %cst_131 {dimension_numbers = #tpu.dot_dimension_numbers<[1], [0], [0], [1], [0, 0, 1, 1], [], []>} : vector<16x8xbf16>, vector<8x288xbf16>, vector<16x288xf32> -> vector<16x288xf32>
    %143 = arith.addf %137, %142 : vector<16x288xf32>
    %c0_132 = arith.constant 0 : index
    %c0_133 = arith.constant 0 : index
    %c0_134 = arith.constant 0 : index
    %144 = vector.load %arg1[%c0_132, %c0_133, %c0_134] : memref<1x8x384xbf16, #tpu.memory_space<vmem>>, vector<1x8x288xbf16>
    %145 = vector.shape_cast %144 : vector<1x8x288xbf16> to vector<8x288xbf16>
    %c3_135 = arith.constant 3 : index
    %c0_136 = arith.constant 0 : index
    %c0_137 = arith.constant 0 : index
    %146 = vector.load %arg2[%c3_135, %c0_136, %c0_137] : memref<16x16x8xbf16, #tpu.memory_space<vmem>>, vector<1x16x8xbf16>
    %147 = vector.shape_cast %146 : vector<1x16x8xbf16> to vector<16x8xbf16>
    %cst_138 = arith.constant dense<0.000000e+00> : vector<16x288xf32>
    %148 = tpu.matmul %147, %145, %cst_138 {dimension_numbers = #tpu.dot_dimension_numbers<[1], [0], [0], [1], [0, 0, 1, 1], [], []>} : vector<16x8xbf16>, vector<8x288xbf16>, vector<16x288xf32> -> vector<16x288xf32>
    %149 = arith.addf %143, %148 : vector<16x288xf32>
    %150 = vector.broadcast %125 : vector<16x1xf32> to vector<16x288xf32>
    %151 = arith.subf %149, %150 : vector<16x288xf32>
    %c0_139 = arith.constant 0 : index
    %c0_140 = arith.constant 0 : index
    %c0_141 = arith.constant 0 : index
    %152 = vector.load %arg3[%c0_139, %c0_140, %c0_141] : memref<4x1x288xf32, #tpu.memory_space<vmem>>, vector<1x1x288xf32>
    %153 = vector.shape_cast %152 : vector<1x1x288xf32> to vector<1x288xf32>
    %154 = vector.broadcast %153 : vector<1x288xf32> to vector<16x288xf32>
    %155 = arith.mulf %151, %154 : vector<16x288xf32>
    %156 = arith.mulf %155, %155 : vector<16x288xf32>
    %cst_142 = arith.constant dense<0.000000e+00> : vector<16xf32>
    %157 = vector.multi_reduction <add>, %156, %cst_142 [1] : vector<16x288xf32> to vector<16xf32>
    %158 = vector.shape_cast %157 : vector<16xf32> to vector<16x1xf32>
    %159 = arith.addf %126, %158 : vector<16x1xf32>
    %c0_143 = arith.constant 0 : index
    %c0_144 = arith.constant 0 : index
    %c20_145 = arith.constant 20 : index
    %160 = vector.load %arg1[%c0_143, %c0_144, %c20_145] : memref<1x8x384xbf16, #tpu.memory_space<vmem>>, vector<1x8x288xbf16>
    %161 = vector.shape_cast %160 : vector<1x8x288xbf16> to vector<8x288xbf16>
    %c4_146 = arith.constant 4 : index
    %c0_147 = arith.constant 0 : index
    %c0_148 = arith.constant 0 : index
    %162 = vector.load %arg2[%c4_146, %c0_147, %c0_148] : memref<16x16x8xbf16, #tpu.memory_space<vmem>>, vector<1x16x8xbf16>
    %163 = vector.shape_cast %162 : vector<1x16x8xbf16> to vector<16x8xbf16>
    %cst_149 = arith.constant dense<0.000000e+00> : vector<16x288xf32>
    %164 = tpu.matmul %163, %161, %cst_149 {dimension_numbers = #tpu.dot_dimension_numbers<[1], [0], [0], [1], [0, 0, 1, 1], [], []>} : vector<16x8xbf16>, vector<8x288xbf16>, vector<16x288xf32> -> vector<16x288xf32>
    %c0_150 = arith.constant 0 : index
    %c0_151 = arith.constant 0 : index
    %c19_152 = arith.constant 19 : index
    %165 = vector.load %arg1[%c0_150, %c0_151, %c19_152] : memref<1x8x384xbf16, #tpu.memory_space<vmem>>, vector<1x8x288xbf16>
    %166 = vector.shape_cast %165 : vector<1x8x288xbf16> to vector<8x288xbf16>
    %c5_153 = arith.constant 5 : index
    %c0_154 = arith.constant 0 : index
    %c0_155 = arith.constant 0 : index
    %167 = vector.load %arg2[%c5_153, %c0_154, %c0_155] : memref<16x16x8xbf16, #tpu.memory_space<vmem>>, vector<1x16x8xbf16>
    %168 = vector.shape_cast %167 : vector<1x16x8xbf16> to vector<16x8xbf16>
    %cst_156 = arith.constant dense<0.000000e+00> : vector<16x288xf32>
    %169 = tpu.matmul %168, %166, %cst_156 {dimension_numbers = #tpu.dot_dimension_numbers<[1], [0], [0], [1], [0, 0, 1, 1], [], []>} : vector<16x8xbf16>, vector<8x288xbf16>, vector<16x288xf32> -> vector<16x288xf32>
    %170 = arith.addf %164, %169 : vector<16x288xf32>
    %c0_157 = arith.constant 0 : index
    %c0_158 = arith.constant 0 : index
    %c2_159 = arith.constant 2 : index
    %171 = vector.load %arg1[%c0_157, %c0_158, %c2_159] : memref<1x8x384xbf16, #tpu.memory_space<vmem>>, vector<1x8x288xbf16>
    %172 = vector.shape_cast %171 : vector<1x8x288xbf16> to vector<8x288xbf16>
    %c6_160 = arith.constant 6 : index
    %c0_161 = arith.constant 0 : index
    %c0_162 = arith.constant 0 : index
    %173 = vector.load %arg2[%c6_160, %c0_161, %c0_162] : memref<16x16x8xbf16, #tpu.memory_space<vmem>>, vector<1x16x8xbf16>
    %174 = vector.shape_cast %173 : vector<1x16x8xbf16> to vector<16x8xbf16>
    %cst_163 = arith.constant dense<0.000000e+00> : vector<16x288xf32>
    %175 = tpu.matmul %174, %172, %cst_163 {dimension_numbers = #tpu.dot_dimension_numbers<[1], [0], [0], [1], [0, 0, 1, 1], [], []>} : vector<16x8xbf16>, vector<8x288xbf16>, vector<16x288xf32> -> vector<16x288xf32>
    %176 = arith.addf %170, %175 : vector<16x288xf32>
    %c0_164 = arith.constant 0 : index
    %c0_165 = arith.constant 0 : index
    %c1_166 = arith.constant 1 : index
    %177 = vector.load %arg1[%c0_164, %c0_165, %c1_166] : memref<1x8x384xbf16, #tpu.memory_space<vmem>>, vector<1x8x288xbf16>
    %178 = vector.shape_cast %177 : vector<1x8x288xbf16> to vector<8x288xbf16>
    %c7_167 = arith.constant 7 : index
    %c0_168 = arith.constant 0 : index
    %c0_169 = arith.constant 0 : index
    %179 = vector.load %arg2[%c7_167, %c0_168, %c0_169] : memref<16x16x8xbf16, #tpu.memory_space<vmem>>, vector<1x16x8xbf16>
    %180 = vector.shape_cast %179 : vector<1x16x8xbf16> to vector<16x8xbf16>
    %cst_170 = arith.constant dense<0.000000e+00> : vector<16x288xf32>
    %181 = tpu.matmul %180, %178, %cst_170 {dimension_numbers = #tpu.dot_dimension_numbers<[1], [0], [0], [1], [0, 0, 1, 1], [], []>} : vector<16x8xbf16>, vector<8x288xbf16>, vector<16x288xf32> -> vector<16x288xf32>
    %182 = arith.addf %176, %181 : vector<16x288xf32>
    %183 = vector.broadcast %125 : vector<16x1xf32> to vector<16x288xf32>
    %184 = arith.subf %182, %183 : vector<16x288xf32>
    %c1_171 = arith.constant 1 : index
    %c0_172 = arith.constant 0 : index
    %c0_173 = arith.constant 0 : index
    %185 = vector.load %arg3[%c1_171, %c0_172, %c0_173] : memref<4x1x288xf32, #tpu.memory_space<vmem>>, vector<1x1x288xf32>
    %186 = vector.shape_cast %185 : vector<1x1x288xf32> to vector<1x288xf32>
    %187 = vector.broadcast %186 : vector<1x288xf32> to vector<16x288xf32>
    %188 = arith.mulf %184, %187 : vector<16x288xf32>
    %189 = arith.mulf %188, %188 : vector<16x288xf32>
    %cst_174 = arith.constant dense<0.000000e+00> : vector<16xf32>
    %190 = vector.multi_reduction <add>, %189, %cst_174 [1] : vector<16x288xf32> to vector<16xf32>
    %191 = vector.shape_cast %190 : vector<16xf32> to vector<16x1xf32>
    %192 = arith.addf %159, %191 : vector<16x1xf32>
    %c0_175 = arith.constant 0 : index
    %c0_176 = arith.constant 0 : index
    %c37_177 = arith.constant 37 : index
    %193 = vector.load %arg1[%c0_175, %c0_176, %c37_177] : memref<1x8x384xbf16, #tpu.memory_space<vmem>>, vector<1x8x288xbf16>
    %194 = vector.shape_cast %193 : vector<1x8x288xbf16> to vector<8x288xbf16>
    %c8_178 = arith.constant 8 : index
    %c0_179 = arith.constant 0 : index
    %c0_180 = arith.constant 0 : index
    %195 = vector.load %arg2[%c8_178, %c0_179, %c0_180] : memref<16x16x8xbf16, #tpu.memory_space<vmem>>, vector<1x16x8xbf16>
    %196 = vector.shape_cast %195 : vector<1x16x8xbf16> to vector<16x8xbf16>
    %cst_181 = arith.constant dense<0.000000e+00> : vector<16x288xf32>
    %197 = tpu.matmul %196, %194, %cst_181 {dimension_numbers = #tpu.dot_dimension_numbers<[1], [0], [0], [1], [0, 0, 1, 1], [], []>} : vector<16x8xbf16>, vector<8x288xbf16>, vector<16x288xf32> -> vector<16x288xf32>
    %c0_182 = arith.constant 0 : index
    %c0_183 = arith.constant 0 : index
    %c36_184 = arith.constant 36 : index
    %198 = vector.load %arg1[%c0_182, %c0_183, %c36_184] : memref<1x8x384xbf16, #tpu.memory_space<vmem>>, vector<1x8x288xbf16>
    %199 = vector.shape_cast %198 : vector<1x8x288xbf16> to vector<8x288xbf16>
    %c9_185 = arith.constant 9 : index
    %c0_186 = arith.constant 0 : index
    %c0_187 = arith.constant 0 : index
    %200 = vector.load %arg2[%c9_185, %c0_186, %c0_187] : memref<16x16x8xbf16, #tpu.memory_space<vmem>>, vector<1x16x8xbf16>
    %201 = vector.shape_cast %200 : vector<1x16x8xbf16> to vector<16x8xbf16>
    %cst_188 = arith.constant dense<0.000000e+00> : vector<16x288xf32>
    %202 = tpu.matmul %201, %199, %cst_188 {dimension_numbers = #tpu.dot_dimension_numbers<[1], [0], [0], [1], [0, 0, 1, 1], [], []>} : vector<16x8xbf16>, vector<8x288xbf16>, vector<16x288xf32> -> vector<16x288xf32>
    %203 = arith.addf %197, %202 : vector<16x288xf32>
    %c0_189 = arith.constant 0 : index
    %c0_190 = arith.constant 0 : index
    %c19_191 = arith.constant 19 : index
    %204 = vector.load %arg1[%c0_189, %c0_190, %c19_191] : memref<1x8x384xbf16, #tpu.memory_space<vmem>>, vector<1x8x288xbf16>
    %205 = vector.shape_cast %204 : vector<1x8x288xbf16> to vector<8x288xbf16>
    %c10_192 = arith.constant 10 : index
    %c0_193 = arith.constant 0 : index
    %c0_194 = arith.constant 0 : index
    %206 = vector.load %arg2[%c10_192, %c0_193, %c0_194] : memref<16x16x8xbf16, #tpu.memory_space<vmem>>, vector<1x16x8xbf16>
    %207 = vector.shape_cast %206 : vector<1x16x8xbf16> to vector<16x8xbf16>
    %cst_195 = arith.constant dense<0.000000e+00> : vector<16x288xf32>
    %208 = tpu.matmul %207, %205, %cst_195 {dimension_numbers = #tpu.dot_dimension_numbers<[1], [0], [0], [1], [0, 0, 1, 1], [], []>} : vector<16x8xbf16>, vector<8x288xbf16>, vector<16x288xf32> -> vector<16x288xf32>
    %209 = arith.addf %203, %208 : vector<16x288xf32>
    %c0_196 = arith.constant 0 : index
    %c0_197 = arith.constant 0 : index
    %c18_198 = arith.constant 18 : index
    %210 = vector.load %arg1[%c0_196, %c0_197, %c18_198] : memref<1x8x384xbf16, #tpu.memory_space<vmem>>, vector<1x8x288xbf16>
    %211 = vector.shape_cast %210 : vector<1x8x288xbf16> to vector<8x288xbf16>
    %c11_199 = arith.constant 11 : index
    %c0_200 = arith.constant 0 : index
    %c0_201 = arith.constant 0 : index
    %212 = vector.load %arg2[%c11_199, %c0_200, %c0_201] : memref<16x16x8xbf16, #tpu.memory_space<vmem>>, vector<1x16x8xbf16>
    %213 = vector.shape_cast %212 : vector<1x16x8xbf16> to vector<16x8xbf16>
    %cst_202 = arith.constant dense<0.000000e+00> : vector<16x288xf32>
    %214 = tpu.matmul %213, %211, %cst_202 {dimension_numbers = #tpu.dot_dimension_numbers<[1], [0], [0], [1], [0, 0, 1, 1], [], []>} : vector<16x8xbf16>, vector<8x288xbf16>, vector<16x288xf32> -> vector<16x288xf32>
    %215 = arith.addf %209, %214 : vector<16x288xf32>
    %216 = vector.broadcast %125 : vector<16x1xf32> to vector<16x288xf32>
    %217 = arith.subf %215, %216 : vector<16x288xf32>
    %c2_203 = arith.constant 2 : index
    %c0_204 = arith.constant 0 : index
    %c0_205 = arith.constant 0 : index
    %218 = vector.load %arg3[%c2_203, %c0_204, %c0_205] : memref<4x1x288xf32, #tpu.memory_space<vmem>>, vector<1x1x288xf32>
    %219 = vector.shape_cast %218 : vector<1x1x288xf32> to vector<1x288xf32>
    %220 = vector.broadcast %219 : vector<1x288xf32> to vector<16x288xf32>
    %221 = arith.mulf %217, %220 : vector<16x288xf32>
    %222 = arith.mulf %221, %221 : vector<16x288xf32>
    %cst_206 = arith.constant dense<0.000000e+00> : vector<16xf32>
    %223 = vector.multi_reduction <add>, %222, %cst_206 [1] : vector<16x288xf32> to vector<16xf32>
    %224 = vector.shape_cast %223 : vector<16xf32> to vector<16x1xf32>
    %225 = arith.addf %192, %224 : vector<16x1xf32>
    %c0_207 = arith.constant 0 : index
    %c0_208 = arith.constant 0 : index
    %c38_209 = arith.constant 38 : index
    %226 = vector.load %arg1[%c0_207, %c0_208, %c38_209] : memref<1x8x384xbf16, #tpu.memory_space<vmem>>, vector<1x8x288xbf16>
    %227 = vector.shape_cast %226 : vector<1x8x288xbf16> to vector<8x288xbf16>
    %c12_210 = arith.constant 12 : index
    %c0_211 = arith.constant 0 : index
    %c0_212 = arith.constant 0 : index
    %228 = vector.load %arg2[%c12_210, %c0_211, %c0_212] : memref<16x16x8xbf16, #tpu.memory_space<vmem>>, vector<1x16x8xbf16>
    %229 = vector.shape_cast %228 : vector<1x16x8xbf16> to vector<16x8xbf16>
    %cst_213 = arith.constant dense<0.000000e+00> : vector<16x288xf32>
    %230 = tpu.matmul %229, %227, %cst_213 {dimension_numbers = #tpu.dot_dimension_numbers<[1], [0], [0], [1], [0, 0, 1, 1], [], []>} : vector<16x8xbf16>, vector<8x288xbf16>, vector<16x288xf32> -> vector<16x288xf32>
    %c0_214 = arith.constant 0 : index
    %c0_215 = arith.constant 0 : index
    %c37_216 = arith.constant 37 : index
    %231 = vector.load %arg1[%c0_214, %c0_215, %c37_216] : memref<1x8x384xbf16, #tpu.memory_space<vmem>>, vector<1x8x288xbf16>
    %232 = vector.shape_cast %231 : vector<1x8x288xbf16> to vector<8x288xbf16>
    %c13_217 = arith.constant 13 : index
    %c0_218 = arith.constant 0 : index
    %c0_219 = arith.constant 0 : index
    %233 = vector.load %arg2[%c13_217, %c0_218, %c0_219] : memref<16x16x8xbf16, #tpu.memory_space<vmem>>, vector<1x16x8xbf16>
    %234 = vector.shape_cast %233 : vector<1x16x8xbf16> to vector<16x8xbf16>
    %cst_220 = arith.constant dense<0.000000e+00> : vector<16x288xf32>
    %235 = tpu.matmul %234, %232, %cst_220 {dimension_numbers = #tpu.dot_dimension_numbers<[1], [0], [0], [1], [0, 0, 1, 1], [], []>} : vector<16x8xbf16>, vector<8x288xbf16>, vector<16x288xf32> -> vector<16x288xf32>
    %236 = arith.addf %230, %235 : vector<16x288xf32>
    %c0_221 = arith.constant 0 : index
    %c0_222 = arith.constant 0 : index
    %c20_223 = arith.constant 20 : index
    %237 = vector.load %arg1[%c0_221, %c0_222, %c20_223] : memref<1x8x384xbf16, #tpu.memory_space<vmem>>, vector<1x8x288xbf16>
    %238 = vector.shape_cast %237 : vector<1x8x288xbf16> to vector<8x288xbf16>
    %c14_224 = arith.constant 14 : index
    %c0_225 = arith.constant 0 : index
    %c0_226 = arith.constant 0 : index
    %239 = vector.load %arg2[%c14_224, %c0_225, %c0_226] : memref<16x16x8xbf16, #tpu.memory_space<vmem>>, vector<1x16x8xbf16>
    %240 = vector.shape_cast %239 : vector<1x16x8xbf16> to vector<16x8xbf16>
    %cst_227 = arith.constant dense<0.000000e+00> : vector<16x288xf32>
    %241 = tpu.matmul %240, %238, %cst_227 {dimension_numbers = #tpu.dot_dimension_numbers<[1], [0], [0], [1], [0, 0, 1, 1], [], []>} : vector<16x8xbf16>, vector<8x288xbf16>, vector<16x288xf32> -> vector<16x288xf32>
    %242 = arith.addf %236, %241 : vector<16x288xf32>
    %c0_228 = arith.constant 0 : index
    %c0_229 = arith.constant 0 : index
    %c19_230 = arith.constant 19 : index
    %243 = vector.load %arg1[%c0_228, %c0_229, %c19_230] : memref<1x8x384xbf16, #tpu.memory_space<vmem>>, vector<1x8x288xbf16>
    %244 = vector.shape_cast %243 : vector<1x8x288xbf16> to vector<8x288xbf16>
    %c15_231 = arith.constant 15 : index
    %c0_232 = arith.constant 0 : index
    %c0_233 = arith.constant 0 : index
    %245 = vector.load %arg2[%c15_231, %c0_232, %c0_233] : memref<16x16x8xbf16, #tpu.memory_space<vmem>>, vector<1x16x8xbf16>
    %246 = vector.shape_cast %245 : vector<1x16x8xbf16> to vector<16x8xbf16>
    %cst_234 = arith.constant dense<0.000000e+00> : vector<16x288xf32>
    %247 = tpu.matmul %246, %244, %cst_234 {dimension_numbers = #tpu.dot_dimension_numbers<[1], [0], [0], [1], [0, 0, 1, 1], [], []>} : vector<16x8xbf16>, vector<8x288xbf16>, vector<16x288xf32> -> vector<16x288xf32>
    %248 = arith.addf %242, %247 : vector<16x288xf32>
    %249 = vector.broadcast %125 : vector<16x1xf32> to vector<16x288xf32>
    %250 = arith.subf %248, %249 : vector<16x288xf32>
    %c3_235 = arith.constant 3 : index
    %c0_236 = arith.constant 0 : index
    %c0_237 = arith.constant 0 : index
    %251 = vector.load %arg3[%c3_235, %c0_236, %c0_237] : memref<4x1x288xf32, #tpu.memory_space<vmem>>, vector<1x1x288xf32>
    %252 = vector.shape_cast %251 : vector<1x1x288xf32> to vector<1x288xf32>
    %253 = vector.broadcast %252 : vector<1x288xf32> to vector<16x288xf32>
    %254 = arith.mulf %250, %253 : vector<16x288xf32>
    %255 = arith.mulf %254, %254 : vector<16x288xf32>
    %cst_238 = arith.constant dense<0.000000e+00> : vector<16xf32>
    %256 = vector.multi_reduction <add>, %255, %cst_238 [1] : vector<16x288xf32> to vector<16xf32>
    %257 = vector.shape_cast %256 : vector<16xf32> to vector<16x1xf32>
    %258 = arith.addf %225, %257 : vector<16x1xf32>
    %c0_239 = arith.constant 0 : index
    %c0_240 = arith.constant 0 : index
    %c0_241 = arith.constant 0 : index
    %259 = vector.load %arg5[%c0_239, %c0_240, %c0_241] : memref<1x16x1xf32, #tpu.memory_space<vmem>>, vector<1x16x1xf32>
    %260 = vector.shape_cast %259 : vector<1x16x1xf32> to vector<16x1xf32>
    %261 = vector.shape_cast %258 : vector<16x1xf32> to vector<1x16x1xf32>
    tpu.vector_store %arg5[%c0_239, %c0_240, %c0_241], %261 {strides = array<i32>} : memref<1x16x1xf32, #tpu.memory_space<vmem>>, vector<1x16x1xf32>,
    return
  }
  func.func @transform_0(%arg0: i32) -> (i32, i32, i32) {
    %c0_i32 = arith.constant 0 : i32
    %c0_i32_0 = arith.constant 0 : i32
    %c0_i32_1 = arith.constant 0 : i32
    return %arg0, %c0_i32, %c0_i32_0 : i32, i32, i32
  }
  func.func @transform_1(%arg0: i32) -> (i32, i32, i32) {
    %c0_i32 = arith.constant 0 : i32
    %c0_i32_0 = arith.constant 0 : i32
    %c0_i32_1 = arith.constant 0 : i32
    %c0_i32_2 = arith.constant 0 : i32
    return %c0_i32, %c0_i32_0, %c0_i32_1 : i32, i32, i32
  }
  func.func @transform_2(%arg0: i32) -> (i32, i32, i32) {
    %c0_i32 = arith.constant 0 : i32
    %c0_i32_0 = arith.constant 0 : i32
    %c0_i32_1 = arith.constant 0 : i32
    %c0_i32_2 = arith.constant 0 : i32
    return %c0_i32, %c0_i32_0, %c0_i32_1 : i32, i32, i32
  }
  func.func @transform_3(%arg0: i32) -> (i32, i32, i32) {
    %c0_i32 = arith.constant 0 : i32
    %c0_i32_0 = arith.constant 0 : i32
    %c0_i32_1 = arith.constant 0 : i32
    return %arg0, %c0_i32, %c0_i32_0 : i32, i32, i32
  }
  func.func @transform_4(%arg0: i32) -> (i32, i32, i32) {
    %c0_i32 = arith.constant 0 : i32
    %c0_i32_0 = arith.constant 0 : i32
    %c0_i32_1 = arith.constant 0 : i32
    return %arg0, %c0_i32, %c0_i32_0 : i32, i32, i32
  }
}

module attributes {stable_mosaic.version = 11 : i64} {
  func.func @_bnrelu_kernel(%arg0: i32, %arg1: memref<1x8x384xbf16, #tpu.memory_space<vmem>>, %arg2: memref<16x16x8xbf16, #tpu.memory_space<vmem>>, %arg3: memref<16x1xf32, #tpu.memory_space<vmem>>, %arg4: memref<16x1xf32, #tpu.memory_space<vmem>>, %arg5: memref<1x4x16x288xbf16, #tpu.memory_space<vmem>>) attributes {dimension_semantics = [#tpu.dimension_semantics<parallel>], iteration_bounds = array<i64: 2>, scalar_prefetch = 0 : i64, scratch_operands = 0 : i64, tpu.core_type = #tpu.core_type<tc>, window_params = [{transform_indices = @transform_0, window_bounds = array<i64: 1, 8, 384>}, {pipeline_mode = #tpu.pipeline_mode<synchronous>, transform_indices = @transform_1, window_bounds = array<i64: 16, 16, 8>}, {pipeline_mode = #tpu.pipeline_mode<synchronous>, transform_indices = @transform_2, window_bounds = array<i64: 16, 1>}, {pipeline_mode = #tpu.pipeline_mode<synchronous>, transform_indices = @transform_3, window_bounds = array<i64: 16, 1>}, {transform_indices = @transform_4, window_bounds = array<i64: 1, 4, 16, 288>}]} {
    %c0 = arith.constant 0 : index
    %c0_0 = arith.constant 0 : index
    %0 = vector.load %arg3[%c0, %c0_0] : memref<16x1xf32, #tpu.memory_space<vmem>>, vector<16x1xf32>
    %c0_1 = arith.constant 0 : index
    %c0_2 = arith.constant 0 : index
    %1 = vector.load %arg4[%c0_1, %c0_2] : memref<16x1xf32, #tpu.memory_space<vmem>>, vector<16x1xf32>
    %c0_3 = arith.constant 0 : index
    %c0_4 = arith.constant 0 : index
    %c19 = arith.constant 19 : index
    %2 = vector.load %arg1[%c0_3, %c0_4, %c19] : memref<1x8x384xbf16, #tpu.memory_space<vmem>>, vector<1x8x288xbf16>
    %3 = vector.shape_cast %2 : vector<1x8x288xbf16> to vector<8x288xbf16>
    %c0_5 = arith.constant 0 : index
    %c0_6 = arith.constant 0 : index
    %c0_7 = arith.constant 0 : index
    %4 = vector.load %arg2[%c0_5, %c0_6, %c0_7] : memref<16x16x8xbf16, #tpu.memory_space<vmem>>, vector<1x16x8xbf16>
    %5 = vector.shape_cast %4 : vector<1x16x8xbf16> to vector<16x8xbf16>
    %cst = arith.constant dense<0.000000e+00> : vector<16x288xf32>
    %6 = tpu.matmul %5, %3, %cst {dimension_numbers = #tpu.dot_dimension_numbers<[1], [0], [0], [1], [0, 0, 1, 1], [], []>} : vector<16x8xbf16>, vector<8x288xbf16>, vector<16x288xf32> -> vector<16x288xf32>
    %c0_8 = arith.constant 0 : index
    %c0_9 = arith.constant 0 : index
    %c18 = arith.constant 18 : index
    %7 = vector.load %arg1[%c0_8, %c0_9, %c18] : memref<1x8x384xbf16, #tpu.memory_space<vmem>>, vector<1x8x288xbf16>
    %8 = vector.shape_cast %7 : vector<1x8x288xbf16> to vector<8x288xbf16>
    %c1 = arith.constant 1 : index
    %c0_10 = arith.constant 0 : index
    %c0_11 = arith.constant 0 : index
    %9 = vector.load %arg2[%c1, %c0_10, %c0_11] : memref<16x16x8xbf16, #tpu.memory_space<vmem>>, vector<1x16x8xbf16>
    %10 = vector.shape_cast %9 : vector<1x16x8xbf16> to vector<16x8xbf16>
    %cst_12 = arith.constant dense<0.000000e+00> : vector<16x288xf32>
    %11 = tpu.matmul %10, %8, %cst_12 {dimension_numbers = #tpu.dot_dimension_numbers<[1], [0], [0], [1], [0, 0, 1, 1], [], []>} : vector<16x8xbf16>, vector<8x288xbf16>, vector<16x288xf32> -> vector<16x288xf32>
    %12 = arith.addf %6, %11 : vector<16x288xf32>
    %c0_13 = arith.constant 0 : index
    %c0_14 = arith.constant 0 : index
    %c1_15 = arith.constant 1 : index
    %13 = vector.load %arg1[%c0_13, %c0_14, %c1_15] : memref<1x8x384xbf16, #tpu.memory_space<vmem>>, vector<1x8x288xbf16>
    %14 = vector.shape_cast %13 : vector<1x8x288xbf16> to vector<8x288xbf16>
    %c2 = arith.constant 2 : index
    %c0_16 = arith.constant 0 : index
    %c0_17 = arith.constant 0 : index
    %15 = vector.load %arg2[%c2, %c0_16, %c0_17] : memref<16x16x8xbf16, #tpu.memory_space<vmem>>, vector<1x16x8xbf16>
    %16 = vector.shape_cast %15 : vector<1x16x8xbf16> to vector<16x8xbf16>
    %cst_18 = arith.constant dense<0.000000e+00> : vector<16x288xf32>
    %17 = tpu.matmul %16, %14, %cst_18 {dimension_numbers = #tpu.dot_dimension_numbers<[1], [0], [0], [1], [0, 0, 1, 1], [], []>} : vector<16x8xbf16>, vector<8x288xbf16>, vector<16x288xf32> -> vector<16x288xf32>
    %18 = arith.addf %12, %17 : vector<16x288xf32>
    %c0_19 = arith.constant 0 : index
    %c0_20 = arith.constant 0 : index
    %c0_21 = arith.constant 0 : index
    %19 = vector.load %arg1[%c0_19, %c0_20, %c0_21] : memref<1x8x384xbf16, #tpu.memory_space<vmem>>, vector<1x8x288xbf16>
    %20 = vector.shape_cast %19 : vector<1x8x288xbf16> to vector<8x288xbf16>
    %c3 = arith.constant 3 : index
    %c0_22 = arith.constant 0 : index
    %c0_23 = arith.constant 0 : index
    %21 = vector.load %arg2[%c3, %c0_22, %c0_23] : memref<16x16x8xbf16, #tpu.memory_space<vmem>>, vector<1x16x8xbf16>
    %22 = vector.shape_cast %21 : vector<1x16x8xbf16> to vector<16x8xbf16>
    %cst_24 = arith.constant dense<0.000000e+00> : vector<16x288xf32>
    %23 = tpu.matmul %22, %20, %cst_24 {dimension_numbers = #tpu.dot_dimension_numbers<[1], [0], [0], [1], [0, 0, 1, 1], [], []>} : vector<16x8xbf16>, vector<8x288xbf16>, vector<16x288xf32> -> vector<16x288xf32>
    %24 = arith.addf %18, %23 : vector<16x288xf32>
    %25 = vector.broadcast %0 : vector<16x1xf32> to vector<16x288xf32>
    %26 = arith.mulf %24, %25 : vector<16x288xf32>
    %27 = vector.broadcast %1 : vector<16x1xf32> to vector<16x288xf32>
    %28 = arith.addf %26, %27 : vector<16x288xf32>
    %cst_25 = arith.constant 0.000000e+00 : f32
    %29 = vector.broadcast %cst_25 : f32 to vector<16x288xf32>
    %30 = arith.maximumf %28, %29 : vector<16x288xf32>
    %31 = arith.truncf %30 : vector<16x288xf32> to vector<16x288xbf16>
    %c0_26 = arith.constant 0 : index
    %c0_27 = arith.constant 0 : index
    %c0_28 = arith.constant 0 : index
    %c0_29 = arith.constant 0 : index
    %32 = vector.load %arg5[%c0_26, %c0_27, %c0_28, %c0_29] : memref<1x4x16x288xbf16, #tpu.memory_space<vmem>>, vector<1x1x16x288xbf16>
    %33 = vector.shape_cast %32 : vector<1x1x16x288xbf16> to vector<16x288xbf16>
    %34 = vector.shape_cast %31 : vector<16x288xbf16> to vector<1x1x16x288xbf16>
    tpu.vector_store %arg5[%c0_26, %c0_27, %c0_28, %c0_29], %34 {strides = array<i32>} : memref<1x4x16x288xbf16, #tpu.memory_space<vmem>>, vector<1x1x16x288xbf16>,
    %c0_30 = arith.constant 0 : index
    %c0_31 = arith.constant 0 : index
    %c20 = arith.constant 20 : index
    %35 = vector.load %arg1[%c0_30, %c0_31, %c20] : memref<1x8x384xbf16, #tpu.memory_space<vmem>>, vector<1x8x288xbf16>
    %36 = vector.shape_cast %35 : vector<1x8x288xbf16> to vector<8x288xbf16>
    %c4 = arith.constant 4 : index
    %c0_32 = arith.constant 0 : index
    %c0_33 = arith.constant 0 : index
    %37 = vector.load %arg2[%c4, %c0_32, %c0_33] : memref<16x16x8xbf16, #tpu.memory_space<vmem>>, vector<1x16x8xbf16>
    %38 = vector.shape_cast %37 : vector<1x16x8xbf16> to vector<16x8xbf16>
    %cst_34 = arith.constant dense<0.000000e+00> : vector<16x288xf32>
    %39 = tpu.matmul %38, %36, %cst_34 {dimension_numbers = #tpu.dot_dimension_numbers<[1], [0], [0], [1], [0, 0, 1, 1], [], []>} : vector<16x8xbf16>, vector<8x288xbf16>, vector<16x288xf32> -> vector<16x288xf32>
    %c0_35 = arith.constant 0 : index
    %c0_36 = arith.constant 0 : index
    %c19_37 = arith.constant 19 : index
    %40 = vector.load %arg1[%c0_35, %c0_36, %c19_37] : memref<1x8x384xbf16, #tpu.memory_space<vmem>>, vector<1x8x288xbf16>
    %41 = vector.shape_cast %40 : vector<1x8x288xbf16> to vector<8x288xbf16>
    %c5 = arith.constant 5 : index
    %c0_38 = arith.constant 0 : index
    %c0_39 = arith.constant 0 : index
    %42 = vector.load %arg2[%c5, %c0_38, %c0_39] : memref<16x16x8xbf16, #tpu.memory_space<vmem>>, vector<1x16x8xbf16>
    %43 = vector.shape_cast %42 : vector<1x16x8xbf16> to vector<16x8xbf16>
    %cst_40 = arith.constant dense<0.000000e+00> : vector<16x288xf32>
    %44 = tpu.matmul %43, %41, %cst_40 {dimension_numbers = #tpu.dot_dimension_numbers<[1], [0], [0], [1], [0, 0, 1, 1], [], []>} : vector<16x8xbf16>, vector<8x288xbf16>, vector<16x288xf32> -> vector<16x288xf32>
    %45 = arith.addf %39, %44 : vector<16x288xf32>
    %c0_41 = arith.constant 0 : index
    %c0_42 = arith.constant 0 : index
    %c2_43 = arith.constant 2 : index
    %46 = vector.load %arg1[%c0_41, %c0_42, %c2_43] : memref<1x8x384xbf16, #tpu.memory_space<vmem>>, vector<1x8x288xbf16>
    %47 = vector.shape_cast %46 : vector<1x8x288xbf16> to vector<8x288xbf16>
    %c6 = arith.constant 6 : index
    %c0_44 = arith.constant 0 : index
    %c0_45 = arith.constant 0 : index
    %48 = vector.load %arg2[%c6, %c0_44, %c0_45] : memref<16x16x8xbf16, #tpu.memory_space<vmem>>, vector<1x16x8xbf16>
    %49 = vector.shape_cast %48 : vector<1x16x8xbf16> to vector<16x8xbf16>
    %cst_46 = arith.constant dense<0.000000e+00> : vector<16x288xf32>
    %50 = tpu.matmul %49, %47, %cst_46 {dimension_numbers = #tpu.dot_dimension_numbers<[1], [0], [0], [1], [0, 0, 1, 1], [], []>} : vector<16x8xbf16>, vector<8x288xbf16>, vector<16x288xf32> -> vector<16x288xf32>
    %51 = arith.addf %45, %50 : vector<16x288xf32>
    %c0_47 = arith.constant 0 : index
    %c0_48 = arith.constant 0 : index
    %c1_49 = arith.constant 1 : index
    %52 = vector.load %arg1[%c0_47, %c0_48, %c1_49] : memref<1x8x384xbf16, #tpu.memory_space<vmem>>, vector<1x8x288xbf16>
    %53 = vector.shape_cast %52 : vector<1x8x288xbf16> to vector<8x288xbf16>
    %c7 = arith.constant 7 : index
    %c0_50 = arith.constant 0 : index
    %c0_51 = arith.constant 0 : index
    %54 = vector.load %arg2[%c7, %c0_50, %c0_51] : memref<16x16x8xbf16, #tpu.memory_space<vmem>>, vector<1x16x8xbf16>
    %55 = vector.shape_cast %54 : vector<1x16x8xbf16> to vector<16x8xbf16>
    %cst_52 = arith.constant dense<0.000000e+00> : vector<16x288xf32>
    %56 = tpu.matmul %55, %53, %cst_52 {dimension_numbers = #tpu.dot_dimension_numbers<[1], [0], [0], [1], [0, 0, 1, 1], [], []>} : vector<16x8xbf16>, vector<8x288xbf16>, vector<16x288xf32> -> vector<16x288xf32>
    %57 = arith.addf %51, %56 : vector<16x288xf32>
    %58 = vector.broadcast %0 : vector<16x1xf32> to vector<16x288xf32>
    %59 = arith.mulf %57, %58 : vector<16x288xf32>
    %60 = vector.broadcast %1 : vector<16x1xf32> to vector<16x288xf32>
    %61 = arith.addf %59, %60 : vector<16x288xf32>
    %cst_53 = arith.constant 0.000000e+00 : f32
    %62 = vector.broadcast %cst_53 : f32 to vector<16x288xf32>
    %63 = arith.maximumf %61, %62 : vector<16x288xf32>
    %64 = arith.truncf %63 : vector<16x288xf32> to vector<16x288xbf16>
    %c0_54 = arith.constant 0 : index
    %c1_55 = arith.constant 1 : index
    %c0_56 = arith.constant 0 : index
    %c0_57 = arith.constant 0 : index
    %65 = vector.load %arg5[%c0_54, %c1_55, %c0_56, %c0_57] : memref<1x4x16x288xbf16, #tpu.memory_space<vmem>>, vector<1x1x16x288xbf16>
    %66 = vector.shape_cast %65 : vector<1x1x16x288xbf16> to vector<16x288xbf16>
    %67 = vector.shape_cast %64 : vector<16x288xbf16> to vector<1x1x16x288xbf16>
    tpu.vector_store %arg5[%c0_54, %c1_55, %c0_56, %c0_57], %67 {strides = array<i32>} : memref<1x4x16x288xbf16, #tpu.memory_space<vmem>>, vector<1x1x16x288xbf16>,
    %c0_58 = arith.constant 0 : index
    %c0_59 = arith.constant 0 : index
    %c37 = arith.constant 37 : index
    %68 = vector.load %arg1[%c0_58, %c0_59, %c37] : memref<1x8x384xbf16, #tpu.memory_space<vmem>>, vector<1x8x288xbf16>
    %69 = vector.shape_cast %68 : vector<1x8x288xbf16> to vector<8x288xbf16>
    %c8 = arith.constant 8 : index
    %c0_60 = arith.constant 0 : index
    %c0_61 = arith.constant 0 : index
    %70 = vector.load %arg2[%c8, %c0_60, %c0_61] : memref<16x16x8xbf16, #tpu.memory_space<vmem>>, vector<1x16x8xbf16>
    %71 = vector.shape_cast %70 : vector<1x16x8xbf16> to vector<16x8xbf16>
    %cst_62 = arith.constant dense<0.000000e+00> : vector<16x288xf32>
    %72 = tpu.matmul %71, %69, %cst_62 {dimension_numbers = #tpu.dot_dimension_numbers<[1], [0], [0], [1], [0, 0, 1, 1], [], []>} : vector<16x8xbf16>, vector<8x288xbf16>, vector<16x288xf32> -> vector<16x288xf32>
    %c0_63 = arith.constant 0 : index
    %c0_64 = arith.constant 0 : index
    %c36 = arith.constant 36 : index
    %73 = vector.load %arg1[%c0_63, %c0_64, %c36] : memref<1x8x384xbf16, #tpu.memory_space<vmem>>, vector<1x8x288xbf16>
    %74 = vector.shape_cast %73 : vector<1x8x288xbf16> to vector<8x288xbf16>
    %c9 = arith.constant 9 : index
    %c0_65 = arith.constant 0 : index
    %c0_66 = arith.constant 0 : index
    %75 = vector.load %arg2[%c9, %c0_65, %c0_66] : memref<16x16x8xbf16, #tpu.memory_space<vmem>>, vector<1x16x8xbf16>
    %76 = vector.shape_cast %75 : vector<1x16x8xbf16> to vector<16x8xbf16>
    %cst_67 = arith.constant dense<0.000000e+00> : vector<16x288xf32>
    %77 = tpu.matmul %76, %74, %cst_67 {dimension_numbers = #tpu.dot_dimension_numbers<[1], [0], [0], [1], [0, 0, 1, 1], [], []>} : vector<16x8xbf16>, vector<8x288xbf16>, vector<16x288xf32> -> vector<16x288xf32>
    %78 = arith.addf %72, %77 : vector<16x288xf32>
    %c0_68 = arith.constant 0 : index
    %c0_69 = arith.constant 0 : index
    %c19_70 = arith.constant 19 : index
    %79 = vector.load %arg1[%c0_68, %c0_69, %c19_70] : memref<1x8x384xbf16, #tpu.memory_space<vmem>>, vector<1x8x288xbf16>
    %80 = vector.shape_cast %79 : vector<1x8x288xbf16> to vector<8x288xbf16>
    %c10 = arith.constant 10 : index
    %c0_71 = arith.constant 0 : index
    %c0_72 = arith.constant 0 : index
    %81 = vector.load %arg2[%c10, %c0_71, %c0_72] : memref<16x16x8xbf16, #tpu.memory_space<vmem>>, vector<1x16x8xbf16>
    %82 = vector.shape_cast %81 : vector<1x16x8xbf16> to vector<16x8xbf16>
    %cst_73 = arith.constant dense<0.000000e+00> : vector<16x288xf32>
    %83 = tpu.matmul %82, %80, %cst_73 {dimension_numbers = #tpu.dot_dimension_numbers<[1], [0], [0], [1], [0, 0, 1, 1], [], []>} : vector<16x8xbf16>, vector<8x288xbf16>, vector<16x288xf32> -> vector<16x288xf32>
    %84 = arith.addf %78, %83 : vector<16x288xf32>
    %c0_74 = arith.constant 0 : index
    %c0_75 = arith.constant 0 : index
    %c18_76 = arith.constant 18 : index
    %85 = vector.load %arg1[%c0_74, %c0_75, %c18_76] : memref<1x8x384xbf16, #tpu.memory_space<vmem>>, vector<1x8x288xbf16>
    %86 = vector.shape_cast %85 : vector<1x8x288xbf16> to vector<8x288xbf16>
    %c11 = arith.constant 11 : index
    %c0_77 = arith.constant 0 : index
    %c0_78 = arith.constant 0 : index
    %87 = vector.load %arg2[%c11, %c0_77, %c0_78] : memref<16x16x8xbf16, #tpu.memory_space<vmem>>, vector<1x16x8xbf16>
    %88 = vector.shape_cast %87 : vector<1x16x8xbf16> to vector<16x8xbf16>
    %cst_79 = arith.constant dense<0.000000e+00> : vector<16x288xf32>
    %89 = tpu.matmul %88, %86, %cst_79 {dimension_numbers = #tpu.dot_dimension_numbers<[1], [0], [0], [1], [0, 0, 1, 1], [], []>} : vector<16x8xbf16>, vector<8x288xbf16>, vector<16x288xf32> -> vector<16x288xf32>
    %90 = arith.addf %84, %89 : vector<16x288xf32>
    %91 = vector.broadcast %0 : vector<16x1xf32> to vector<16x288xf32>
    %92 = arith.mulf %90, %91 : vector<16x288xf32>
    %93 = vector.broadcast %1 : vector<16x1xf32> to vector<16x288xf32>
    %94 = arith.addf %92, %93 : vector<16x288xf32>
    %cst_80 = arith.constant 0.000000e+00 : f32
    %95 = vector.broadcast %cst_80 : f32 to vector<16x288xf32>
    %96 = arith.maximumf %94, %95 : vector<16x288xf32>
    %97 = arith.truncf %96 : vector<16x288xf32> to vector<16x288xbf16>
    %c0_81 = arith.constant 0 : index
    %c2_82 = arith.constant 2 : index
    %c0_83 = arith.constant 0 : index
    %c0_84 = arith.constant 0 : index
    %98 = vector.load %arg5[%c0_81, %c2_82, %c0_83, %c0_84] : memref<1x4x16x288xbf16, #tpu.memory_space<vmem>>, vector<1x1x16x288xbf16>
    %99 = vector.shape_cast %98 : vector<1x1x16x288xbf16> to vector<16x288xbf16>
    %100 = vector.shape_cast %97 : vector<16x288xbf16> to vector<1x1x16x288xbf16>
    tpu.vector_store %arg5[%c0_81, %c2_82, %c0_83, %c0_84], %100 {strides = array<i32>} : memref<1x4x16x288xbf16, #tpu.memory_space<vmem>>, vector<1x1x16x288xbf16>,
    %c0_85 = arith.constant 0 : index
    %c0_86 = arith.constant 0 : index
    %c38 = arith.constant 38 : index
    %101 = vector.load %arg1[%c0_85, %c0_86, %c38] : memref<1x8x384xbf16, #tpu.memory_space<vmem>>, vector<1x8x288xbf16>
    %102 = vector.shape_cast %101 : vector<1x8x288xbf16> to vector<8x288xbf16>
    %c12 = arith.constant 12 : index
    %c0_87 = arith.constant 0 : index
    %c0_88 = arith.constant 0 : index
    %103 = vector.load %arg2[%c12, %c0_87, %c0_88] : memref<16x16x8xbf16, #tpu.memory_space<vmem>>, vector<1x16x8xbf16>
    %104 = vector.shape_cast %103 : vector<1x16x8xbf16> to vector<16x8xbf16>
    %cst_89 = arith.constant dense<0.000000e+00> : vector<16x288xf32>
    %105 = tpu.matmul %104, %102, %cst_89 {dimension_numbers = #tpu.dot_dimension_numbers<[1], [0], [0], [1], [0, 0, 1, 1], [], []>} : vector<16x8xbf16>, vector<8x288xbf16>, vector<16x288xf32> -> vector<16x288xf32>
    %c0_90 = arith.constant 0 : index
    %c0_91 = arith.constant 0 : index
    %c37_92 = arith.constant 37 : index
    %106 = vector.load %arg1[%c0_90, %c0_91, %c37_92] : memref<1x8x384xbf16, #tpu.memory_space<vmem>>, vector<1x8x288xbf16>
    %107 = vector.shape_cast %106 : vector<1x8x288xbf16> to vector<8x288xbf16>
    %c13 = arith.constant 13 : index
    %c0_93 = arith.constant 0 : index
    %c0_94 = arith.constant 0 : index
    %108 = vector.load %arg2[%c13, %c0_93, %c0_94] : memref<16x16x8xbf16, #tpu.memory_space<vmem>>, vector<1x16x8xbf16>
    %109 = vector.shape_cast %108 : vector<1x16x8xbf16> to vector<16x8xbf16>
    %cst_95 = arith.constant dense<0.000000e+00> : vector<16x288xf32>
    %110 = tpu.matmul %109, %107, %cst_95 {dimension_numbers = #tpu.dot_dimension_numbers<[1], [0], [0], [1], [0, 0, 1, 1], [], []>} : vector<16x8xbf16>, vector<8x288xbf16>, vector<16x288xf32> -> vector<16x288xf32>
    %111 = arith.addf %105, %110 : vector<16x288xf32>
    %c0_96 = arith.constant 0 : index
    %c0_97 = arith.constant 0 : index
    %c20_98 = arith.constant 20 : index
    %112 = vector.load %arg1[%c0_96, %c0_97, %c20_98] : memref<1x8x384xbf16, #tpu.memory_space<vmem>>, vector<1x8x288xbf16>
    %113 = vector.shape_cast %112 : vector<1x8x288xbf16> to vector<8x288xbf16>
    %c14 = arith.constant 14 : index
    %c0_99 = arith.constant 0 : index
    %c0_100 = arith.constant 0 : index
    %114 = vector.load %arg2[%c14, %c0_99, %c0_100] : memref<16x16x8xbf16, #tpu.memory_space<vmem>>, vector<1x16x8xbf16>
    %115 = vector.shape_cast %114 : vector<1x16x8xbf16> to vector<16x8xbf16>
    %cst_101 = arith.constant dense<0.000000e+00> : vector<16x288xf32>
    %116 = tpu.matmul %115, %113, %cst_101 {dimension_numbers = #tpu.dot_dimension_numbers<[1], [0], [0], [1], [0, 0, 1, 1], [], []>} : vector<16x8xbf16>, vector<8x288xbf16>, vector<16x288xf32> -> vector<16x288xf32>
    %117 = arith.addf %111, %116 : vector<16x288xf32>
    %c0_102 = arith.constant 0 : index
    %c0_103 = arith.constant 0 : index
    %c19_104 = arith.constant 19 : index
    %118 = vector.load %arg1[%c0_102, %c0_103, %c19_104] : memref<1x8x384xbf16, #tpu.memory_space<vmem>>, vector<1x8x288xbf16>
    %119 = vector.shape_cast %118 : vector<1x8x288xbf16> to vector<8x288xbf16>
    %c15 = arith.constant 15 : index
    %c0_105 = arith.constant 0 : index
    %c0_106 = arith.constant 0 : index
    %120 = vector.load %arg2[%c15, %c0_105, %c0_106] : memref<16x16x8xbf16, #tpu.memory_space<vmem>>, vector<1x16x8xbf16>
    %121 = vector.shape_cast %120 : vector<1x16x8xbf16> to vector<16x8xbf16>
    %cst_107 = arith.constant dense<0.000000e+00> : vector<16x288xf32>
    %122 = tpu.matmul %121, %119, %cst_107 {dimension_numbers = #tpu.dot_dimension_numbers<[1], [0], [0], [1], [0, 0, 1, 1], [], []>} : vector<16x8xbf16>, vector<8x288xbf16>, vector<16x288xf32> -> vector<16x288xf32>
    %123 = arith.addf %117, %122 : vector<16x288xf32>
    %124 = vector.broadcast %0 : vector<16x1xf32> to vector<16x288xf32>
    %125 = arith.mulf %123, %124 : vector<16x288xf32>
    %126 = vector.broadcast %1 : vector<16x1xf32> to vector<16x288xf32>
    %127 = arith.addf %125, %126 : vector<16x288xf32>
    %cst_108 = arith.constant 0.000000e+00 : f32
    %128 = vector.broadcast %cst_108 : f32 to vector<16x288xf32>
    %129 = arith.maximumf %127, %128 : vector<16x288xf32>
    %130 = arith.truncf %129 : vector<16x288xf32> to vector<16x288xbf16>
    %c0_109 = arith.constant 0 : index
    %c3_110 = arith.constant 3 : index
    %c0_111 = arith.constant 0 : index
    %c0_112 = arith.constant 0 : index
    %131 = vector.load %arg5[%c0_109, %c3_110, %c0_111, %c0_112] : memref<1x4x16x288xbf16, #tpu.memory_space<vmem>>, vector<1x1x16x288xbf16>
    %132 = vector.shape_cast %131 : vector<1x1x16x288xbf16> to vector<16x288xbf16>
    %133 = vector.shape_cast %130 : vector<16x288xbf16> to vector<1x1x16x288xbf16>
    tpu.vector_store %arg5[%c0_109, %c3_110, %c0_111, %c0_112], %133 {strides = array<i32>} : memref<1x4x16x288xbf16, #tpu.memory_space<vmem>>, vector<1x1x16x288xbf16>,
    return
  }
  func.func @transform_0(%arg0: i32) -> (i32, i32, i32) {
    %c0_i32 = arith.constant 0 : i32
    %c0_i32_0 = arith.constant 0 : i32
    %c0_i32_1 = arith.constant 0 : i32
    return %arg0, %c0_i32, %c0_i32_0 : i32, i32, i32
  }
  func.func @transform_1(%arg0: i32) -> (i32, i32, i32) {
    %c0_i32 = arith.constant 0 : i32
    %c0_i32_0 = arith.constant 0 : i32
    %c0_i32_1 = arith.constant 0 : i32
    %c0_i32_2 = arith.constant 0 : i32
    return %c0_i32, %c0_i32_0, %c0_i32_1 : i32, i32, i32
  }
  func.func @transform_2(%arg0: i32) -> (i32, i32) {
    %c0_i32 = arith.constant 0 : i32
    %c0_i32_0 = arith.constant 0 : i32
    %c0_i32_1 = arith.constant 0 : i32
    return %c0_i32, %c0_i32_0 : i32, i32
  }
  func.func @transform_3(%arg0: i32) -> (i32, i32) {
    %c0_i32 = arith.constant 0 : i32
    %c0_i32_0 = arith.constant 0 : i32
    %c0_i32_1 = arith.constant 0 : i32
    return %c0_i32, %c0_i32_0 : i32, i32
  }
  func.func @transform_4(%arg0: i32) -> (i32, i32, i32, i32) {
    %c0_i32 = arith.constant 0 : i32
    %c0_i32_0 = arith.constant 0 : i32
    %c0_i32_1 = arith.constant 0 : i32
    %c0_i32_2 = arith.constant 0 : i32
    return %arg0, %c0_i32, %c0_i32_0, %c0_i32_1 : i32, i32, i32, i32
  }
}

</mosaic_0001>

<bundles_post_ra>
// kernel: deconv2d_batchnorm_relu.3
= control target key start
LH: loop header
LB: loop body
LE: loop exit
PB: predicated region body
PF: predicated region fallthrough
CT: control target
= control target key end

     0   :  { %s2803_s15 = smov 0   ;;  %s3209_s0 = inlined_call_operand.vmem [shape: bf16[2,8,384], index: 0, kind: input, shape index: {}]   ;;  %s3210_s1 = inlined_call_operand.vmem [shape: bf16[16,16,8], index: 1, kind: input, shape index: {}]   ;;  %s3211_s2 = inlined_call_operand.vmem [shape: f32[16,1], index: 2, kind: input, shape index: {}]   ;;  %s3212_s3 = inlined_call_operand.vmem [shape: f32[16,1], index: 3, kind: input, shape index: {}]   ;;  %s3213_s4 = inlined_call_operand.vmem [shape: bf16[2,4,16,288], index: 4, kind: output, shape index: {}]  }
   0x1 LB: > { %s2331_s16 = sadd.s32 4294967295, %s2765_s15   ;;  %p2335_p0 = scmp.ge.s32.totalorder %s2765_s15, 1  ;;  %s2765_s15 = sphi %s2803_s15, %s14_s15  }
   0x2   : > { %p162_p1 = scmp.lt.s32.totalorder %s2765_s15, 3 }
   0x4   : > { %p163_p2 = pnand %p2335_p0, %p162_p1 }
   0x5   : > { %p188_p3 = scmp.lt.s32.totalorder (!%p163_p2), %s2331_s16, 1  ;;  %v2767_v0 = vmov (!%p163_p2), 0.0   ;;  %vm2768_vm0 = vmmov (!%p163_p2), 0   ;;  %v2769_v1 = vmov (!%p163_p2), 0   ;;  %s2770_s21 = smov (!%p163_p2), 110   ;;  %v199_v9 = vld [vmem:[%s3211_s2] sm:$0xff] (!%p163_p2) }
   0x6   : > { %166 = sbr.rel (%p163_p2) target bundleno = 536 (0x218), region = 36  ;;  %2522 = vmatprep.subr.bf16.mxu1 (!%p163_p2), %v2767_v0  ;;  %2524 = vmatprep.mubr.msk.bf16.mxu1 (!%p163_p2), %vm2768_vm0, %v2767_v0  ;;  %s2771_s22 = smov (!%p163_p2), 109   ;;  %v201_v10 = vld [vmem:[%s3212_s3] sm:$0xff] (!%p163_p2)  ;;  %v200_v11 = vld [vmem:[%s3211_s2 + $0x8] sm:$0xff] (!%p163_p2)  ;;  %vm236_vm1 = vcmask (!%p163_p2), 1043456   ;;  %vm232_vm2 = vcmask (!%p163_p2), 64512  }
   0x7   : > { %278 = vmatprep.mubr.bf16.mxu0 (!%p163_p2), %v2769_v1  ;;  %2735 = vset.pattern.permute.xlu1 (!%p163_p2), %v2769_v1  ;;  %s2772_s23 = smov (!%p163_p2), 127   ;;  %s2773_s24 = smov (!%p163_p2), 108   ;;  %v202_v12 = vld [vmem:[%s3212_s3 + $0x8] sm:$0xff] (!%p163_p2)  ;;  %vm229_vm3 = vcmask (!%p163_p2), 900096   ;;  %vm341_vm4 = vcmask (!%p163_p2), 891904   ;;  %v2744_v29 = vld [vmem:[%s3210_s1] sm:$0xff] (!%p163_p2)  }
   0x8   : > { %2736 = vset.pattern.permute.xlu0 (!%p163_p2), %v2769_v1  ;;  %s2774_s25 = smov (!%p163_p2), 126   ;;  %s2775_s26 = smov (!%p163_p2), 92   ;;  %v2742_v16 = vld [vmem:[%s3210_s1 + $0x8] sm:$0xff] (!%p163_p2)   ;;  %vm454_vm5 = vcmask (!%p163_p2), 1039360   ;;  %v2745_v36 = vld [vmem:[%s3210_s1 + $0x10] sm:$0xff] (!%p163_p2)   ;;  %v2746_v43 = vld [vmem:[%s3210_s1 + $0x18] sm:$0xff] (!%p163_p2)  }
   0x9   : > { %s2776_s27 = smov (!%p163_p2), 91   ;;  %s2777_s28 = smov (!%p163_p2), 90   ;;  %vm868_vm6 = vcmask (!%p163_p2), 883712   ;;  %v2747_v50 = vld [vmem:[%s3210_s1 + $0x28] sm:$0xff] (!%p163_p2)   ;;  %vm981_vm7 = vcmask (!%p163_p2), 1031168   ;;  %v2748_v59 = vld [vmem:[%s3210_s1 + $0x20] sm:$0xff] (!%p163_p2)  }
   0xa   : > { %vm1274_vm8 = vcmask (!%p163_p2), 752640   ;;  %vm1384_vm9 = vcmask (!%p163_p2), 744448   ;;  %vm1898_vm10 = vcmask (!%p163_p2), 736256   ;;  %vm728_vm11 = vcmask (!%p163_p2), 257024  }
   0xd   : > { %s3215_s16 = smov (!%p188_p3, %s2331_s16), 1 }
   0xe   : > { %s2714_s17 = smul.u32 12, %s3215_s16 }
  0x10   : > { %s2822_s20 = scalar_lea.vmem %s3209_s0, %s2714_s17 }
  0x11   : > { %v2826_v2 = vld [vmem:[%s2822_s20 + $0x8] ss:$0 sps:$4 sm:$0xff]   ;;  %v203_v3 = vld [vmem:[%s2822_s20] sm:$0xff] }
  0x12   : > { %v2829_v4 = vcombine.low %v203_v3, %v203_v3  ;;  %227 = vrot.lane.b32.xlu1 %v2826_v2, %s2770_s21  ;;  %v2835_v5 = vcombine.high %v203_v3, %v203_v3  ;;  %v2740_v6 = vld [vmem:[%s2822_s20 + $0x8] ss:$0 sps:$4 sm:$0xff]   ;;  %v577_v38 = vsel %vm236_vm1, %v2826_v2, 0 }
  0x13   : > { %v2741_v7 = vld [vmem:[%s2822_s20 + $0x8] ss:$0 sps:$4 sm:$0xff]  }
  0x14   : > { %223 = vrot.lane.b32.xlu0 %v2829_v4, %s2770_s21  ;;  %v2743_v8 = vld [vmem:[%s2822_s20 + $0x8] ss:$0 sps:$4 sm:$0xff]   ;;  %v571_v41 = vsel %vm236_vm1, %v2829_v4, 0 }
  0x16   : > { %335 = vrot.lane.b32.xlu1 %v2829_v4, %s2771_s22 }
  0x18   : > { %225 = vrot.lane.b32.xlu0 %v2835_v5, %s2770_s21 }
  0x1a   : > { %339 = vrot.lane.b32.xlu1 %v2826_v2, %s2771_s22 }
  0x1c   : > { %337 = vrot.lane.b32.xlu0 %v2835_v5, %s2771_s22 }
  0x1e   : > { %450 = vrot.lane.b32.xlu1 %v2835_v5, %s2772_s23 }
  0x20   : > { %448 = vrot.lane.b32.xlu0 %v2829_v4, %s2772_s23 }
  0x22   : > { %753 = vrot.lane.b32.xlu1 %v2829_v4, %s2771_s22 }
  0x24   : > { %452 = vrot.lane.b32.xlu0 %v2826_v2, %s2772_s23 }
  0x26   : > { %757 = vrot.lane.b32.xlu1 %v2740_v6, %s2771_s22 }
  0x28   : > { %755 = vrot.lane.b32.xlu0 %v2835_v5, %s2771_s22 }
  0x2a   : > { %864 = vrot.lane.b32.xlu1 %v2835_v5, %s2773_s24 }
  0x2c   : > { %862 = vrot.lane.b32.xlu0 %v2829_v4, %s2773_s24 }
  0x2e   : > { %975 = vrot.lane.b32.xlu1 %v2829_v4, %s2774_s25 }
  0x30   : > { %866 = vrot.lane.b32.xlu0 %v2740_v6, %s2773_s24 }
  0x32   : > { %979 = vrot.lane.b32.xlu1 %v2740_v6, %s2774_s25 }
  0x34   : > { %977 = vrot.lane.b32.xlu0 %v2835_v5, %s2774_s25 }
  0x36   : > { %1096 = vrot.lane.b32.xlu1 %v2835_v5, %s2772_s23 }
  0x38   : > { %1094 = vrot.lane.b32.xlu0 %v2829_v4, %s2772_s23 }
  0x3a   : > { %1268 = vrot.lane.b32.xlu1 %v2829_v4, %s2775_s26 }
  0x3c   : > { %1098 = vrot.lane.b32.xlu0 %v2740_v6, %s2772_s23 }
  0x3e   : > { %1272 = vrot.lane.b32.xlu1 %v2741_v7, %s2775_s26 }
  0x40   : > { %1270 = vrot.lane.b32.xlu0 %v2835_v5, %s2775_s26 }
  0x42   : > { %1380 = vrot.lane.b32.xlu1 %v2835_v5, %s2776_s27 }
  0x44   : > { %1378 = vrot.lane.b32.xlu0 %v2829_v4, %s2776_s27 }
  0x46   : > { %1491 = vrot.lane.b32.xlu1 %v2829_v4, %s2771_s22 }
  0x48   : > { %1382 = vrot.lane.b32.xlu0 %v2741_v7, %s2776_s27 }
  0x4a   : > { %1495 = vrot.lane.b32.xlu1 %v2741_v7, %s2771_s22 }
  0x4c   : > { %1493 = vrot.lane.b32.xlu0 %v2835_v5, %s2771_s22 }
  0x4e   : > { %1611 = vrot.lane.b32.xlu1 %v2835_v5, %s2770_s21 }
  0x50   : > { %1609 = vrot.lane.b32.xlu0 %v2829_v4, %s2770_s21 }
  0x52   : > { %1783 = vrot.lane.b32.xlu1 %v2829_v4, %s2776_s27 }
  0x54   : > { %1613 = vrot.lane.b32.xlu0 %v2741_v7, %s2770_s21  ;;  %s2715_s21 = smul.u32 96, %s3215_s16 }
  0x56   : > { %1787 = vrot.lane.b32.xlu1 %v2743_v8, %s2776_s27 }
  0x58   : > { %1785 = vrot.lane.b32.xlu0 %v2835_v5, %s2776_s27 }
  0x5a   : > { %1894 = vrot.lane.b32.xlu1 %v2835_v5, %s2777_s28 }
  0x5c   : > { %1892 = vrot.lane.b32.xlu0 %v2829_v4, %s2777_s28 }
  0x5e   : > { %2005 = vrot.lane.b32.xlu1 %v2829_v4, %s2773_s24 }
  0x60   : > { %1896 = vrot.lane.b32.xlu0 %v2743_v8, %s2777_s28 }
  0x62   : > { %2009 = vrot.lane.b32.xlu1 %v2743_v8, %s2773_s24 }
  0x64   : > { %2007 = vrot.lane.b32.xlu0 %v2835_v5, %s2773_s24  ;;  %s3136_s24 = scalar_lea.vmem %s3213_s4, %s2715_s21 }
  0x66   : > { %2125 = vrot.lane.b32.xlu1 %v2835_v5, %s2771_s22 }
  0x68   : > { %2123 = vrot.lane.b32.xlu0 %v2829_v4, %s2771_s22 }
  0x6a   : > { %671 = vperm.xlu1 %2735, %v199_v9  }
  0x6c   : > { %2127 = vrot.lane.b32.xlu0 %v2743_v8, %s2771_s22 }
  0x6e   : > { %687 = vperm.xlu1 %2735, %v201_v10  }
  0x70   : > { %676 = vperm.xlu0 %2736, %v200_v11  }
  0x72   : > { %692 = vperm.xlu1 %2735, %v202_v12  }
  0x84   : > { %v228_v13 = vpop.permute.xlu1 %227 }
  0x85   : > { %v244_v15 = vsel %vm236_vm1, %v228_v13, 0 }
  0x86   : > { %v224_v14 = vpop.permute.xlu0 %223  ;;  %2523 = vmatpush3.bf16.msra.mxu1 %v244_v15 }
  0x87   : > { %2528 = vmatprep.subr.bf16.mxu1 %v2767_v0 }
  0x88   : > { %v336_v17 = vpop.permute.xlu1 %335 }
  0x89   : > { %2525 = vmatmul.mubr.msk.bf16.vlgmr.msra.gmra.mrb[0].mxu1 %vm232_vm2, %v2742_v16 }
  0x8a   : > { %v226_v18 = vpop.permute.xlu0 %225  ;;  %2530 = vmatprep.mubr.msk.bf16.mxu1 %vm2768_vm0, %v2767_v0 }
  0x8b   : > { %v231_v19 = vsel %vm229_vm3, %v226_v18, %v228_v13  ;;  %v230_v20 = vsel %vm229_vm3, %v224_v14, %v226_v18  ;;  %v2750_v13 = vld [vmem:[%s3210_s1 + $0x38] sm:$0xff]  }
  0x8c   : > { %2344 = vmatprep.subr.msk.bf16.mxu0 %vm236_vm1, %v231_v19  ;;  %v238_v21 = vsel %vm236_vm1, %v230_v20, 0  ;;  %v340_v22 = vpop.permute.xlu1 %339  ;;  %v2751_v20 = vld [vmem:[%s3210_s1 + $0x48] sm:$0xff]  }
  0x8d   : > { %247 = vmatpush1.bf16.msra.mxu0 %v238_v21  ;;  %v354_v23 = vsel %vm236_vm1, %v340_v22, 0 }
  0x8e   : > { %v338_v24 = vpop.permute.xlu0 %337  ;;  %2529 = vmatpush3.bf16.msra.mxu1 %v354_v23 }
  0x8f   : > { %v342_v25 = vsel %vm341_vm4, %v336_v17, %v338_v24  ;;  %v343_v26 = vsel %vm341_vm4, %v338_v24, %v340_v22  ;;  %2534 = vmatprep.subr.bf16.mxu1 %v2767_v0 }
  0x90   : > { %v348_v27 = vsel %vm236_vm1, %v342_v25, 0  ;;  %2345 = vmatmul.mubr.msk.bf16.vlgmr.msra.gmra.mrb[0].mxu0 %vm232_vm2, %v2742_v16  ;;  %2348 = vmatprep.subr.msk.bf16.mxu0 %vm236_vm1, %v343_v26  ;;  %v451_v30 = vpop.permute.xlu1 %450 }
  0x91   : > { %357 = vmatpush1.bf16.msra.mxu0 %v348_v27  ;;  %388 = vmatprep.mubr.bf16.mxu0 %v2769_v1 }
  0x92   : > { %v449_v28 = vpop.permute.xlu0 %448 }
  0x93   : > { %v455_v32 = vsel %vm454_vm5, %v449_v28, %v451_v30 }
  0x94   : > { %v461_v35 = vsel %vm236_vm1, %v455_v32, 0  ;;  %v754_v37 = vpop.permute.xlu1 %753 }
  0x95   : > { %2531 = vmatmul.mubr.msk.bf16.vlgmr.msra.gmra.mrb[0].mxu1 %vm232_vm2, %v2744_v29 }
  0x96   : > { %v453_v31 = vpop.permute.xlu0 %452  ;;  %2536 = vmatprep.mubr.msk.bf16.mxu1 %vm2768_vm0, %v2767_v0 }
  0x97   : > { %v456_v33 = vsel %vm454_vm5, %v451_v30, %v453_v31  ;;  %v467_v34 = vsel %vm236_vm1, %v453_v31, 0 }
  0x98   : > { %2354 = vmatprep.subr.msk.bf16.mxu0 %vm236_vm1, %v456_v33  ;;  %2535 = vmatpush3.bf16.msra.mxu1 %v467_v34  ;;  %v758_v40 = vpop.permute.xlu1 %757 }
  0x99   : > { %2540 = vmatprep.subr.bf16.mxu1 %v2767_v0  ;;  %v771_v45 = vsel %vm236_vm1, %v758_v40, 0 }
  0x9a   : > { %v756_v39 = vpop.permute.xlu0 %755 }
  0x9b   : > { %v760_v42 = vsel %vm341_vm4, %v756_v39, %v758_v40  ;;  %v759_v47 = vsel %vm341_vm4, %v754_v37, %v756_v39  ;;  %v2753_v37 = vld [vmem:[%s3210_s1 + $0x50] sm:$0xff]  }
  0x9c   : > { %2349 = vmatmul.mubr.msk.bf16.vlgmr.msra.gmra.mrb[0].mxu0 %vm232_vm2, %v2744_v29  ;;  %v865_v46 = vpop.permute.xlu1 %864  ;;  %v765_v49 = vsel %vm236_vm1, %v759_v47, 0  ;;  %v2752_v29 = vld [vmem:[%s3210_s1 + $0x40] sm:$0xff]  }
  0x9d   : > { %470 = vmatpush1.bf16.msra.mxu0 %v461_v35  ;;  %501 = vmatprep.mubr.bf16.mxu0 %v2769_v1 }
  0x9e   : > { %2360 = vmatprep.subr.msk.bf16.mxu0 %vm236_vm1, %v2835_v5  ;;  %v863_v44 = vpop.permute.xlu0 %862  ;;  %v2749_v5 = vld [vmem:[%s3210_s1 + $0x30] sm:$0xff]  }
  0x9f   : > { %v869_v54 = vsel %vm868_vm6, %v863_v44, %v865_v46 }
  0xa0   : > { %v976_v51 = vpop.permute.xlu1 %975  ;;  %v875_v57 = vsel %vm236_vm1, %v869_v54, 0 }
  0xa1   : > { %2537 = vmatmul.mubr.msk.bf16.vlgmr.msra.gmra.mrb[0].mxu1 %vm232_vm2, %v2745_v36 }
  0xa2   : > { %2541 = vmatpush3.bf16.msra.mxu1 %v577_v38  ;;  %2542 = vmatprep.mubr.msk.bf16.mxu1 %vm2768_vm0, %v2767_v0  ;;  %v867_v48 = vpop.permute.xlu0 %866 }
  0xa3   : > { %2546 = vmatprep.subr.bf16.mxu1 %v2767_v0  ;;  %v870_v52 = vsel %vm868_vm6, %v865_v46, %v867_v48  ;;  %v881_v53 = vsel %vm236_vm1, %v867_v48, 0 }
  0xa4   : > { %v980_v56 = vpop.permute.xlu1 %979 }
  0xa5   : > { %v994_v61 = vsel %vm236_vm1, %v980_v56, 0 }
  0xa6   : > { %v978_v55 = vpop.permute.xlu0 %977 }
  0xa7   : > { %v983_v58 = vsel %vm981_vm7, %v978_v55, %v980_v56  ;;  %v982_v62 = vsel %vm981_vm7, %v976_v51, %v978_v55 }
  0xa8   : > { %2355 = vmatmul.mubr.msk.bf16.vlgmr.msra.gmra.mrb[0].mxu0 %vm232_vm2, %v2745_v36  ;;  %v1097_v63 = vpop.permute.xlu1 %1096  ;;  %v988_v3 = vsel %vm236_vm1, %v982_v62, 0 }
  0xa9   : > { %580 = vmatpush1.bf16.msra.mxu0 %v571_v41  ;;  %611 = vmatprep.mubr.bf16.mxu0 %v2769_v1 }
  0xaa   : > { %2375 = vmatprep.subr.msk.bf16.mxu0 %vm236_vm1, %v760_v42  ;;  %v1095_v60 = vpop.permute.xlu0 %1094 }
  0xab   : > { %v1100_v8 = vsel %vm454_vm5, %v1095_v60, %v1097_v63 }
  0xac   : > { %v1269_v6 = vpop.permute.xlu1 %1268  ;;  %v1106_v11 = vsel %vm236_vm1, %v1100_v8, 0 }
  0xad   : > { %2543 = vmatmul.mubr.msk.bf16.vlgmr.msra.gmra.mrb[0].mxu1 %vm232_vm2, %v2746_v43 }
  0xae   : > { %2547 = vmatpush3.bf16.msra.mxu1 %v771_v45  ;;  %2548 = vmatprep.mubr.msk.bf16.mxu1 %vm2768_vm0, %v2767_v0  ;;  %v1099_v2 = vpop.permute.xlu0 %1098  ;;  %v2754_v45 = vld [vmem:[%s3210_s1 + $0x58] sm:$0xff]  }
  0xaf   : > { %2552 = vmatprep.subr.bf16.mxu1 %v2767_v0  ;;  %v1101_v4 = vsel %vm454_vm5, %v1097_v63, %v1099_v2  ;;  %v1112_v7 = vsel %vm236_vm1, %v1099_v2, 0 }
  0xb0   : > { %v1273_v10 = vpop.permute.xlu1 %1272 }
  0xb1   : > { %v1287_v15 = vsel %vm236_vm1, %v1273_v10, 0 }
  0xb2   : > { %v1271_v9 = vpop.permute.xlu0 %1270 }
  0xb3   : > { %v1276_v12 = vsel %vm1274_vm8, %v1271_v9, %v1273_v10  ;;  %v1275_v17 = vsel %vm1274_vm8, %v1269_v6, %v1271_v9 }
  0xb4   : > { %2361 = vmatmul.mubr.msk.bf16.vlgmr.msra.gmra.mrb[0].mxu0 %vm232_vm2, %v2746_v43  ;;  %v1381_v16 = vpop.permute.xlu1 %1380  ;;  %v1281_v19 = vsel %vm236_vm1, %v1275_v17, 0 }
  0xb5   : > { %774 = vmatpush1.bf16.msra.mxu0 %v765_v49  ;;  %805 = vmatprep.mubr.bf16.mxu0 %v2769_v1 }
  0xb6   : > { %2549 = vmatmul.mubr.msk.bf16.vlgmr.msra.gmra.mrb[4].mxu1 %vm232_vm2, %v2747_v50  ;;  %2379 = vmatprep.subr.msk.bf16.mxu0 %vm236_vm1, %v870_v52  ;;  %v1379_v14 = vpop.permute.xlu0 %1378  ;;  %v2755_v52 = vld [vmem:[%s3210_s1 + $0x68] sm:$0xff]  }
  0xb7   : > { %2553 = vmatpush3.bf16.msra.mxu1 %v881_v53  ;;  %2554 = vmatprep.mubr.msk.bf16.mxu1 %vm2768_vm0, %v2767_v0  ;;  %v1385_v24 = vsel %vm1384_vm9, %v1379_v14, %v1381_v16 }
  0xb8   : > { %2558 = vmatprep.subr.bf16.mxu1 %v2767_v0  ;;  %v1492_v21 = vpop.permute.xlu1 %1491  ;;  %v1391_v27 = vsel %vm236_vm1, %v1385_v24, 0 }
  0xba   : > { %v1383_v18 = vpop.permute.xlu0 %1382 }
  0xbb   : > { %v1386_v22 = vsel %vm1384_vm9, %v1381_v16, %v1383_v18  ;;  %v1397_v23 = vsel %vm236_vm1, %v1383_v18, 0 }
  0xbc   : > { %2376 = vmatmul.mubr.msk.bf16.vlgmr.msra.gmra.mrb[4].mxu0 %vm232_vm2, %v2747_v50  ;;  %v1496_v26 = vpop.permute.xlu1 %1495 }
  0xbd   : > { %884 = vmatpush1.bf16.msra.mxu0 %v875_v57  ;;  %915 = vmatprep.mubr.bf16.mxu0 %v2769_v1  ;;  %v1509_v31 = vsel %vm236_vm1, %v1496_v26, 0 }
  0xbe   : > { %2385 = vmatprep.subr.msk.bf16.mxu0 %vm236_vm1, %v983_v58  ;;  %v1494_v25 = vpop.permute.xlu0 %1493 }
  0xbf   : > { %v1498_v28 = vsel %vm341_vm4, %v1494_v25, %v1496_v26  ;;  %v1497_v32 = vsel %vm341_vm4, %v1492_v21, %v1494_v25 }
  0xc0   : > { %v1612_v33 = vpop.permute.xlu1 %1611  ;;  %v1503_v35 = vsel %vm236_vm1, %v1497_v32, 0 }
  0xc2   : > { %2555 = vmatmul.mubr.msk.bf16.vlgmr.msra.gmra.mrb[4].mxu1 %vm232_vm2, %v2748_v59  ;;  %v1610_v30 = vpop.permute.xlu0 %1609 }
  0xc3   : > { %2559 = vmatpush3.bf16.msra.mxu1 %v994_v61  ;;  %2560 = vmatprep.mubr.msk.bf16.mxu1 %vm2768_vm0, %v2767_v0  ;;  %v1615_v40 = vsel %vm229_vm3, %v1610_v30, %v1612_v33  ;;  %v2756_v61 = vld [vmem:[%s3210_s1 + $0x60] sm:$0xff]  }
  0xc4   : > { %2564 = vmatprep.subr.bf16.mxu1 %v2767_v0  ;;  %v1784_v38 = vpop.permute.xlu1 %1783  ;;  %v1621_v43 = vsel %vm236_vm1, %v1615_v40, 0 }
  0xc6   : > { %v1614_v34 = vpop.permute.xlu0 %1613 }
  0xc7   : > { %v1616_v36 = vsel %vm229_vm3, %v1612_v33, %v1614_v34  ;;  %v1627_v39 = vsel %vm236_vm1, %v1614_v34, 0 }
  0xc8   : > { %2380 = vmatmul.mubr.msk.bf16.vlgmr.msra.gmra.mrb[4].mxu0 %vm232_vm2, %v2748_v59  ;;  %v1788_v42 = vpop.permute.xlu1 %1787 }
  0xc9   : > { %997 = vmatpush1.bf16.msra.mxu0 %v988_v3  ;;  %1028 = vmatprep.mubr.bf16.mxu0 %v2769_v1  ;;  %v1801_v47 = vsel %vm236_vm1, %v1788_v42, 0 }
  0xca   : > { %2391 = vmatprep.subr.msk.bf16.mxu0 %vm236_vm1, %v1101_v4  ;;  %v1786_v41 = vpop.permute.xlu0 %1785 }
  0xcb   : > { %v1790_v44 = vsel %vm1384_vm9, %v1786_v41, %v1788_v42  ;;  %v1789_v49 = vsel %vm1384_vm9, %v1784_v38, %v1786_v41 }
  0xcc   : > { %v1895_v48 = vpop.permute.xlu1 %1894  ;;  %v1795_v51 = vsel %vm236_vm1, %v1789_v49, 0 }
  0xce   : > { %2561 = vmatmul.mubr.msk.bf16.vlgmr.msra.gmra.mrb[4].mxu1 %vm232_vm2, %v2749_v5  ;;  %v1893_v46 = vpop.permute.xlu0 %1892 }
  0xcf   : > { %2565 = vmatpush3.bf16.msra.mxu1 %v1112_v7  ;;  %2566 = vmatprep.mubr.msk.bf16.mxu1 %vm2768_vm0, %v2767_v0  ;;  %v1899_v56 = vsel %vm1898_vm10, %v1893_v46, %v1895_v48  ;;  %v2757_v7 = vld [vmem:[%s3210_s1 + $0x70] sm:$0xff]  }
  0xd0   : > { %2570 = vmatprep.subr.bf16.mxu1 %v2767_v0  ;;  %v2006_v53 = vpop.permute.xlu1 %2005  ;;  %v1905_v59 = vsel %vm236_vm1, %v1899_v56, 0 }
  0xd2   : > { %v1897_v50 = vpop.permute.xlu0 %1896 }
  0xd3   : > { %v1900_v54 = vsel %vm1898_vm10, %v1895_v48, %v1897_v50  ;;  %v1911_v55 = vsel %vm236_vm1, %v1897_v50, 0 }
  0xd4   : > { %2386 = vmatmul.mubr.msk.bf16.vlgmr.msra.gmra.mrb[4].mxu0 %vm232_vm2, %v2749_v5  ;;  %v2010_v58 = vpop.permute.xlu1 %2009 }
  0xd5   : > { %1115 = vmatpush1.bf16.msra.mxu0 %v1106_v11  ;;  %1146 = vmatprep.mubr.bf16.mxu0 %v2769_v1  ;;  %v2023_v63 = vsel %vm236_vm1, %v2010_v58, 0  ;;  %v2758_v11 = vld [vmem:[%s3210_s1 + $0x78] sm:$0xff]  }
  0xd6   : > { %2410 = vmatprep.subr.msk.bf16.mxu0 %vm236_vm1, %v1276_v12  ;;  %v2008_v57 = vpop.permute.xlu0 %2007 }
  0xd7   : > { %v2012_v60 = vsel %vm868_vm6, %v2008_v57, %v2010_v58  ;;  %v2011_v2 = vsel %vm868_vm6, %v2006_v53, %v2008_v57 }
  0xd8   : > { %v2126_v3 = vpop.permute.xlu1 %2125  ;;  %v2017_v5 = vsel %vm236_vm1, %v2011_v2, 0 }
  0xda   : > { %2567 = vmatmul.mubr.msk.bf16.vlgmr.msra.gmra.mrb[4].mxu1 %vm232_vm2, %v2750_v13  ;;  %v2124_v62 = vpop.permute.xlu0 %2123 }
  0xdb   : > { %2571 = vmatpush3.bf16.msra.mxu1 %v1287_v15  ;;  %2572 = vmatprep.mubr.msk.bf16.mxu1 %vm2768_vm0, %v2767_v0  ;;  %v2129_v9 = vsel %vm341_vm4, %v2124_v62, %v2126_v3 }
  0xdc   : > { %2576 = vmatprep.subr.bf16.mxu1 %v2767_v0  ;;  %v2135_v10 = vsel %vm236_vm1, %v2129_v9, 0 }
  0xde   : > { %v2128_v4 = vpop.permute.xlu0 %2127 }
  0xdf   : > { %v2130_v6 = vsel %vm341_vm4, %v2126_v3, %v2128_v4  ;;  %v2141_v8 = vsel %vm236_vm1, %v2128_v4, 0 }
  0xe0   : > { %2392 = vmatmul.mubr.msk.bf16.vlgmr.msra.gmra.mrb[4].mxu0 %vm232_vm2, %v2750_v13 }
  0xe1   : > { %1290 = vmatpush1.bf16.msra.mxu0 %v1281_v19  ;;  %1321 = vmatprep.mubr.bf16.mxu0 %v2769_v1 }
  0xe2   : > { %2573 = vmatmul.mubr.msk.bf16.vlgmr.msra.gmra.mrb[8].mxu1 %vm232_vm2, %v2751_v20  ;;  %2414 = vmatprep.subr.msk.bf16.mxu0 %vm236_vm1, %v1386_v22 }
  0xe3   : > { %2577 = vmatpush3.bf16.msra.mxu1 %v1397_v23  ;;  %2578 = vmatprep.mubr.msk.bf16.mxu1 %vm2768_vm0, %v2767_v0 }
  0xe4   : > { %2582 = vmatprep.subr.bf16.mxu1 %v2767_v0 }
  0xe8   : > { %2411 = vmatmul.mubr.msk.bf16.vlgmr.msra.gmra.mrb[8].mxu0 %vm232_vm2, %v2751_v20 }
  0xe9   : > { %1400 = vmatpush1.bf16.msra.mxu0 %v1391_v27  ;;  %1431 = vmatprep.mubr.bf16.mxu0 %v2769_v1  ;;  %v3120_v12 = vpop.permute.xlu1 %671 }
  0xea   : > { %2420 = vmatprep.subr.msk.bf16.mxu0 %vm236_vm1, %v1498_v28 }
  0xed   : > { %v3122_v13 = vpop.permute.xlu1 %687 }
  0xee   : > { %2579 = vmatmul.mubr.msk.bf16.vlgmr.msra.gmra.mrb[8].mxu1 %vm232_vm2, %v2752_v29 }
  0xef   : > { %2583 = vmatpush3.bf16.msra.mxu1 %v1509_v31  ;;  %2584 = vmatprep.mubr.msk.bf16.mxu1 %vm2768_vm0, %v2767_v0  ;;  %v3124_v14 = vpop.permute.xlu0 %676 }
  0xf0   : > { %2588 = vmatprep.subr.bf16.mxu1 %v2767_v0 }
  0xf1   : > { %v3128_v17 = vpop.permute.xlu1 %692 }
  0xf4   : > { %2415 = vmatmul.mubr.msk.bf16.vlgmr.msra.gmra.mrb[8].mxu0 %vm232_vm2, %v2752_v29 }
  0xf5   : > { %1512 = vmatpush1.bf16.msra.mxu0 %v1503_v35  ;;  %1543 = vmatprep.mubr.bf16.mxu0 %v2769_v1 }
  0xf6   : > { %2426 = vmatprep.subr.msk.bf16.mxu0 %vm236_vm1, %v1616_v36 }
  0xfa   : > { %2585 = vmatmul.mubr.msk.bf16.vlgmr.msra.gmra.mrb[8].mxu1 %vm232_vm2, %v2753_v37 }
  0xfb   : > { %2589 = vmatpush3.bf16.msra.mxu1 %v1627_v39  ;;  %2590 = vmatprep.mubr.msk.bf16.mxu1 %vm2768_vm0, %v2767_v0 }
  0xfc   : > { %2594 = vmatprep.subr.bf16.mxu1 %v2767_v0 }
 0x100   : > { %2421 = vmatmul.mubr.msk.bf16.vlgmr.msra.gmra.mrb[8].mxu0 %vm232_vm2, %v2753_v37 }
 0x101   : > { %1630 = vmatpush1.bf16.msra.mxu0 %v1621_v43  ;;  %1661 = vmatprep.mubr.bf16.mxu0 %v2769_v1 }
 0x102   : > { %2445 = vmatprep.subr.msk.bf16.mxu0 %vm236_vm1, %v1790_v44 }
 0x106   : > { %2591 = vmatmul.mubr.msk.bf16.vlgmr.msra.gmra.mrb[8].mxu1 %vm232_vm2, %v2754_v45 }
 0x107   : > { %2595 = vmatpush3.bf16.msra.mxu1 %v1801_v47  ;;  %2596 = vmatprep.mubr.msk.bf16.mxu1 %vm2768_vm0, %v2767_v0 }
 0x108   : > { %2600 = vmatprep.subr.bf16.mxu1 %v2767_v0 }
 0x10c   : > { %2427 = vmatmul.mubr.msk.bf16.vlgmr.msra.gmra.mrb[8].mxu0 %vm232_vm2, %v2754_v45 }
 0x10d   : > { %1804 = vmatpush1.bf16.msra.mxu0 %v1795_v51  ;;  %1835 = vmatprep.mubr.bf16.mxu0 %v2769_v1 }
 0x10e   : > { %2597 = vmatmul.mubr.msk.bf16.vlgmr.msra.gmra.mrb[12].mxu1 %vm232_vm2, %v2755_v52  ;;  %2449 = vmatprep.subr.msk.bf16.mxu0 %vm236_vm1, %v1900_v54 }
 0x10f   : > { %2601 = vmatpush3.bf16.msra.mxu1 %v1911_v55  ;;  %2602 = vmatprep.mubr.msk.bf16.mxu1 %vm2768_vm0, %v2767_v0 }
 0x110   : > { %2606 = vmatprep.subr.bf16.mxu1 %v2767_v0 }
 0x114   : > { %2446 = vmatmul.mubr.msk.bf16.vlgmr.msra.gmra.mrb[12].mxu0 %vm232_vm2, %v2755_v52 }
 0x115   : > { %1914 = vmatpush1.bf16.msra.mxu0 %v1905_v59  ;;  %1945 = vmatprep.mubr.bf16.mxu0 %v2769_v1 }
 0x116   : > { %2455 = vmatprep.subr.msk.bf16.mxu0 %vm236_vm1, %v2012_v60 }
 0x11a   : > { %2603 = vmatmul.mubr.msk.bf16.vlgmr.msra.gmra.mrb[12].mxu1 %vm232_vm2, %v2756_v61 }
 0x11b   : > { %2607 = vmatpush3.bf16.msra.mxu1 %v2023_v63  ;;  %2608 = vmatprep.mubr.msk.bf16.mxu1 %vm2768_vm0, %v2767_v0 }
 0x11c   : > { %2612 = vmatprep.subr.bf16.mxu1 %v2767_v0 }
 0x120   : > { %2450 = vmatmul.mubr.msk.bf16.vlgmr.msra.gmra.mrb[12].mxu0 %vm232_vm2, %v2756_v61 }
 0x121   : > { %2026 = vmatpush1.bf16.msra.mxu0 %v2017_v5  ;;  %2057 = vmatprep.mubr.bf16.mxu0 %v2769_v1 }
 0x122   : > { %2461 = vmatprep.subr.msk.bf16.mxu0 %vm236_vm1, %v2130_v6 }
 0x126   : > { %2609 = vmatmul.mubr.msk.bf16.vlgmr.msra.gmra.mrb[12].mxu1 %vm232_vm2, %v2757_v7 }
 0x127   : > { %2613 = vmatpush3.bf16.msra.mxu1 %v2141_v8  ;;  %2614 = vmatprep.mubr.msk.bf16.mxu1 %vm2768_vm0, %v2767_v0 }
 0x12c   : > { %2456 = vmatmul.mubr.msk.bf16.vlgmr.msra.gmra.mrb[12].mxu0 %vm232_vm2, %v2757_v7 }
 0x12d   : > { %2144 = vmatpush1.bf16.msra.mxu0 %v2135_v10  ;;  %2175 = vmatprep.mubr.bf16.mxu0 %v2769_v1 }
 0x132   : > { %2615 = vmatmul.mubr.msk.bf16.vlgmr.msra.gmra.mrb[12].mxu1 %vm232_vm2, %v2758_v11 }
 0x138   : > { %2462 = vmatmul.mubr.msk.bf16.vlgmr.msra.gmra.mrb[12].mxu0 %vm232_vm2, %v2758_v11 }
 0x180   : > { %v656_v0 = vpop.f32.mrb[0].mxu1 }
 0x181   : > { %v681_v15 = vmul.f32 %v3120_v12, %v656_v0  ;;  %v2544_v16 = vpop.f32.mrb[1].mxu1 }
 0x182   : > { %v659_v1 = vpop.f32.mrb[2].mxu1 }
 0x183   : > { %v697_v18 = vadd.f32 %v3122_v13, %v681_v15  ;;  %v684_v19 = vmul.f32 %v3124_v14, %v659_v1  ;;  %v2545_v20 = vpop.f32.mrb[3].mxu1 }
 0x185   : > { %v703_v21 = vmax.f32 %v697_v18, 0.0  ;;  %v700_v22 = vadd.f32 %v3128_v17, %v684_v19 }
 0x187   : > { %v613_v23 = vpop.f32.mrb[0].mxu0  ;;  %v2475_v24 = vpack.c.bf16 %v703_v21, %v703_v21  ;;  %v706_v25 = vmax.f32 %v700_v22, 0.0 }
 0x188   : > { %v679_v26 = vmul.f32 %v3120_v12, %v613_v23  ;;  %v615_v27 = vpop.f32.mrb[1].mxu0 }
 0x189   : > { %v680_v28 = vmul.f32 %v3120_v12, %v615_v27  ;;  %v617_v29 = vpop.f32.mrb[2].mxu0  ;;  %729 = vst.msk [vmem:[%s3136_s24 + $0x8] sm:$0xf] %vm728_vm11, %v2475_v24  ;;  %v2477_v30 = vpack.c.bf16 %v706_v25, %v706_v25 }
 0x18a   : > { %v695_v31 = vadd.f32 %v3122_v13, %v679_v26  ;;  %v682_v32 = vmul.f32 %v3124_v14, %v617_v29  ;;  %v619_v33 = vpop.f32.mrb[3].mxu0 }
 0x18b   : > { %v696_v34 = vadd.f32 %v3122_v13, %v680_v28  ;;  %v683_v35 = vmul.f32 %v3124_v14, %v619_v33  ;;  %731 = vst.msk [vmem:[%s3136_s24 + $0x14] sm:$0xf] %vm728_vm11, %v2477_v30 }
 0x18c   : > { %v701_v36 = vmax.f32 %v695_v31, 0.0  ;;  %v698_v37 = vadd.f32 %v3128_v17, %v682_v32 }
 0x18d   : > { %v702_v38 = vmax.f32 %v696_v34, 0.0  ;;  %v699_v39 = vadd.f32 %v3128_v17, %v683_v35 }
 0x18e   : > { %v704_v40 = vmax.f32 %v698_v37, 0.0 }
 0x18f   : > { %v2474_v41 = vpack.c.bf16 %v702_v38, %v701_v36  ;;  %v705_v42 = vmax.f32 %v699_v39, 0.0 }
 0x191   : > { %727 = vst [vmem:[%s3136_s24] sm:$0xff] %v2474_v41  ;;  %v2476_v43 = vpack.c.bf16 %v705_v42, %v704_v40 }
 0x193   : > { %730 = vst [vmem:[%s3136_s24 + $0xc] sm:$0xff] %v2476_v43 }
 0x1ad   : > { %v1191_v44 = vpop.f32.mrb[4].mxu1 }
 0x1ae   : > { %v1206_v45 = vmul.f32 %v1191_v44, %v3120_v12  ;;  %v2568_v46 = vpop.f32.mrb[5].mxu1 }
 0x1af   : > { %v1194_v47 = vpop.f32.mrb[6].mxu1 }
 0x1b0   : > { %v1212_v48 = vadd.f32 %v1206_v45, %v3122_v13  ;;  %v1209_v49 = vmul.f32 %v1194_v47, %v3124_v14  ;;  %v2569_v50 = vpop.f32.mrb[7].mxu1 }
 0x1b2   : > { %v1218_v51 = vmax.f32 %v1212_v48, 0.0  ;;  %v1215_v52 = vadd.f32 %v1209_v49, %v3128_v17 }
 0x1b3   : > { %v1148_v53 = vpop.f32.mrb[4].mxu0 }
 0x1b4   : > { %v2479_v54 = vpack.c.bf16 %v1218_v51, %v1218_v51  ;;  %v1221_v55 = vmax.f32 %v1215_v52, 0.0  ;;  %v1204_v56 = vmul.f32 %v1148_v53, %v3120_v12  ;;  %v1150_v57 = vpop.f32.mrb[5].mxu0 }
 0x1b5   : > { %v1205_v58 = vmul.f32 %v1150_v57, %v3120_v12  ;;  %v1152_v59 = vpop.f32.mrb[6].mxu0 }
 0x1b6   : > { %2399 = vst.msk [vmem:[%s3136_s24 + $0x20] sm:$0xf] %vm728_vm11, %v2479_v54  ;;  %v2481_v60 = vpack.c.bf16 %v1221_v55, %v1221_v55  ;;  %v1210_v61 = vadd.f32 %v1204_v56, %v3122_v13  ;;  %v1207_v62 = vmul.f32 %v1152_v59, %v3124_v14  ;;  %v1154_v63 = vpop.f32.mrb[7].mxu0 }
 0x1b7   : > { %v1211_v2 = vadd.f32 %v1205_v58, %v3122_v13  ;;  %v1208_v3 = vmul.f32 %v1154_v63, %v3124_v14 }
 0x1b8   : > { %2401 = vst.msk [vmem:[%s3136_s24 + $0x2c] sm:$0xf] %vm728_vm11, %v2481_v60  ;;  %v1216_v4 = vmax.f32 %v1210_v61, 0.0  ;;  %v1213_v5 = vadd.f32 %v1207_v62, %v3128_v17 }
 0x1b9   : > { %v1217_v6 = vmax.f32 %v1211_v2, 0.0  ;;  %v1214_v7 = vadd.f32 %v1208_v3, %v3128_v17 }
 0x1ba   : > { %v1219_v8 = vmax.f32 %v1213_v5, 0.0 }
 0x1bb   : > { %v2478_v9 = vpack.c.bf16 %v1217_v6, %v1216_v4  ;;  %v1220_v10 = vmax.f32 %v1214_v7, 0.0 }
 0x1bd   : > { %2398 = vst [vmem:[%s3136_s24 + $0x18] sm:$0xff] %v2478_v9  ;;  %v2480_v11 = vpack.c.bf16 %v1220_v10, %v1219_v8 }
 0x1bf   : > { %2400 = vst [vmem:[%s3136_s24 + $0x24] sm:$0xff] %v2480_v11 }
 0x1d9   : > { %v1706_v0 = vpop.f32.mrb[8].mxu1 }
 0x1da   : > { %v1721_v15 = vmul.f32 %v1706_v0, %v3120_v12  ;;  %v2592_v16 = vpop.f32.mrb[9].mxu1 }
 0x1db   : > { %v1709_v1 = vpop.f32.mrb[10].mxu1 }
 0x1dc   : > { %v1727_v18 = vadd.f32 %v1721_v15, %v3122_v13  ;;  %v1724_v19 = vmul.f32 %v1709_v1, %v3124_v14  ;;  %v2593_v20 = vpop.f32.mrb[11].mxu1 }
 0x1de   : > { %v1733_v21 = vmax.f32 %v1727_v18, 0.0  ;;  %v1730_v22 = vadd.f32 %v1724_v19, %v3128_v17 }
 0x1df   : > { %v1663_v23 = vpop.f32.mrb[8].mxu0 }
 0x1e0   : > { %v2483_v24 = vpack.c.bf16 %v1733_v21, %v1733_v21  ;;  %v1736_v25 = vmax.f32 %v1730_v22, 0.0  ;;  %v1719_v26 = vmul.f32 %v1663_v23, %v3120_v12  ;;  %v1665_v27 = vpop.f32.mrb[9].mxu0 }
 0x1e1   : > { %v1720_v28 = vmul.f32 %v1665_v27, %v3120_v12  ;;  %v1667_v29 = vpop.f32.mrb[10].mxu0 }
 0x1e2   : > { %2434 = vst.msk [vmem:[%s3136_s24 + $0x38] sm:$0xf] %vm728_vm11, %v2483_v24  ;;  %v2485_v30 = vpack.c.bf16 %v1736_v25, %v1736_v25  ;;  %v1725_v31 = vadd.f32 %v1719_v26, %v3122_v13  ;;  %v1722_v32 = vmul.f32 %v1667_v29, %v3124_v14  ;;  %v1669_v33 = vpop.f32.mrb[11].mxu0 }
 0x1e3   : > { %v1726_v34 = vadd.f32 %v1720_v28, %v3122_v13  ;;  %v1723_v35 = vmul.f32 %v1669_v33, %v3124_v14 }
 0x1e4   : > { %2436 = vst.msk [vmem:[%s3136_s24 + $0x44] sm:$0xf] %vm728_vm11, %v2485_v30  ;;  %v1731_v36 = vmax.f32 %v1725_v31, 0.0  ;;  %v1728_v37 = vadd.f32 %v1722_v32, %v3128_v17 }
 0x1e5   : > { %v1732_v38 = vmax.f32 %v1726_v34, 0.0  ;;  %v1729_v39 = vadd.f32 %v1723_v35, %v3128_v17 }
 0x1e6   : > { %v1734_v40 = vmax.f32 %v1728_v37, 0.0 }
 0x1e7   : > { %v2482_v41 = vpack.c.bf16 %v1732_v38, %v1731_v36  ;;  %v1735_v42 = vmax.f32 %v1729_v39, 0.0 }
 0x1e9   : > { %2433 = vst [vmem:[%s3136_s24 + $0x30] sm:$0xff] %v2482_v41  ;;  %v2484_v43 = vpack.c.bf16 %v1735_v42, %v1734_v40 }
 0x1eb   : > { %2435 = vst [vmem:[%s3136_s24 + $0x3c] sm:$0xff] %v2484_v43 }
 0x205   : > { %v2220_v44 = vpop.f32.mrb[12].mxu1 }
 0x206   : > { %v2235_v45 = vmul.f32 %v2220_v44, %v3120_v12  ;;  %v2616_v46 = vpop.f32.mrb[13].mxu1 }
 0x207   : > { %v2223_v47 = vpop.f32.mrb[14].mxu1 }
 0x208   : > { %v2241_v48 = vadd.f32 %v2235_v45, %v3122_v13  ;;  %v2238_v49 = vmul.f32 %v2223_v47, %v3124_v14  ;;  %v2617_v50 = vpop.f32.mrb[15].mxu1 }
 0x20a   : > { %v2247_v51 = vmax.f32 %v2241_v48, 0.0  ;;  %v2244_v52 = vadd.f32 %v2238_v49, %v3128_v17 }
 0x20b   : > { %v2177_v53 = vpop.f32.mrb[12].mxu0 }
 0x20c   : > { %v2487_v54 = vpack.c.bf16 %v2247_v51, %v2247_v51  ;;  %v2250_v55 = vmax.f32 %v2244_v52, 0.0  ;;  %v2233_v56 = vmul.f32 %v2177_v53, %v3120_v12  ;;  %v2179_v57 = vpop.f32.mrb[13].mxu0 }
 0x20d   : > { %v2234_v58 = vmul.f32 %v2179_v57, %v3120_v12  ;;  %v2181_v59 = vpop.f32.mrb[14].mxu0 }
 0x20e   : > { %2469 = vst.msk [vmem:[%s3136_s24 + $0x50] sm:$0xf] %vm728_vm11, %v2487_v54  ;;  %v2489_v60 = vpack.c.bf16 %v2250_v55, %v2250_v55  ;;  %v2239_v61 = vadd.f32 %v2233_v56, %v3122_v13  ;;  %v2236_v62 = vmul.f32 %v2181_v59, %v3124_v14  ;;  %v2183_v63 = vpop.f32.mrb[15].mxu0 }
 0x20f   : > { %v2240_v2 = vadd.f32 %v2234_v58, %v3122_v13  ;;  %v2237_v3 = vmul.f32 %v2183_v63, %v3124_v14 }
 0x210   : > { %2471 = vst.msk [vmem:[%s3136_s24 + $0x5c] sm:$0xf] %vm728_vm11, %v2489_v60  ;;  %v2245_v4 = vmax.f32 %v2239_v61, 0.0  ;;  %v2242_v12 = vadd.f32 %v2236_v62, %v3128_v17 }
 0x211   : > { %v2246_v5 = vmax.f32 %v2240_v2, 0.0  ;;  %v2243_v6 = vadd.f32 %v2237_v3, %v3128_v17 }
 0x212   : > { %v2248_v7 = vmax.f32 %v2242_v12, 0.0 }
 0x213   : > { %v2486_v8 = vpack.c.bf16 %v2246_v5, %v2245_v4  ;;  %v2249_v9 = vmax.f32 %v2243_v6, 0.0 }
 0x215   : > { %2468 = vst [vmem:[%s3136_s24 + $0x48] sm:$0xff] %v2486_v8  ;;  %v2488_v10 = vpack.c.bf16 %v2249_v9, %v2248_v7 }
 0x217   : > { %2470 = vst [vmem:[%s3136_s24 + $0x54] sm:$0xff] %v2488_v10 }
 0x218 PF: > { %s14_s15 = sadd.s32 1, %s2765_s15  }
 0x219   : > { %p11_p4 = scmp.ge.s32.totalorder %s14_s15, 4  }
 0x21b   :  { %13 = sbr.rel (!%p11_p4) target bundleno = 1 (0x1), region = 84 }

// kernel: deconv2d_batchnorm_relu.2
= control target key start
LH: loop header
LB: loop body
LE: loop exit
PB: predicated region body
PF: predicated region fallthrough
CT: control target
= control target key end

     0   :  { %s4840_s15 = smov 0   ;;  %s5631_s0 = inlined_call_operand.vmem [shape: bf16[2,8,384], index: 0, kind: input, shape index: {}]   ;;  %s5632_s1 = inlined_call_operand.vmem [shape: bf16[16,16,8], index: 1, kind: input, shape index: {}]   ;;  %s5633_s2 = inlined_call_operand.vmem [shape: f32[4,1,288], index: 2, kind: input, shape index: {}]   ;;  %s5634_s3 = inlined_call_operand.vmem [shape: f32[2,16,1], index: 3, kind: output, shape index: {0}]   ;;  %s5635_s4 = inlined_call_operand.vmem [shape: f32[2,16,1], index: 4, kind: output, shape index: {1}]  }
   0x1 LB: > { %s4078_s16 = sadd.s32 4294967295, %s4802_s15   ;;  %p4082_p0 = scmp.ge.s32.totalorder %s4802_s15, 1  ;;  %s4802_s15 = sphi %s4840_s15, %s15_s15  }
   0x2   : > { %p165_p1 = scmp.lt.s32.totalorder %s4802_s15, 3 }
   0x4   : > { %p166_p2 = pnand %p4082_p0, %p165_p1 }
   0x5   : > { %p196_p3 = scmp.lt.s32.totalorder (!%p166_p2), %s4078_s16, 1  ;;  %v4804_v0 = vmov (!%p166_p2), 0.0   ;;  %vm4805_vm0 = vmmov (!%p166_p2), 0   ;;  %v4806_v1 = vmov (!%p166_p2), 0   ;;  %s4807_s21 = smov (!%p166_p2), 110   ;;  %vm245_vm1 = vcmask (!%p166_p2), 1043456  }
   0x6   : > { %169 = sbr.rel (%p166_p2) target bundleno = 858 (0x35a), region = 32  ;;  %4356 = vmatprep.subr.bf16.mxu1 (!%p166_p2), %v4804_v0  ;;  %4358 = vmatprep.mubr.msk.bf16.mxu1 (!%p166_p2), %vm4805_vm0, %v4804_v0  ;;  %s4808_s22 = smov (!%p166_p2), 109   ;;  %v4763_v10 = vld [vmem:[%s5632_s1 + $0x8] sm:$0xff] (!%p166_p2)   ;;  %vm241_vm2 = vcmask (!%p166_p2), 64512   ;;  %vm238_vm3 = vcmask (!%p166_p2), 900096   ;;  %vm350_vm4 = vcmask (!%p166_p2), 891904  }
   0x7   : > { %287 = vmatprep.mubr.bf16.mxu0 (!%p166_p2), %v4806_v1  ;;  %s4809_s23 = smov (!%p166_p2), 127   ;;  %s4810_s24 = smov (!%p166_p2), 108   ;;  %v4764_v23 = vld [vmem:[%s5632_s1] sm:$0xff] (!%p166_p2)   ;;  %vm463_vm5 = vcmask (!%p166_p2), 1039360   ;;  %v4765_v30 = vld [vmem:[%s5632_s1 + $0x10] sm:$0xff] (!%p166_p2)   ;;  %v4766_v33 = vld [vmem:[%s5632_s1 + $0x18] sm:$0xff] (!%p166_p2)  }
   0x8   : > { %s4811_s25 = smov (!%p166_p2), 126   ;;  %s4812_s26 = smov (!%p166_p2), 92   ;;  %vm823_vm6 = vcmask (!%p166_p2), 883712   ;;  %v4767_v37 = vld [vmem:[%s5632_s1 + $0x28] sm:$0xff] (!%p166_p2)   ;;  %vm936_vm7 = vcmask (!%p166_p2), 1031168   ;;  %v4769_v46 = vld [vmem:[%s5632_s1 + $0x20] sm:$0xff] (!%p166_p2)  }
   0x9   : > { %s4813_s27 = smov (!%p166_p2), 91   ;;  %s4814_s28 = smov (!%p166_p2), 90   ;;  %v4770_v50 = vld [vmem:[%s5632_s1 + $0x30] sm:$0xff] (!%p166_p2)   ;;  %vm1195_vm8 = vcmask (!%p166_p2), 752640   ;;  %v4771_v55 = vld [vmem:[%s5632_s1 + $0x38] sm:$0xff] (!%p166_p2)   ;;  %vm1305_vm9 = vcmask (!%p166_p2), 744448  }
   0xa   : > { %v4772_v62 = vld [vmem:[%s5632_s1 + $0x48] sm:$0xff] (!%p166_p2)   ;;  %vm1751_vm10 = vcmask (!%p166_p2), 736256   ;;  %vm702_vm11 = vcmask (!%p166_p2), 261120   ;;  %vm2088_vm12 = vcmask (!%p166_p2), 7168  }
   0xd   : > { %s5637_s16 = smov (!%p196_p3, %s4078_s16), 1 }
   0xe   : > { %s4740_s17 = smul.u32 12, %s5637_s16  ;;  %s4290_s29 = sshll.u32 %s5637_s16, 4 }
   0xf   : > { %s205_s8 = scalar_lea.vmem %s5634_s3, %s4290_s29  ;;  %s210_s19 = scalar_lea.vmem %s5635_s4, %s4290_s29 }
  0x10   : > { %s4858_s20 = scalar_lea.vmem %s5631_s0, %s4740_s17 }
  0x11   : > { %v4861_v2 = vld [vmem:[%s4858_s20 + $0x8] ss:$0 sps:$4 sm:$0xff]   ;;  %v212_v3 = vld [vmem:[%s4858_s20] sm:$0xff] }
  0x12   : > { %v4864_v4 = vcombine.low %v212_v3, %v212_v3  ;;  %236 = vrot.lane.b32.xlu1 %v4861_v2, %s4807_s21  ;;  %v4870_v5 = vcombine.high %v212_v3, %v212_v3  ;;  %v4918_v6 = vld [vmem:[%s4858_s20 + $0x8] ss:$0 sps:$4 sm:$0xff]   ;;  %v586_v31 = vsel %vm245_vm1, %v4861_v2, 0 }
  0x14   : > { %232 = vrot.lane.b32.xlu0 %v4864_v4, %s4807_s21  ;;  %v5035_v32 = vsel %vm245_vm1, %v4864_v4, 0 }
  0x16   : > { %344 = vrot.lane.b32.xlu1 %v4864_v4, %s4808_s22 }
  0x18   : > { %234 = vrot.lane.b32.xlu0 %v4870_v5, %s4807_s21 }
  0x1a   : > { %348 = vrot.lane.b32.xlu1 %v4861_v2, %s4808_s22 }
  0x1c   : > { %346 = vrot.lane.b32.xlu0 %v4870_v5, %s4808_s22 }
  0x1e   : > { %459 = vrot.lane.b32.xlu1 %v4870_v5, %s4809_s23 }
  0x20   : > { %457 = vrot.lane.b32.xlu0 %v4864_v4, %s4809_s23 }
  0x22   : > { %817 = vrot.lane.b32.xlu1 %v4864_v4, %s4810_s24 }
  0x24   : > { %461 = vrot.lane.b32.xlu0 %v4861_v2, %s4809_s23 }
  0x26   : > { %821 = vrot.lane.b32.xlu1 %v4861_v2, %s4810_s24 }
  0x28   : > { %819 = vrot.lane.b32.xlu0 %v4870_v5, %s4810_s24 }
  0x2a   : > { %932 = vrot.lane.b32.xlu1 %v4870_v5, %s4811_s25 }
  0x2c   : > { %930 = vrot.lane.b32.xlu0 %v4864_v4, %s4811_s25 }
  0x2e   : > { %1189 = vrot.lane.b32.xlu1 %v4864_v4, %s4812_s26 }
  0x30   : > { %934 = vrot.lane.b32.xlu0 %v4861_v2, %s4811_s25 }
  0x32   : > { %1193 = vrot.lane.b32.xlu1 %v4861_v2, %s4812_s26 }
  0x34   : > { %1191 = vrot.lane.b32.xlu0 %v4870_v5, %s4812_s26 }
  0x36   : > { %1301 = vrot.lane.b32.xlu1 %v4870_v5, %s4813_s27 }
  0x38   : > { %1299 = vrot.lane.b32.xlu0 %v4864_v4, %s4813_s27 }
  0x3a   : > { %1745 = vrot.lane.b32.xlu1 %v4864_v4, %s4814_s28 }
  0x3c   : > { %1303 = vrot.lane.b32.xlu0 %v4861_v2, %s4813_s27 }
  0x3e   : > { %1749 = vrot.lane.b32.xlu1 %v4861_v2, %s4814_s28 }
  0x40   : > { %1747 = vrot.lane.b32.xlu0 %v4870_v5, %s4814_s28 }
  0x42   : > { %2114 = vrot.lane.b32.xlu1 %v4870_v5, %s4807_s21 }
  0x44   : > { %2112 = vrot.lane.b32.xlu0 %v4864_v4, %s4807_s21 }
  0x46   : > { %2221 = vrot.lane.b32.xlu1 %v4864_v4, %s4808_s22 }
  0x48   : > { %2116 = vrot.lane.b32.xlu0 %v4918_v6, %s4807_s21 }
  0x4a   : > { %2225 = vrot.lane.b32.xlu1 %v4918_v6, %s4808_s22 }
  0x4c   : > { %2223 = vrot.lane.b32.xlu0 %v4870_v5, %s4808_s22 }
  0x4e   : > { %2334 = vrot.lane.b32.xlu1 %v4870_v5, %s4809_s23 }
  0x50   : > { %2332 = vrot.lane.b32.xlu0 %v4864_v4, %s4809_s23 }
  0x52   : > { %2699 = vrot.lane.b32.xlu1 %v4864_v4, %s4810_s24 }
  0x54   : > { %2336 = vrot.lane.b32.xlu0 %v4918_v6, %s4809_s23 }
  0x56   : > { %2703 = vrot.lane.b32.xlu1 %v4918_v6, %s4810_s24 }
  0x58   : > { %2701 = vrot.lane.b32.xlu0 %v4870_v5, %s4810_s24 }
  0x5a   : > { %2812 = vrot.lane.b32.xlu1 %v4870_v5, %s4811_s25 }
  0x5c   : > { %2810 = vrot.lane.b32.xlu0 %v4864_v4, %s4811_s25 }
  0x5e   : > { %3076 = vrot.lane.b32.xlu1 %v4864_v4, %s4812_s26 }
  0x60   : > { %2814 = vrot.lane.b32.xlu0 %v4918_v6, %s4811_s25 }
  0x62   : > { %3080 = vrot.lane.b32.xlu1 %v4918_v6, %s4812_s26 }
  0x64   : > { %3078 = vrot.lane.b32.xlu0 %v4870_v5, %s4812_s26 }
  0x66   : > { %3187 = vrot.lane.b32.xlu1 %v4870_v5, %s4813_s27 }
  0x68   : > { %3185 = vrot.lane.b32.xlu0 %v4864_v4, %s4813_s27 }
  0x6a   : > { %3637 = vrot.lane.b32.xlu1 %v4864_v4, %s4814_s28 }
  0x6c   : > { %3189 = vrot.lane.b32.xlu0 %v4918_v6, %s4813_s27 }
  0x6e   : > { %3641 = vrot.lane.b32.xlu1 %v4918_v6, %s4814_s28 }
  0x70   : > { %3639 = vrot.lane.b32.xlu0 %v4870_v5, %s4814_s28 }
  0x84   : > { %v237_v7 = vpop.permute.xlu1 %236 }
  0x85   : > { %v4962_v9 = vsel %vm245_vm1, %v237_v7, 0 }
  0x86   : > { %v233_v8 = vpop.permute.xlu0 %232  ;;  %4357 = vmatpush3.bf16.msra.mxu1 %v4962_v9 }
  0x87   : > { %4362 = vmatprep.subr.bf16.mxu1 %v4804_v0 }
  0x88   : > { %v345_v11 = vpop.permute.xlu1 %344 }
  0x89   : > { %4359 = vmatmul.mubr.msk.bf16.vlgmr.msra.gmra.mrb[0].mxu1 %vm241_vm2, %v4763_v10 }
  0x8a   : > { %v235_v12 = vpop.permute.xlu0 %234  ;;  %4364 = vmatprep.mubr.msk.bf16.mxu1 %vm4805_vm0, %v4804_v0 }
  0x8b   : > { %v4971_v13 = vsel %vm238_vm3, %v235_v12, %v237_v7  ;;  %v239_v14 = vsel %vm238_vm3, %v233_v8, %v235_v12  ;;  %v4773_v7 = vld [vmem:[%s5632_s1 + $0x40] sm:$0xff]   ;;  %v4774_v8 = vld [vmem:[%s5632_s1 + $0x50] sm:$0xff]  }
  0x8c   : > { %4094 = vmatprep.subr.msk.bf16.mxu0 %vm245_vm1, %v4971_v13  ;;  %v4979_v15 = vsel %vm245_vm1, %v239_v14, 0  ;;  %v349_v16 = vpop.permute.xlu1 %348 }
  0x8d   : > { %256 = vmatpush1.bf16.msra.mxu0 %v4979_v15  ;;  %v4983_v17 = vsel %vm245_vm1, %v349_v16, 0 }
  0x8e   : > { %v347_v18 = vpop.permute.xlu0 %346  ;;  %4363 = vmatpush3.bf16.msra.mxu1 %v4983_v17 }
  0x8f   : > { %v351_v19 = vsel %vm350_vm4, %v345_v11, %v347_v18  ;;  %v4987_v20 = vsel %vm350_vm4, %v347_v18, %v349_v16  ;;  %4368 = vmatprep.subr.bf16.mxu1 %v4804_v0 }
  0x90   : > { %v4991_v21 = vsel %vm245_vm1, %v351_v19, 0  ;;  %4095 = vmatmul.mubr.msk.bf16.vlgmr.msra.gmra.mrb[0].mxu0 %vm241_vm2, %v4763_v10  ;;  %4098 = vmatprep.subr.msk.bf16.mxu0 %vm245_vm1, %v4987_v20  ;;  %v460_v24 = vpop.permute.xlu1 %459  ;;  %v4775_v10 = vld [vmem:[%s5632_s1 + $0x58] sm:$0xff]   ;;  %v4777_v19 = vld [vmem:[%s5632_s1 + $0x60] sm:$0xff]  }
  0x91   : > { %366 = vmatpush1.bf16.msra.mxu0 %v4991_v21  ;;  %397 = vmatprep.mubr.bf16.mxu0 %v4806_v1 }
  0x92   : > { %v458_v22 = vpop.permute.xlu0 %457 }
  0x93   : > { %v464_v26 = vsel %vm463_vm5, %v458_v22, %v460_v24  ;;  %v4778_v22 = vld [vmem:[%s5632_s1 + $0x70] sm:$0xff]  }
  0x94   : > { %v5017_v29 = vsel %vm245_vm1, %v464_v26, 0  ;;  %v818_v34 = vpop.permute.xlu1 %817 }
  0x95   : > { %4365 = vmatmul.mubr.msk.bf16.vlgmr.msra.gmra.mrb[0].mxu1 %vm241_vm2, %v4764_v23 }
  0x96   : > { %v462_v25 = vpop.permute.xlu0 %461  ;;  %4370 = vmatprep.mubr.msk.bf16.mxu1 %vm4805_vm0, %v4804_v0 }
  0x97   : > { %v5005_v27 = vsel %vm463_vm5, %v460_v24, %v462_v25  ;;  %v5008_v28 = vsel %vm245_vm1, %v462_v25, 0 }
  0x98   : > { %4104 = vmatprep.subr.msk.bf16.mxu0 %vm245_vm1, %v5005_v27  ;;  %4369 = vmatpush3.bf16.msra.mxu1 %v5008_v28  ;;  %v822_v36 = vpop.permute.xlu1 %821 }
  0x99   : > { %4374 = vmatprep.subr.bf16.mxu1 %v4804_v0  ;;  %v5058_v40 = vsel %vm245_vm1, %v822_v36, 0 }
  0x9a   : > { %v820_v35 = vpop.permute.xlu0 %819 }
  0x9b   : > { %v5054_v39 = vsel %vm823_vm6, %v820_v35, %v822_v36  ;;  %v824_v41 = vsel %vm823_vm6, %v818_v34, %v820_v35 }
  0x9c   : > { %4099 = vmatmul.mubr.msk.bf16.vlgmr.msra.gmra.mrb[0].mxu0 %vm241_vm2, %v4764_v23  ;;  %v933_v42 = vpop.permute.xlu1 %932  ;;  %v5071_v44 = vsel %vm245_vm1, %v824_v41, 0  ;;  %v4781_v41 = vld [vmem:[%s5632_s1] sm:$0xff]  }
  0x9d   : > { %479 = vmatpush1.bf16.msra.mxu0 %v5017_v29  ;;  %510 = vmatprep.mubr.bf16.mxu0 %v4806_v1 }
  0x9e   : > { %4110 = vmatprep.subr.msk.bf16.mxu0 %vm245_vm1, %v4870_v5  ;;  %v931_v38 = vpop.permute.xlu0 %930 }
  0x9f   : > { %v937_v48 = vsel %vm936_vm7, %v931_v38, %v933_v42 }
  0xa0   : > { %v943_v49 = vsel %vm245_vm1, %v937_v48, 0  ;;  %v1190_v51 = vpop.permute.xlu1 %1189 }
  0xa1   : > { %4371 = vmatmul.mubr.msk.bf16.vlgmr.msra.gmra.mrb[0].mxu1 %vm241_vm2, %v4765_v30 }
  0xa2   : > { %4375 = vmatpush3.bf16.msra.mxu1 %v586_v31  ;;  %4376 = vmatprep.mubr.msk.bf16.mxu1 %vm4805_vm0, %v4804_v0  ;;  %v935_v43 = vpop.permute.xlu0 %934  ;;  %v4780_v31 = vld [vmem:[%s5632_s1 + $0x8] sm:$0xff]  }
  0xa3   : > { %4380 = vmatprep.subr.bf16.mxu1 %v4804_v0  ;;  %v938_v45 = vsel %vm936_vm7, %v933_v42, %v935_v43  ;;  %v949_v47 = vsel %vm245_vm1, %v935_v43, 0 }
  0xa4   : > { %v1194_v53 = vpop.permute.xlu1 %1193 }
  0xa5   : > { %v1208_v57 = vsel %vm245_vm1, %v1194_v53, 0 }
  0xa6   : > { %v1192_v52 = vpop.permute.xlu0 %1191 }
  0xa7   : > { %v1197_v54 = vsel %vm1195_vm8, %v1192_v52, %v1194_v53  ;;  %v1196_v58 = vsel %vm1195_vm8, %v1190_v51, %v1192_v52 }
  0xa8   : > { %4105 = vmatmul.mubr.msk.bf16.vlgmr.msra.gmra.mrb[0].mxu0 %vm241_vm2, %v4765_v30  ;;  %v1302_v59 = vpop.permute.xlu1 %1301  ;;  %v1202_v61 = vsel %vm245_vm1, %v1196_v58, 0 }
  0xa9   : > { %589 = vmatpush1.bf16.msra.mxu0 %v5035_v32  ;;  %620 = vmatprep.mubr.bf16.mxu0 %v4806_v1 }
  0xaa   : > { %4118 = vmatprep.subr.msk.bf16.mxu0 %vm245_vm1, %v4987_v20  ;;  %v1300_v56 = vpop.permute.xlu0 %1299 }
  0xab   : > { %v1306_v3 = vsel %vm1305_vm9, %v1300_v56, %v1302_v59 }
  0xac   : > { %v1312_v4 = vsel %vm245_vm1, %v1306_v3, 0  ;;  %v1746_v11 = vpop.permute.xlu1 %1745 }
  0xad   : > { %4377 = vmatmul.mubr.msk.bf16.vlgmr.msra.gmra.mrb[0].mxu1 %vm241_vm2, %v4766_v33 }
  0xae   : > { %4381 = vmatpush3.bf16.msra.mxu1 %v4983_v17  ;;  %4382 = vmatprep.mubr.msk.bf16.mxu1 %vm4805_vm0, %v4804_v0  ;;  %v1304_v60 = vpop.permute.xlu0 %1303 }
  0xaf   : > { %4386 = vmatprep.subr.bf16.mxu1 %v4804_v0  ;;  %v1307_v63 = vsel %vm1305_vm9, %v1302_v59, %v1304_v60  ;;  %v1318_v2 = vsel %vm245_vm1, %v1304_v60, 0 }
  0xb0   : > { %v1750_v12 = vpop.permute.xlu1 %1749 }
  0xb4   : > { %4111 = vmatmul.mubr.msk.bf16.vlgmr.msra.gmra.mrb[0].mxu0 %vm241_vm2, %v4766_v33  ;;  %v2115_v24 = vpop.permute.xlu1 %2114 }
  0xb5   : > { %729 = vmatpush1.bf16.msra.mxu0 %v4991_v21  ;;  %760 = vmatprep.mubr.bf16.mxu0 %v4806_v1 }
  0xb6   : > { %4383 = vmatmul.mubr.msk.bf16.vlgmr.msra.gmra.mrb[4].mxu1 %vm241_vm2, %v4767_v37  ;;  %4122 = vmatprep.subr.msk.bf16.mxu0 %vm245_vm1, %v5054_v39 }
  0xb7   : > { %4387 = vmatpush3.bf16.msra.mxu1 %v5058_v40  ;;  %4388 = vmatprep.mubr.msk.bf16.mxu1 %vm4805_vm0, %v4804_v0 }
  0xb8   : > { %4392 = vmatprep.subr.bf16.mxu1 %v4804_v0 }
  0xbc   : > { %4119 = vmatmul.mubr.msk.bf16.vlgmr.msra.gmra.mrb[4].mxu0 %vm241_vm2, %v4767_v37 }
  0xbd   : > { %839 = vmatpush1.bf16.msra.mxu0 %v5071_v44  ;;  %870 = vmatprep.mubr.bf16.mxu0 %v4806_v1 }
  0xbe   : > { %4128 = vmatprep.subr.msk.bf16.mxu0 %vm245_vm1, %v938_v45  ;;  %v4782_v45 = vld [vmem:[%s5632_s1 + $0x10] sm:$0xff]  }
  0xc2   : > { %4389 = vmatmul.mubr.msk.bf16.vlgmr.msra.gmra.mrb[4].mxu1 %vm241_vm2, %v4769_v46 }
  0xc3   : > { %4393 = vmatpush3.bf16.msra.mxu1 %v949_v47  ;;  %4394 = vmatprep.mubr.msk.bf16.mxu1 %vm4805_vm0, %v4804_v0 }
  0xc4   : > { %4398 = vmatprep.subr.bf16.mxu1 %v4804_v0 }
  0xc8   : > { %4123 = vmatmul.mubr.msk.bf16.vlgmr.msra.gmra.mrb[4].mxu0 %vm241_vm2, %v4769_v46  ;;  %v2459_v46 = vsel %vm245_vm1, %v4918_v6, 0 }
  0xc9   : > { %952 = vmatpush1.bf16.msra.mxu0 %v943_v49  ;;  %983 = vmatprep.mubr.bf16.mxu0 %v4806_v1 }
  0xca   : > { %4134 = vmatprep.subr.msk.bf16.mxu0 %vm245_vm1, %v5005_v27 }
  0xce   : > { %4395 = vmatmul.mubr.msk.bf16.vlgmr.msra.gmra.mrb[4].mxu1 %vm241_vm2, %v4770_v50 }
  0xcf   : > { %4399 = vmatpush3.bf16.msra.mxu1 %v5008_v28  ;;  %4400 = vmatprep.mubr.msk.bf16.mxu1 %vm4805_vm0, %v4804_v0 }
  0xd0   : > { %4404 = vmatprep.subr.bf16.mxu1 %v4804_v0 }
  0xd4   : > { %4129 = vmatmul.mubr.msk.bf16.vlgmr.msra.gmra.mrb[4].mxu0 %vm241_vm2, %v4770_v50 }
  0xd5   : > { %1053 = vmatpush1.bf16.msra.mxu0 %v5017_v29  ;;  %1084 = vmatprep.mubr.bf16.mxu0 %v4806_v1 }
  0xd6   : > { %4143 = vmatprep.subr.msk.bf16.mxu0 %vm245_vm1, %v1197_v54 }
  0xda   : > { %4401 = vmatmul.mubr.msk.bf16.vlgmr.msra.gmra.mrb[4].mxu1 %vm241_vm2, %v4771_v55 }
  0xdb   : > { %4405 = vmatpush3.bf16.msra.mxu1 %v1208_v57  ;;  %4406 = vmatprep.mubr.msk.bf16.mxu1 %vm4805_vm0, %v4804_v0  ;;  %v4785_v57 = vld [vmem:[%s5632_s1 + $0x20] sm:$0xff]  }
  0xdc   : > { %4410 = vmatprep.subr.bf16.mxu1 %v4804_v0 }
  0xe0   : > { %4135 = vmatmul.mubr.msk.bf16.vlgmr.msra.gmra.mrb[4].mxu0 %vm241_vm2, %v4771_v55 }
  0xe1   : > { %1211 = vmatpush1.bf16.msra.mxu0 %v1202_v61  ;;  %1242 = vmatprep.mubr.bf16.mxu0 %v4806_v1  ;;  %v680_v61 = vlaneseq }
  0xe2   : > { %4407 = vmatmul.mubr.msk.bf16.vlgmr.msra.gmra.mrb[8].mxu1 %vm241_vm2, %v4772_v62  ;;  %4147 = vmatprep.subr.msk.bf16.mxu0 %vm245_vm1, %v1307_v63 }
  0xe3   : > { %4411 = vmatpush3.bf16.msra.mxu1 %v1318_v2  ;;  %4412 = vmatprep.mubr.msk.bf16.mxu1 %vm4805_vm0, %v4804_v0 }
  0xe4   : > { %4416 = vmatprep.subr.bf16.mxu1 %v4804_v0 }
  0xe8   : > { %4144 = vmatmul.mubr.msk.bf16.vlgmr.msra.gmra.mrb[8].mxu0 %vm241_vm2, %v4772_v62  ;;  %v4786_v62 = vld [vmem:[%s5632_s1 + $0x30] sm:$0xff]  }
  0xe9   : > { %1321 = vmatpush1.bf16.msra.mxu0 %v1312_v4  ;;  %1352 = vmatprep.mubr.bf16.mxu0 %v4806_v1 }
  0xea   : > { %4153 = vmatprep.subr.msk.bf16.mxu0 %vm245_vm1, %v4987_v20 }
  0xee   : > { %4413 = vmatmul.mubr.msk.bf16.vlgmr.msra.gmra.mrb[8].mxu1 %vm241_vm2, %v4773_v7 }
  0xef   : > { %4417 = vmatpush3.bf16.msra.mxu1 %v4983_v17  ;;  %4418 = vmatprep.mubr.msk.bf16.mxu1 %vm4805_vm0, %v4804_v0 }
  0xf0   : > { %4422 = vmatprep.subr.bf16.mxu1 %v4804_v0 }
  0xf4   : > { %4148 = vmatmul.mubr.msk.bf16.vlgmr.msra.gmra.mrb[8].mxu0 %vm241_vm2, %v4773_v7 }
  0xf5   : > { %1416 = vmatpush1.bf16.msra.mxu0 %v4991_v21  ;;  %1447 = vmatprep.mubr.bf16.mxu0 %v4806_v1 }
  0xf6   : > { %4159 = vmatprep.subr.msk.bf16.mxu0 %vm245_vm1, %v4971_v13  ;;  %v4776_v13 = vld [vmem:[%s5632_s1 + $0x68] sm:$0xff]  }
  0xfa   : > { %4419 = vmatmul.mubr.msk.bf16.vlgmr.msra.gmra.mrb[8].mxu1 %vm241_vm2, %v4774_v8 }
  0xfb   : > { %4423 = vmatpush3.bf16.msra.mxu1 %v4962_v9  ;;  %4424 = vmatprep.mubr.msk.bf16.mxu1 %vm4805_vm0, %v4804_v0  ;;  %v1748_v9 = vpop.permute.xlu0 %1747 }
  0xfc   : > { %4428 = vmatprep.subr.bf16.mxu1 %v4804_v0  ;;  %v1753_v14 = vsel %vm1751_vm10, %v1748_v9, %v1750_v12  ;;  %v1752_v16 = vsel %vm1751_vm10, %v1746_v11, %v1748_v9  ;;  %v678_v11 = vld [vmem:[%s5633_s2] sm:$0x7] }
  0xfd   : > { %v1758_v18 = vsel %vm245_vm1, %v1752_v16, 0 }
  0xff   : > { %v2113_v23 = vpop.permute.xlu0 %2112 }
 0x100   : > { %4154 = vmatmul.mubr.msk.bf16.vlgmr.msra.gmra.mrb[8].mxu0 %vm241_vm2, %v4774_v8  ;;  %v2118_v29 = vsel %vm238_vm3, %v2113_v23, %v2115_v24 }
 0x101   : > { %1517 = vmatpush1.bf16.msra.mxu0 %v4979_v15  ;;  %1548 = vmatprep.mubr.bf16.mxu0 %v4806_v1  ;;  %v1764_v15 = vsel %vm245_vm1, %v1750_v12, 0  ;;  %v5225_v30 = vsel %vm245_vm1, %v2118_v29, 0 }
 0x102   : > { %4168 = vmatprep.subr.msk.bf16.mxu0 %vm245_vm1, %v1307_v63 }
 0x103   : > { %v2117_v25 = vpop.permute.xlu0 %2116 }
 0x104   : > { %v5205_v26 = vsel %vm238_vm3, %v2115_v24, %v2117_v25  ;;  %v5216_v27 = vsel %vm245_vm1, %v2117_v25, 0 }
 0x106   : > { %4425 = vmatmul.mubr.msk.bf16.vlgmr.msra.gmra.mrb[8].mxu1 %vm241_vm2, %v4775_v10 }
 0x107   : > { %4429 = vmatpush3.bf16.msra.mxu1 %v1318_v2  ;;  %4430 = vmatprep.mubr.msk.bf16.mxu1 %vm4805_vm0, %v4804_v0  ;;  %v2224_v28 = vpop.permute.xlu0 %2223  ;;  %v681_v2 = vshrl.u32 %v680_v61, 7 }
 0x108   : > { %4434 = vmatprep.subr.bf16.mxu1 %v4804_v0 }
 0x109   : > { %v5349_v3 = vsub.s32 2, %v681_v2  ;;  %v5357_v9 = vsub.s32 1, %v681_v2 }
 0x10b   : > { %v2333_v33 = vpop.permute.xlu0 %2332 }
 0x10c   : > { %4160 = vmatmul.mubr.msk.bf16.vlgmr.msra.gmra.mrb[8].mxu0 %vm241_vm2, %v4775_v10 }
 0x10d   : > { %1657 = vmatpush1.bf16.msra.mxu0 %v1312_v4  ;;  %1688 = vmatprep.mubr.bf16.mxu0 %v4806_v1  ;;  %v5351_v4 = vsub.s32 0, %v681_v2 }
 0x10e   : > { %4431 = vmatmul.mubr.msk.bf16.vlgmr.msra.gmra.mrb[12].mxu1 %vm241_vm2, %v4776_v13  ;;  %4172 = vmatprep.subr.msk.bf16.mxu0 %vm245_vm1, %v1753_v14 }
 0x10f   : > { %4435 = vmatpush3.bf16.msra.mxu1 %v1764_v15  ;;  %4436 = vmatprep.mubr.msk.bf16.mxu1 %vm4805_vm0, %v4804_v0  ;;  %v2337_v38 = vpop.permute.xlu0 %2336  ;;  %v691_v15 = vrot.slane %v678_v11, %v5349_v3 }
 0x110   : > { %4440 = vmatprep.subr.bf16.mxu1 %v4804_v0  ;;  %v5262_v42 = vsel %vm245_vm1, %v2337_v38, 0 }
 0x113   : > { %v2702_v47 = vpop.permute.xlu0 %2701 }
 0x114   : > { %4169 = vmatmul.mubr.msk.bf16.vlgmr.msra.gmra.mrb[12].mxu0 %vm241_vm2, %v4776_v13 }
 0x115   : > { %1767 = vmatpush1.bf16.msra.mxu0 %v1758_v18  ;;  %1798 = vmatprep.mubr.bf16.mxu0 %v4806_v1  ;;  %v683_v18 = vrot.slane %v678_v11, %v5351_v4 }
 0x116   : > { %4178 = vmatprep.subr.msk.bf16.mxu0 %vm245_vm1, %v5054_v39 }
 0x117   : > { %v2811_v49 = vpop.permute.xlu0 %2810 }
 0x11a   : > { %4437 = vmatmul.mubr.msk.bf16.vlgmr.msra.gmra.mrb[12].mxu1 %vm241_vm2, %v4777_v19 }
 0x11b   : > { %4441 = vmatpush3.bf16.msra.mxu1 %v5058_v40  ;;  %4442 = vmatprep.mubr.msk.bf16.mxu1 %vm4805_vm0, %v4804_v0  ;;  %v2815_v54 = vpop.permute.xlu0 %2814 }
 0x11c   : > { %4446 = vmatprep.subr.bf16.mxu1 %v4804_v0  ;;  %v2828_v58 = vsel %vm245_vm1, %v2815_v54, 0 }
 0x11f   : > { %v3079_v7 = vpop.permute.xlu0 %3078 }
 0x120   : > { %4173 = vmatmul.mubr.msk.bf16.vlgmr.msra.gmra.mrb[12].mxu0 %vm241_vm2, %v4777_v19  ;;  %v687_v19 = vrot.slane %v678_v11, %v5357_v9 }
 0x121   : > { %1862 = vmatpush1.bf16.msra.mxu0 %v5071_v44  ;;  %1893 = vmatprep.mubr.bf16.mxu0 %v4806_v1 }
 0x122   : > { %4184 = vmatprep.subr.msk.bf16.mxu0 %vm245_vm1, %v4987_v20  ;;  %v2222_v20 = vpop.permute.xlu1 %2221 }
 0x123   : > { %v2227_v36 = vsel %vm350_vm4, %v2222_v20, %v2224_v28  ;;  %v3186_v24 = vpop.permute.xlu0 %3185 }
 0x124   : > { %v5248_v39 = vsel %vm245_vm1, %v2227_v36, 0 }
 0x126   : > { %4443 = vmatmul.mubr.msk.bf16.vlgmr.msra.gmra.mrb[12].mxu1 %vm241_vm2, %v4778_v22 }
 0x127   : > { %4447 = vmatpush3.bf16.msra.mxu1 %v4983_v17  ;;  %4448 = vmatprep.mubr.msk.bf16.mxu1 %vm4805_vm0, %v4804_v0  ;;  %v4779_v17 = vld [vmem:[%s5632_s1 + $0x78] sm:$0xff]  }
 0x128   : > { %4452 = vmatprep.subr.bf16.mxu1 %v4804_v0 }
 0x12c   : > { %4179 = vmatmul.mubr.msk.bf16.vlgmr.msra.gmra.mrb[12].mxu0 %vm241_vm2, %v4778_v22  ;;  %v4787_v22 = vld [vmem:[%s5632_s1 + $0x38] sm:$0xff]  }
 0x12d   : > { %1963 = vmatpush1.bf16.msra.mxu0 %v4991_v21  ;;  %1994 = vmatprep.mubr.bf16.mxu0 %v4806_v1  ;;  %v2226_v21 = vpop.permute.xlu1 %2225 }
 0x12e   : > { %4194 = vmatprep.subr.msk.bf16.mxu0 %vm245_vm1, %v5205_v26  ;;  %v5231_v34 = vsel %vm350_vm4, %v2224_v28, %v2226_v21  ;;  %v5235_v35 = vsel %vm245_vm1, %v2226_v21, 0 }
 0x131   : > { %v2335_v37 = vpop.permute.xlu1 %2334 }
 0x132   : > { %4449 = vmatmul.mubr.msk.bf16.vlgmr.msra.gmra.mrb[12].mxu1 %vm241_vm2, %v4779_v17  ;;  %v5251_v40 = vsel %vm463_vm5, %v2335_v37, %v2337_v38  ;;  %v2338_v43 = vsel %vm463_vm5, %v2333_v33, %v2335_v37 }
 0x133   : > { %4453 = vmatpush3.bf16.msra.mxu1 %v5216_v27  ;;  %4454 = vmatprep.mubr.msk.bf16.mxu1 %vm4805_vm0, %v4804_v0  ;;  %v5271_v44 = vsel %vm245_vm1, %v2338_v43, 0 }
 0x134   : > { %4458 = vmatprep.subr.bf16.mxu1 %v4804_v0 }
 0x135   : > { %v2700_v6 = vpop.permute.xlu1 %2699 }
 0x136   : > { %v2705_v52 = vsel %vm823_vm6, %v2700_v6, %v2702_v47  ;;  %v4788_v6 = vld [vmem:[%s5632_s1 + $0x48] sm:$0xff]  }
 0x137   : > { %v5321_v55 = vsel %vm245_vm1, %v2705_v52, 0 }
 0x138   : > { %4185 = vmatmul.mubr.msk.bf16.vlgmr.msra.gmra.mrb[12].mxu0 %vm241_vm2, %v4779_v17 }
 0x139   : > { %2133 = vmatpush1.bf16.msra.mxu0 %v5225_v30  ;;  %2164 = vmatprep.mubr.bf16.mxu0 %v4806_v1  ;;  %v2704_v48 = vpop.permute.xlu1 %2703 }
 0x13a   : > { %4455 = vmatmul.mubr.msk.bf16.vlgmr.msra.gmra.mrb[16].mxu1 %vm241_vm2, %v4780_v31  ;;  %4198 = vmatprep.subr.msk.bf16.mxu0 %vm245_vm1, %v5231_v34  ;;  %v5304_v50 = vsel %vm823_vm6, %v2702_v47, %v2704_v48  ;;  %v5308_v51 = vsel %vm245_vm1, %v2704_v48, 0 }
 0x13b   : > { %4459 = vmatpush3.bf16.msra.mxu1 %v5235_v35  ;;  %4460 = vmatprep.mubr.msk.bf16.mxu1 %vm4805_vm0, %v4804_v0 }
 0x13c   : > { %4464 = vmatprep.subr.bf16.mxu1 %v4804_v0 }
 0x13d   : > { %v2813_v53 = vpop.permute.xlu1 %2812 }
 0x13e   : > { %v2817_v56 = vsel %vm936_vm7, %v2813_v53, %v2815_v54  ;;  %v2816_v59 = vsel %vm936_vm7, %v2811_v49, %v2813_v53  ;;  %v4789_v53 = vld [vmem:[%s5632_s1 + $0x40] sm:$0xff]   ;;  %v4790_v54 = vld [vmem:[%s5632_s1 + $0x50] sm:$0xff]  }
 0x13f   : > { %v2822_v60 = vsel %vm245_vm1, %v2816_v59, 0 }
 0x140   : > { %4195 = vmatmul.mubr.msk.bf16.vlgmr.msra.gmra.mrb[16].mxu0 %vm241_vm2, %v4780_v31 }
 0x141   : > { %2242 = vmatpush1.bf16.msra.mxu0 %v5248_v39  ;;  %2273 = vmatprep.mubr.bf16.mxu0 %v4806_v1  ;;  %v3077_v63 = vpop.permute.xlu1 %3076 }
 0x142   : > { %4204 = vmatprep.subr.msk.bf16.mxu0 %vm245_vm1, %v5251_v40  ;;  %v3082_v38 = vsel %vm1195_vm8, %v3077_v63, %v3079_v7 }
 0x145   : > { %v3081_v8 = vpop.permute.xlu1 %3080 }
 0x146   : > { %4461 = vmatmul.mubr.msk.bf16.vlgmr.msra.gmra.mrb[16].mxu1 %vm241_vm2, %v4781_v41  ;;  %v3083_v14 = vsel %vm1195_vm8, %v3079_v7, %v3081_v8  ;;  %v3094_v28 = vsel %vm245_vm1, %v3081_v8, 0 }
 0x147   : > { %4465 = vmatpush3.bf16.msra.mxu1 %v5262_v42  ;;  %4466 = vmatprep.mubr.msk.bf16.mxu1 %vm4805_vm0, %v4804_v0 }
 0x148   : > { %4470 = vmatprep.subr.bf16.mxu1 %v4804_v0 }
 0x14c   : > { %4199 = vmatmul.mubr.msk.bf16.vlgmr.msra.gmra.mrb[16].mxu0 %vm241_vm2, %v4781_v41 }
 0x14d   : > { %2353 = vmatpush1.bf16.msra.mxu0 %v5271_v44  ;;  %2384 = vmatprep.mubr.bf16.mxu0 %v4806_v1 }
 0x14e   : > { %4210 = vmatprep.subr.msk.bf16.mxu0 %vm245_vm1, %v4870_v5  ;;  %v4783_v5 = vld [vmem:[%s5632_s1 + $0x18] sm:$0xff]  }
 0x152   : > { %4467 = vmatmul.mubr.msk.bf16.vlgmr.msra.gmra.mrb[16].mxu1 %vm241_vm2, %v4782_v45 }
 0x153   : > { %4471 = vmatpush3.bf16.msra.mxu1 %v2459_v46  ;;  %4472 = vmatprep.mubr.msk.bf16.mxu1 %vm4805_vm0, %v4804_v0  ;;  %v3088_v46 = vsel %vm245_vm1, %v3082_v38, 0 }
 0x154   : > { %4476 = vmatprep.subr.bf16.mxu1 %v4804_v0 }
 0x158   : > { %4205 = vmatmul.mubr.msk.bf16.vlgmr.msra.gmra.mrb[16].mxu0 %vm241_vm2, %v4782_v45  ;;  %v3190_v45 = vpop.permute.xlu0 %3189 }
 0x159   : > { %2462 = vmatpush1.bf16.msra.mxu0 %v5035_v32  ;;  %2493 = vmatprep.mubr.bf16.mxu0 %v4806_v1  ;;  %v4784_v32 = vld [vmem:[%s5632_s1 + $0x28] sm:$0xff]  }
 0x15a   : > { %4218 = vmatprep.subr.msk.bf16.mxu0 %vm245_vm1, %v5231_v34 }
 0x15e   : > { %4473 = vmatmul.mubr.msk.bf16.vlgmr.msra.gmra.mrb[16].mxu1 %vm241_vm2, %v4783_v5 }
 0x15f   : > { %4477 = vmatpush3.bf16.msra.mxu1 %v5235_v35  ;;  %4478 = vmatprep.mubr.msk.bf16.mxu1 %vm4805_vm0, %v4804_v0 }
 0x160   : > { %4482 = vmatprep.subr.bf16.mxu1 %v4804_v0 }
 0x164   : > { %4211 = vmatmul.mubr.msk.bf16.vlgmr.msra.gmra.mrb[16].mxu0 %vm241_vm2, %v4783_v5 }
 0x165   : > { %2611 = vmatpush1.bf16.msra.mxu0 %v5248_v39  ;;  %2642 = vmatprep.mubr.bf16.mxu0 %v4806_v1 }
 0x166   : > { %4479 = vmatmul.mubr.msk.bf16.vlgmr.msra.gmra.mrb[20].mxu1 %vm241_vm2, %v4784_v32  ;;  %4222 = vmatprep.subr.msk.bf16.mxu0 %vm245_vm1, %v5304_v50 }
 0x167   : > { %4483 = vmatpush3.bf16.msra.mxu1 %v5308_v51  ;;  %4484 = vmatprep.mubr.msk.bf16.mxu1 %vm4805_vm0, %v4804_v0 }
 0x168   : > { %4488 = vmatprep.subr.bf16.mxu1 %v4804_v0 }
 0x16c   : > { %4219 = vmatmul.mubr.msk.bf16.vlgmr.msra.gmra.mrb[20].mxu0 %vm241_vm2, %v4784_v32  ;;  %v3203_v32 = vsel %vm245_vm1, %v3190_v45, 0 }
 0x16d   : > { %2720 = vmatpush1.bf16.msra.mxu0 %v5321_v55  ;;  %2751 = vmatprep.mubr.bf16.mxu0 %v4806_v1 }
 0x16e   : > { %4228 = vmatprep.subr.msk.bf16.mxu0 %vm245_vm1, %v2817_v56 }
 0x172   : > { %4485 = vmatmul.mubr.msk.bf16.vlgmr.msra.gmra.mrb[20].mxu1 %vm241_vm2, %v4785_v57 }
 0x173   : > { %4489 = vmatpush3.bf16.msra.mxu1 %v2828_v58  ;;  %4490 = vmatprep.mubr.msk.bf16.mxu1 %vm4805_vm0, %v4804_v0 }
 0x174   : > { %4494 = vmatprep.subr.bf16.mxu1 %v4804_v0 }
 0x178   : > { %4223 = vmatmul.mubr.msk.bf16.vlgmr.msra.gmra.mrb[20].mxu0 %vm241_vm2, %v4785_v57  ;;  %v4137_v57 = vld [vmem:[%s5633_s2 + $0x3] sm:$0x7] }
 0x179   : > { %2831 = vmatpush1.bf16.msra.mxu0 %v2822_v60  ;;  %2862 = vmatprep.mubr.bf16.mxu0 %v4806_v1  ;;  %v1156_v59 = vrot.slane %v4137_v57, %v5349_v3  ;;  %v1148_v61 = vrot.slane %v4137_v57, %v5351_v4 }
 0x17a   : > { %4234 = vmatprep.subr.msk.bf16.mxu0 %vm245_vm1, %v5251_v40 }
 0x17e   : > { %4491 = vmatmul.mubr.msk.bf16.vlgmr.msra.gmra.mrb[20].mxu1 %vm241_vm2, %v4786_v62 }
 0x17f   : > { %4495 = vmatpush3.bf16.msra.mxu1 %v5262_v42  ;;  %4496 = vmatprep.mubr.msk.bf16.mxu1 %vm4805_vm0, %v4804_v0 }
 0x180   : > { %4500 = vmatprep.subr.bf16.mxu1 %v4804_v0  ;;  %v665_v10 = vpop.f32.mrb[0].mxu1 }
 0x181   : > { %v4378_v12 = vpop.f32.mrb[1].mxu1  ;;  %v697_v25 = vmul.f32 %v691_v15, %v665_v10 }
 0x182   : > { %v668_v13 = vpop.f32.mrb[2].mxu1 }
 0x183   : > { %v4379_v16 = vpop.f32.mrb[3].mxu1  ;;  %v700_v31 = vmul.f32 %v691_v15, %v668_v13  ;;  %v703_v41 = vsel %vm702_vm11, %v697_v25, 0.0  ;;  %v4792_v25 = vld [vmem:[%s5632_s1 + $0x68] sm:$0xff]  }
 0x184   : > { %4229 = vmatmul.mubr.msk.bf16.vlgmr.msra.gmra.mrb[20].mxu0 %vm241_vm2, %v4786_v62  ;;  %v4791_v62 = vld [vmem:[%s5632_s1 + $0x58] sm:$0xff]  }
 0x185   : > { %2931 = vmatpush1.bf16.msra.mxu0 %v5271_v44  ;;  %2962 = vmatprep.mubr.bf16.mxu0 %v4806_v1  ;;  %v3188_v44 = vpop.permute.xlu1 %3187  ;;  %v708_v5 = vsel %vm702_vm11, %v700_v31, 0.0 }
 0x186   : > { %4243 = vmatprep.subr.msk.bf16.mxu0 %vm245_vm1, %v3083_v14  ;;  %v3192_v48 = vsel %vm1305_vm9, %v3188_v44, %v3190_v45  ;;  %v3191_v49 = vsel %vm1305_vm9, %v3186_v24, %v3188_v44 }
 0x187   : > { %v622_v23 = vpop.f32.mrb[0].mxu0  ;;  %v3197_v52 = vsel %vm245_vm1, %v3191_v49, 0 }
 0x188   : > { %v695_v17 = vmul.f32 %v683_v18, %v622_v23  ;;  %v624_v20 = vpop.f32.mrb[1].mxu0 }
 0x189   : > { %v696_v29 = vmul.f32 %v687_v19, %v624_v20  ;;  %v626_v21 = vpop.f32.mrb[2].mxu0  ;;  %v3638_v63 = vpop.permute.xlu1 %3637 }
 0x18a   : > { %v698_v33 = vmul.f32 %v683_v18, %v626_v21  ;;  %v628_v36 = vpop.f32.mrb[3].mxu0  ;;  %4497 = vmatmul.mubr.msk.bf16.vlgmr.msra.gmra.mrb[20].mxu1 %vm241_vm2, %v4787_v22 }
 0x18b   : > { %v701_v37 = vadd.f32 %v696_v29, %v695_v17  ;;  %v699_v40 = vmul.f32 %v687_v19, %v628_v36  ;;  %4501 = vmatpush3.bf16.msra.mxu1 %v3094_v28  ;;  %4502 = vmatprep.mubr.msk.bf16.mxu1 %vm4805_vm0, %v4804_v0  ;;  %v3640_v19 = vpop.permute.xlu0 %3639 }
 0x18c   : > { %4506 = vmatprep.subr.bf16.mxu1 %v4804_v0  ;;  %v3643_v21 = vsel %vm1751_vm10, %v3638_v63, %v3640_v19 }
 0x18d   : > { %v707_v42 = vadd.f32 %v699_v40, %v698_v33  ;;  %v704_v43 = vadd.f32 %v703_v41, %v701_v37  ;;  %v3649_v31 = vsel %vm245_vm1, %v3643_v21, 0  ;;  %v4793_v33 = vld [vmem:[%s5632_s1 + $0x60] sm:$0xff]  }
 0x18f   : > { %705 = vadd.xlane.f32.xlu0 %v704_v43  ;;  %v709_v47 = vadd.f32 %v708_v5, %v707_v42 }
 0x190   : > { %4235 = vmatmul.mubr.msk.bf16.vlgmr.msra.gmra.mrb[20].mxu0 %vm241_vm2, %v4787_v22  ;;  %v3642_v22 = vpop.permute.xlu1 %3641 }
 0x191   : > { %3097 = vmatpush1.bf16.msra.mxu0 %v3088_v46  ;;  %710 = vadd.xlane.f32.xlu1 %v709_v47  ;;  %v3644_v28 = vsel %vm1751_vm10, %v3640_v19, %v3642_v22  ;;  %v3655_v29 = vsel %vm245_vm1, %v3642_v22, 0 }
 0x192   : > { %4503 = vmatmul.mubr.msk.bf16.vlgmr.msra.gmra.mrb[24].mxu1 %vm241_vm2, %v4788_v6  ;;  %3128 = vmatprep.mubr.bf16.mxu0 %v4806_v1 }
 0x193   : > { %4247 = vmatprep.subr.msk.bf16.mxu0 %vm245_vm1, %v3192_v48  ;;  %4507 = vmatpush3.bf16.msra.mxu1 %v3203_v32 }
 0x194   : > { %4508 = vmatprep.mubr.msk.bf16.mxu1 %vm4805_vm0, %v4804_v0  ;;  %4512 = vmatprep.subr.bf16.mxu1 %v4804_v0 }
 0x198   : > { %4244 = vmatmul.mubr.msk.bf16.vlgmr.msra.gmra.mrb[24].mxu0 %vm241_vm2, %v4788_v6 }
 0x199   : > { %3206 = vmatpush1.bf16.msra.mxu0 %v3197_v52  ;;  %3237 = vmatprep.mubr.bf16.mxu0 %v4806_v1 }
 0x19a   : > { %4253 = vmatprep.subr.msk.bf16.mxu0 %vm245_vm1, %v5231_v34 }
 0x19e   : > { %4509 = vmatmul.mubr.msk.bf16.vlgmr.msra.gmra.mrb[24].mxu1 %vm241_vm2, %v4789_v53 }
 0x19f   : > { %4513 = vmatpush3.bf16.msra.mxu1 %v5235_v35  ;;  %4514 = vmatprep.mubr.msk.bf16.mxu1 %vm4805_vm0, %v4804_v0 }
 0x1a0   : > { %4518 = vmatprep.subr.bf16.mxu1 %v4804_v0 }
 0x1a4   : > { %4248 = vmatmul.mubr.msk.bf16.vlgmr.msra.gmra.mrb[24].mxu0 %vm241_vm2, %v4789_v53 }
 0x1a5   : > { %3300 = vmatpush1.bf16.msra.mxu0 %v5248_v39  ;;  %3331 = vmatprep.mubr.bf16.mxu0 %v4806_v1 }
 0x1a6   : > { %4259 = vmatprep.subr.msk.bf16.mxu0 %vm245_vm1, %v5205_v26 }
 0x1aa   : > { %4515 = vmatmul.mubr.msk.bf16.vlgmr.msra.gmra.mrb[24].mxu1 %vm241_vm2, %v4790_v54 }
 0x1ab   : > { %4519 = vmatpush3.bf16.msra.mxu1 %v5216_v27  ;;  %4520 = vmatprep.mubr.msk.bf16.mxu1 %vm4805_vm0, %v4804_v0  ;;  %v1152_v27 = vrot.slane %v4137_v57, %v5357_v9 }
 0x1ac   : > { %4524 = vmatprep.subr.bf16.mxu1 %v4804_v0 }
 0x1ad   : > { %v1129_v56 = vpop.f32.mrb[4].mxu1 }
 0x1ae   : > { %v4402_v58 = vpop.f32.mrb[5].mxu1  ;;  %v1162_v7 = vmul.f32 %v1156_v59, %v1129_v56  ;;  %v4187_v56 = vld [vmem:[%s5633_s2 + $0x9] sm:$0x7] }
 0x1af   : > { %v1132_v26 = vpop.f32.mrb[6].mxu1 }
 0x1b0   : > { %4254 = vmatmul.mubr.msk.bf16.vlgmr.msra.gmra.mrb[24].mxu0 %vm241_vm2, %v4790_v54  ;;  %v4403_v60 = vpop.f32.mrb[7].mxu1  ;;  %v1165_v13 = vmul.f32 %v1156_v59, %v1132_v26  ;;  %v1167_v18 = vsel %vm702_vm11, %v1162_v7, 0.0  ;;  %v2066_v26 = vrot.slane %v4187_v56, %v5349_v3 }
 0x1b1   : > { %3400 = vmatpush1.bf16.msra.mxu0 %v5225_v30  ;;  %3431 = vmatprep.mubr.bf16.mxu0 %v4806_v1  ;;  %v2058_v60 = vrot.slane %v4187_v56, %v5351_v4 }
 0x1b2   : > { %4268 = vmatprep.subr.msk.bf16.mxu0 %vm245_vm1, %v3192_v48  ;;  %v1172_v17 = vsel %vm702_vm11, %v1165_v13, 0.0 }
 0x1b3   : > { %v1086_v2 = vpop.f32.mrb[4].mxu0 }
 0x1b4   : > { %v1160_v8 = vmul.f32 %v1148_v61, %v1086_v2  ;;  %v1088_v10 = vpop.f32.mrb[5].mxu0 }
 0x1b5   : > { %v1161_v11 = vmul.f32 %v1152_v27, %v1088_v10  ;;  %v1090_v12 = vpop.f32.mrb[6].mxu0 }
 0x1b6   : > { %v1163_v14 = vmul.f32 %v1148_v61, %v1090_v12  ;;  %v1092_v30 = vpop.f32.mrb[7].mxu0  ;;  %4521 = vmatmul.mubr.msk.bf16.vlgmr.msra.gmra.mrb[24].mxu1 %vm241_vm2, %v4791_v62  ;;  %v2062_v61 = vrot.slane %v4187_v56, %v5357_v9  ;;  %v4262_v56 = vld [vmem:[%s5633_s2 + $0x6] sm:$0x7] }
 0x1b7   : > { %v1166_v15 = vadd.f32 %v1161_v11, %v1160_v8  ;;  %v1164_v16 = vmul.f32 %v1152_v27, %v1092_v30  ;;  %4525 = vmatpush3.bf16.msra.mxu1 %v3203_v32  ;;  %4526 = vmatprep.mubr.msk.bf16.mxu1 %vm4805_vm0, %v4804_v0 }
 0x1b8   : > { %4530 = vmatprep.subr.bf16.mxu1 %v4804_v0 }
 0x1b9   : > { %v1171_v23 = vadd.f32 %v1164_v16, %v1163_v14  ;;  %v1168_v24 = vadd.f32 %v1167_v18, %v1166_v15 }
 0x1bb   : > { %1169 = vadd.xlane.f32.xlu0 %v1168_v24  ;;  %v1173_v20 = vadd.f32 %v1172_v17, %v1171_v23 }
 0x1bc   : > { %4260 = vmatmul.mubr.msk.bf16.vlgmr.msra.gmra.mrb[24].mxu0 %vm241_vm2, %v4791_v62 }
 0x1bd   : > { %3549 = vmatpush1.bf16.msra.mxu0 %v3197_v52  ;;  %3580 = vmatprep.mubr.bf16.mxu0 %v4806_v1 }
 0x1be   : > { %4527 = vmatmul.mubr.msk.bf16.vlgmr.msra.gmra.mrb[28].mxu1 %vm241_vm2, %v4792_v25  ;;  %4272 = vmatprep.subr.msk.bf16.mxu0 %vm245_vm1, %v3644_v28 }
 0x1bf   : > { %1174 = vadd.xlane.f32.xlu0 %v1173_v20  ;;  %4531 = vmatpush3.bf16.msra.mxu1 %v3655_v29 }
 0x1c0   : > { %4532 = vmatprep.mubr.msk.bf16.mxu1 %vm4805_vm0, %v4804_v0  ;;  %4536 = vmatprep.subr.bf16.mxu1 %v4804_v0 }
 0x1c4   : > { %4269 = vmatmul.mubr.msk.bf16.vlgmr.msra.gmra.mrb[28].mxu0 %vm241_vm2, %v4792_v25 }
 0x1c5   : > { %3658 = vmatpush1.bf16.msra.mxu0 %v3649_v31  ;;  %3689 = vmatprep.mubr.bf16.mxu0 %v4806_v1 }
 0x1c6   : > { %4278 = vmatprep.subr.msk.bf16.mxu0 %vm245_vm1, %v5304_v50  ;;  %v4794_v50 = vld [vmem:[%s5632_s1 + $0x70] sm:$0xff]  }
 0x1ca   : > { %4533 = vmatmul.mubr.msk.bf16.vlgmr.msra.gmra.mrb[28].mxu1 %vm241_vm2, %v4793_v33 }
 0x1cb   : > { %4537 = vmatpush3.bf16.msra.mxu1 %v5308_v51  ;;  %4538 = vmatprep.mubr.msk.bf16.mxu1 %vm4805_vm0, %v4804_v0 }
 0x1cc   : > { %4542 = vmatprep.subr.bf16.mxu1 %v4804_v0 }
 0x1d0   : > { %4273 = vmatmul.mubr.msk.bf16.vlgmr.msra.gmra.mrb[28].mxu0 %vm241_vm2, %v4793_v33 }
 0x1d1   : > { %3752 = vmatpush1.bf16.msra.mxu0 %v5321_v55  ;;  %3783 = vmatprep.mubr.bf16.mxu0 %v4806_v1  ;;  %v4162_v55 = vld [vmem:[%s5633_s2 + $0x6] sm:$0x7] }
 0x1d2   : > { %4284 = vmatprep.subr.msk.bf16.mxu0 %vm245_vm1, %v5231_v34  ;;  %v1620_v34 = vrot.slane %v4162_v55, %v5349_v3  ;;  %v1612_v40 = vrot.slane %v4162_v55, %v5351_v4 }
 0x1d6   : > { %4539 = vmatmul.mubr.msk.bf16.vlgmr.msra.gmra.mrb[28].mxu1 %vm241_vm2, %v4794_v50 }
 0x1d7   : > { %4543 = vmatpush3.bf16.msra.mxu1 %v5235_v35  ;;  %4544 = vmatprep.mubr.msk.bf16.mxu1 %vm4805_vm0, %v4804_v0  ;;  %v1616_v35 = vrot.slane %v4162_v55, %v5357_v9  ;;  %v4795_v0 = vld [vmem:[%s5632_s1 + $0x78] sm:$0xff]  }
 0x1d9   : > { %v1593_v51 = vpop.f32.mrb[8].mxu1 }
 0x1da   : > { %v4426_v36 = vpop.f32.mrb[9].mxu1  ;;  %v1626_v42 = vmul.f32 %v1620_v34, %v1593_v51 }
 0x1db   : > { %v1596_v37 = vpop.f32.mrb[10].mxu1 }
 0x1dc   : > { %4279 = vmatmul.mubr.msk.bf16.vlgmr.msra.gmra.mrb[28].mxu0 %vm241_vm2, %v4794_v50  ;;  %v4427_v38 = vpop.f32.mrb[11].mxu1  ;;  %v1629_v5 = vmul.f32 %v1620_v34, %v1596_v37  ;;  %v1631_v32 = vsel %vm702_vm11, %v1626_v42, 0.0 }
 0x1dd   : > { %3852 = vmatpush1.bf16.msra.mxu0 %v5248_v39  ;;  %3883 = vmatprep.mubr.bf16.mxu0 %v4806_v1 }
 0x1de   : > { %v1636_v52 = vsel %vm702_vm11, %v1629_v5, 0.0 }
 0x1df   : > { %v1550_v41 = vpop.f32.mrb[8].mxu0 }
 0x1e0   : > { %v1624_v43 = vmul.f32 %v1612_v40, %v1550_v41  ;;  %v1552_v44 = vpop.f32.mrb[9].mxu0 }
 0x1e1   : > { %v1625_v45 = vmul.f32 %v1616_v35, %v1552_v44  ;;  %v1554_v46 = vpop.f32.mrb[10].mxu0 }
 0x1e2   : > { %v1627_v6 = vmul.f32 %v1612_v40, %v1554_v46  ;;  %v1556_v47 = vpop.f32.mrb[11].mxu0  ;;  %4545 = vmatmul.mubr.msk.bf16.vlgmr.msra.gmra.mrb[28].mxu1 %vm241_vm2, %v4795_v0 }
 0x1e3   : > { %v1630_v39 = vadd.f32 %v1625_v45, %v1624_v43  ;;  %v1628_v48 = vmul.f32 %v1616_v35, %v1556_v47 }
 0x1e5   : > { %v1635_v1 = vadd.f32 %v1628_v48, %v1627_v6  ;;  %v1632_v49 = vadd.f32 %v1631_v32, %v1630_v39 }
 0x1e7   : > { %1633 = vadd.xlane.f32.xlu1 %v1632_v49  ;;  %v1637_v53 = vadd.f32 %v1636_v52, %v1635_v1  ;;  %v2557_v1 = vld [vmem:[%s5633_s2] sm:$0x7]  ;;  %v4237_v52 = vld [vmem:[%s5633_s2 + $0x3] sm:$0x7] }
 0x1e8   : > { %4285 = vmatmul.mubr.msk.bf16.vlgmr.msra.gmra.mrb[28].mxu0 %vm241_vm2, %v4795_v0 }
 0x1e9   : > { %1638 = vadd.xlane.f32.xlu0 %v1637_v53 }
 0x205   : > { %v2039_v54 = vpop.f32.mrb[12].mxu1 }
 0x206   : > { %v4450_v57 = vpop.f32.mrb[13].mxu1  ;;  %v2072_v62 = vmul.f32 %v2066_v26, %v2039_v54 }
 0x207   : > { %v2042_v58 = vpop.f32.mrb[14].mxu1 }
 0x208   : > { %v4451_v59 = vpop.f32.mrb[15].mxu1  ;;  %v2075_v10 = vmul.f32 %v2066_v26, %v2042_v58  ;;  %v2077_v30 = vsel %vm702_vm11, %v2072_v62, 0.0  ;;  %v2562_v58 = vrot.slane %v2557_v1, %v5351_v4  ;;  %v2566_v26 = vrot.slane %v2557_v1, %v5357_v9 }
 0x209   : > { %v2570_v59 = vrot.slane %v2557_v1, %v5349_v3  ;;  %v3035_v62 = vrot.slane %v4237_v52, %v5357_v9 }
 0x20a   : > { %v2082_v18 = vsel %vm702_vm11, %v2075_v10, 0.0 }
 0x20b   : > { %v1996_v27 = vpop.f32.mrb[12].mxu0 }
 0x20c   : > { %v2070_v63 = vmul.f32 %v2058_v60, %v1996_v27  ;;  %v1998_v2 = vpop.f32.mrb[13].mxu0  ;;  %v3031_v27 = vrot.slane %v4237_v52, %v5351_v4 }
 0x20d   : > { %v2071_v7 = vmul.f32 %v2062_v61, %v1998_v2  ;;  %v2000_v8 = vpop.f32.mrb[14].mxu0  ;;  %v5552_v2 = vrot.slane %v4262_v56, %v5351_v4 }
 0x20e   : > { %v2073_v11 = vmul.f32 %v2058_v60, %v2000_v8  ;;  %v2002_v12 = vpop.f32.mrb[15].mxu0  ;;  %v5558_v8 = vrot.slane %v4262_v56, %v5349_v3 }
 0x20f   : > { %v2076_v13 = vadd.f32 %v2071_v7, %v2070_v63  ;;  %v2074_v14 = vmul.f32 %v2062_v61, %v2002_v12  ;;  %v3039_v63 = vrot.slane %v4237_v52, %v5349_v3  ;;  %v5555_v7 = vrot.slane %v4262_v56, %v5357_v9 }
 0x211   : > { %v2081_v15 = vadd.f32 %v2074_v14, %v2073_v11  ;;  %v2078_v16 = vadd.f32 %v2077_v30, %v2076_v13 }
 0x213   : > { %2079 = vadd.xlane.f32.xlu1 %v2078_v16  ;;  %v2083_v19 = vadd.f32 %v2082_v18, %v2081_v15 }
 0x215   : > { %2084 = vadd.xlane.f32.xlu0 %v2083_v19 }
 0x21c   : > { %v706_v41 = vpop.xlane.xlu0 %705 }
 0x21e   : > { %v711_v46 = vpop.xlane.xlu1 %710 }
 0x231   : > { %v5499_v22 = vpop.f32.mrb[16].mxu1 }
 0x232   : > { %v4474_v23 = vpop.f32.mrb[17].mxu1 }
 0x233   : > { %v5501_v24 = vpop.f32.mrb[18].mxu1 }
 0x234   : > { %v4475_v25 = vpop.f32.mrb[19].mxu1 }
 0x237   : > { %v2495_v17 = vpop.f32.mrb[16].mxu0 }
 0x238   : > { %v2497_v20 = vpop.f32.mrb[17].mxu0 }
 0x239   : > { %v5503_v28 = vpop.f32.mrb[18].mxu0 }
 0x23a   : > { %v5505_v29 = vpop.f32.mrb[19].mxu0 }
 0x248   : > { %v1170_v45 = vpop.xlane.xlu0 %1169 }
 0x249   : > { %v1176_v47 = vadd.f32 %v1170_v45, %v706_v41 }
 0x24c   : > { %v1175_v5 = vpop.xlane.xlu0 %1174 }
 0x24d   : > { %v1177_v48 = vadd.f32 %v1175_v5, %v711_v46 }
 0x25d   : > { %v5507_v21 = vpop.f32.mrb[20].mxu1 }
 0x25e   : > { %v4498_v31 = vpop.f32.mrb[21].mxu1 }
 0x25f   : > { %v5509_v33 = vpop.f32.mrb[22].mxu1 }
 0x260   : > { %v4499_v50 = vpop.f32.mrb[23].mxu1 }
 0x263   : > { %v2964_v51 = vpop.f32.mrb[20].mxu0 }
 0x264   : > { %v2966_v55 = vpop.f32.mrb[21].mxu0 }
 0x265   : > { %v5511_v36 = vpop.f32.mrb[22].mxu0 }
 0x266   : > { %v5513_v37 = vpop.f32.mrb[23].mxu0 }
 0x274   : > { %v1634_v6 = vpop.xlane.xlu1 %1633 }
 0x275   : > { %v1640_v32 = vadd.f32 %v1634_v6, %v1176_v47 }
 0x276   : > { %v1639_v39 = vpop.xlane.xlu0 %1638 }
 0x277   : > { %v1641_v53 = vadd.f32 %v1639_v39, %v1177_v48 }
 0x289   : > { %v5515_v34 = vpop.f32.mrb[24].mxu1 }
 0x28a   : > { %v4522_v38 = vpop.f32.mrb[25].mxu1 }
 0x28b   : > { %v5517_v40 = vpop.f32.mrb[26].mxu1 }
 0x28c   : > { %v4523_v35 = vpop.f32.mrb[27].mxu1 }
 0x28f   : > { %v5519_v0 = vpop.f32.mrb[24].mxu0 }
 0x290   : > { %v5521_v42 = vpop.f32.mrb[25].mxu0 }
 0x291   : > { %v5523_v43 = vpop.f32.mrb[26].mxu0 }
 0x292   : > { %v5525_v44 = vpop.f32.mrb[27].mxu0 }
 0x2a0   : > { %v2080_v49 = vpop.xlane.xlu1 %2079 }
 0x2a1   : > { %v2086_v54 = vadd.f32 %v2080_v49, %v1640_v32 }
 0x2a2   : > { %v2085_v57 = vpop.xlane.xlu0 %2084 }
 0x2a3   : > { %2089 = vst.msk [vmem:[%s205_s8] sm:$0xff] %vm2088_vm12, %v2086_v54  ;;  %v5546_v60 = vmul.f32 0.0009765625, %v2086_v54  ;;  %v2087_v61 = vadd.f32 %v2085_v57, %v1641_v53 }
 0x2a5   : > { %2090 = vst.msk [vmem:[%s205_s8 + $0x8] sm:$0xff] %vm2088_vm12, %v2087_v61  ;;  %v5561_v10 = vmul.f32 0.0009765625, %v2087_v61  ;;  %v2551_v11 = vsub.f32 %v2495_v17, %v5546_v60  ;;  %v2552_v12 = vsub.f32 %v2497_v20, %v5546_v60  ;;  %v2553_v13 = vsub.f32 %v5499_v22, %v5546_v60 }
 0x2a6   : > { %v3020_v14 = vsub.f32 %v2964_v51, %v5546_v60  ;;  %v3021_v30 = vsub.f32 %v2966_v55, %v5546_v60  ;;  %v3022_v15 = vsub.f32 %v5507_v21, %v5546_v60  ;;  %v3489_v16 = vsub.f32 %v5519_v0, %v5546_v60 }
 0x2a7   : > { %v2574_v18 = vmul.f32 %v2562_v58, %v2551_v11  ;;  %v2575_v19 = vmul.f32 %v2566_v26, %v2552_v12  ;;  %v2576_v23 = vmul.f32 %v2570_v59, %v2553_v13  ;;  %v2554_v25 = vsub.f32 %v5503_v28, %v5561_v10 }
 0x2a8   : > { %v2555_v17 = vsub.f32 %v5505_v29, %v5561_v10  ;;  %v2556_v22 = vsub.f32 %v5501_v24, %v5561_v10  ;;  %v3043_v20 = vmul.f32 %v3031_v27, %v3020_v14  ;;  %v3044_v31 = vmul.f32 %v3035_v62, %v3021_v30 }
 0x2a9   : > { %v2580_v50 = vmul.f32 %v2574_v18, %v2574_v18  ;;  %v2581_v51 = vmul.f32 %v2575_v19, %v2575_v19  ;;  %v2582_v21 = vmul.f32 %v2576_v23, %v2576_v23  ;;  %v2577_v55 = vmul.f32 %v2562_v58, %v2554_v25 }
 0x2aa   : > { %v2578_v38 = vmul.f32 %v2566_v26, %v2555_v17  ;;  %v2579_v35 = vmul.f32 %v2570_v59, %v2556_v22  ;;  %v3045_v0 = vmul.f32 %v3039_v63, %v3022_v15  ;;  %v3049_v41 = vmul.f32 %v3043_v20, %v3043_v20 }
 0x2ab   : > { %v2586_v45 = vadd.f32 %v2581_v51, %v2580_v50  ;;  %v2587_v46 = vsel %vm702_vm11, %v2582_v21, 0.0  ;;  %v2583_v28 = vmul.f32 %v2577_v55, %v2577_v55  ;;  %v3050_v5 = vmul.f32 %v3044_v31, %v3044_v31 }
 0x2ac   : > { %v2584_v6 = vmul.f32 %v2578_v38, %v2578_v38  ;;  %v2585_v29 = vmul.f32 %v2579_v35, %v2579_v35  ;;  %v3051_v47 = vmul.f32 %v3045_v0, %v3045_v0  ;;  %v3023_v24 = vsub.f32 %v5511_v36, %v5561_v10 }
 0x2ad   : > { %v2588_v39 = vadd.f32 %v2587_v46, %v2586_v45  ;;  %v3055_v48 = vadd.f32 %v3050_v5, %v3049_v41  ;;  %v3024_v32 = vsub.f32 %v5513_v37, %v5561_v10  ;;  %v3025_v1 = vsub.f32 %v5509_v33, %v5561_v10 }
 0x2ae   : > { %v2591_v49 = vadd.f32 %v2584_v6, %v2583_v28  ;;  %v2592_v52 = vsel %vm702_vm11, %v2585_v29, 0.0  ;;  %v3056_v53 = vsel %vm702_vm11, %v3051_v47, 0.0  ;;  %v3046_v54 = vmul.f32 %v3031_v27, %v3023_v24 }
 0x2af   : > { %2589 = vadd.xlane.f32.xlu1 %v2588_v39  ;;  %v3057_v56 = vadd.f32 %v3056_v53, %v3055_v48  ;;  %v3047_v57 = vmul.f32 %v3035_v62, %v3024_v32  ;;  %v3048_v58 = vmul.f32 %v3039_v63, %v3025_v1  ;;  %v3490_v36 = vsub.f32 %v5521_v42, %v5546_v60 }
 0x2b0   : > { %v2593_v26 = vadd.f32 %v2592_v52, %v2591_v49  ;;  %v3052_v59 = vmul.f32 %v3046_v54, %v3046_v54  ;;  %v3491_v37 = vsub.f32 %v5515_v34, %v5546_v60  ;;  %v3512_v33 = vmul.f32 %v5552_v2, %v3489_v16 }
 0x2b1   : > { %v3053_v61 = vmul.f32 %v3047_v57, %v3047_v57  ;;  %v3054_v11 = vmul.f32 %v3048_v58, %v3048_v58  ;;  %v3513_v12 = vmul.f32 %v5555_v7, %v3490_v36  ;;  %v3492_v27 = vsub.f32 %v5523_v43, %v5561_v10 }
 0x2b2   : > { %2594 = vadd.xlane.f32.xlu0 %v2593_v26  ;;  %v3514_v62 = vmul.f32 %v5558_v8, %v3491_v37  ;;  %v3518_v63 = vmul.f32 %v3512_v33, %v3512_v33  ;;  %v3493_v42 = vsub.f32 %v5525_v44, %v5561_v10  ;;  %v3494_v13 = vsub.f32 %v5517_v40, %v5561_v10  ;;  %v4287_v44 = vld [vmem:[%s5633_s2 + $0x9] sm:$0x7] }
 0x2b3   : > { %3058 = vadd.xlane.f32.xlu1 %v3057_v56  ;;  %v3060_v34 = vadd.f32 %v3053_v61, %v3052_v59  ;;  %v3061_v14 = vsel %vm702_vm11, %v3054_v11, 0.0  ;;  %v3519_v30 = vmul.f32 %v3513_v12, %v3513_v12  ;;  %v3515_v15 = vmul.f32 %v5552_v2, %v3492_v27 }
 0x2b4   : > { %v3520_v16 = vmul.f32 %v3514_v62, %v3514_v62  ;;  %v3516_v43 = vmul.f32 %v5555_v7, %v3493_v42  ;;  %v3517_v18 = vmul.f32 %v5558_v8, %v3494_v13  ;;  %v3960_v8 = vrot.slane %v4287_v44, %v5349_v3 }
 0x2b5   : > { %v3062_v19 = vadd.f32 %v3061_v14, %v3060_v34  ;;  %v3928_v23 = vpop.f32.mrb[28].mxu1  ;;  %v3524_v25 = vadd.f32 %v3519_v30, %v3518_v63  ;;  %v3521_v40 = vmul.f32 %v3515_v15, %v3515_v15  ;;  %v3952_v0 = vrot.slane %v4287_v44, %v5351_v4 }
 0x2b6   : > { %v4546_v17 = vpop.f32.mrb[29].mxu1  ;;  %v3525_v22 = vsel %vm702_vm11, %v3520_v16, 0.0  ;;  %v3522_v20 = vmul.f32 %v3516_v43, %v3516_v43  ;;  %v3523_v31 = vmul.f32 %v3517_v18, %v3517_v18  ;;  %v3943_v7 = vsub.f32 %v3928_v23, %v5546_v60 }
 0x2b7   : > { %3063 = vadd.xlane.f32.xlu0 %v3062_v19  ;;  %v3526_v2 = vadd.f32 %v3525_v22, %v3524_v25  ;;  %v3931_v50 = vpop.f32.mrb[30].mxu1  ;;  %v3956_v45 = vrot.slane %v4287_v44, %v5357_v9 }
 0x2b8   : > { %v4547_v51 = vpop.f32.mrb[31].mxu1  ;;  %v3529_v21 = vadd.f32 %v3522_v20, %v3521_v40  ;;  %v3530_v55 = vsel %vm702_vm11, %v3523_v31, 0.0  ;;  %v3946_v38 = vsub.f32 %v3931_v50, %v5561_v10  ;;  %v3966_v46 = vmul.f32 %v3960_v8, %v3943_v7 }
 0x2b9   : > { %3527 = vadd.xlane.f32.xlu1 %v3526_v2 }
 0x2ba   : > { %v3531_v35 = vadd.f32 %v3530_v55, %v3529_v21  ;;  %v3969_v29 = vmul.f32 %v3960_v8, %v3946_v38  ;;  %v3972_v4 = vmul.f32 %v3966_v46, %v3966_v46 }
 0x2bb   : > { %v3885_v41 = vpop.f32.mrb[28].mxu0 }
 0x2bc   : > { %3532 = vadd.xlane.f32.xlu0 %v3531_v35  ;;  %v3941_v28 = vsub.f32 %v3885_v41, %v5546_v60  ;;  %v3887_v5 = vpop.f32.mrb[29].mxu0  ;;  %v3975_v53 = vmul.f32 %v3969_v29, %v3969_v29 }
 0x2bd   : > { %v3942_v3 = vsub.f32 %v3887_v5, %v5546_v60  ;;  %v3889_v6 = vpop.f32.mrb[30].mxu0  ;;  %v3977_v60 = vsel %vm702_vm11, %v3972_v4, 0.0 }
 0x2be   : > { %v3964_v47 = vmul.f32 %v3952_v0, %v3941_v28  ;;  %v3944_v24 = vsub.f32 %v3889_v6, %v5561_v10  ;;  %v3891_v39 = vpop.f32.mrb[31].mxu0  ;;  %v3982_v26 = vsel %vm702_vm11, %v3975_v53, 0.0 }
 0x2bf   : > { %v3965_v48 = vmul.f32 %v3956_v45, %v3942_v3  ;;  %v3945_v32 = vsub.f32 %v3891_v39, %v5561_v10 }
 0x2c0   : > { %v3970_v1 = vmul.f32 %v3964_v47, %v3964_v47  ;;  %v3967_v49 = vmul.f32 %v3952_v0, %v3944_v24 }
 0x2c1   : > { %v3971_v9 = vmul.f32 %v3965_v48, %v3965_v48  ;;  %v3968_v52 = vmul.f32 %v3956_v45, %v3945_v32 }
 0x2c2   : > { %v3973_v54 = vmul.f32 %v3967_v49, %v3967_v49 }
 0x2c3   : > { %v3974_v56 = vmul.f32 %v3968_v52, %v3968_v52  ;;  %v3976_v57 = vadd.f32 %v3971_v9, %v3970_v1 }
 0x2c5   : > { %v3978_v58 = vadd.f32 %v3977_v60, %v3976_v57  ;;  %v3981_v36 = vadd.f32 %v3974_v56, %v3973_v54 }
 0x2c7   : > { %3979 = vadd.xlane.f32.xlu1 %v3978_v58  ;;  %v3983_v59 = vadd.f32 %v3982_v26, %v3981_v36 }
 0x2c9   : > { %3984 = vadd.xlane.f32.xlu0 %v3983_v59 }
 0x33c   : > { %v2590_v10 = vpop.xlane.xlu1 %2589 }
 0x33f   : > { %v2595_v37 = vpop.xlane.xlu0 %2594 }
 0x340   : > { %v3059_v33 = vpop.xlane.xlu1 %3058 }
 0x341   : > { %v3065_v12 = vadd.f32 %v3059_v33, %v2590_v10 }
 0x344   : > { %v3064_v61 = vpop.xlane.xlu0 %3063 }
 0x345   : > { %v3066_v62 = vadd.f32 %v3064_v61, %v2595_v37 }
 0x346   : > { %v3528_v11 = vpop.xlane.xlu1 %3527 }
 0x347   : > { %v3534_v63 = vadd.f32 %v3528_v11, %v3065_v12 }
 0x349   : > { %v3533_v27 = vpop.xlane.xlu0 %3532 }
 0x34a   : > { %v3535_v13 = vadd.f32 %v3533_v27, %v3066_v62 }
 0x354   : > { %v3980_v42 = vpop.xlane.xlu1 %3979 }
 0x355   : > { %v3986_v34 = vadd.f32 %v3980_v42, %v3534_v63 }
 0x356   : > { %v3985_v14 = vpop.xlane.xlu0 %3984 }
 0x357   : > { %3988 = vst.msk [vmem:[%s210_s19] sm:$0xff] %vm2088_vm12, %v3986_v34  ;;  %v3987_v30 = vadd.f32 %v3985_v14, %v3535_v13 }
 0x359   : > { %3989 = vst.msk [vmem:[%s210_s19 + $0x8] sm:$0xff] %vm2088_vm12, %v3987_v30 }
 0x35a PF: > { %s15_s15 = sadd.s32 1, %s4802_s15  }
 0x35b   : > { %p12_p4 = scmp.ge.s32.totalorder %s15_s15, 4  }
 0x35d   :  { %14 = sbr.rel (!%p12_p4) target bundleno = 1 (0x1), region = 92 }

</bundles_post_ra>
